<compile_context>
chip_gen: v7x
topology: tpu7x:2x2x1
jax: 0.10.0
libtpu: 0.0.40
codegen_flags: <defaults>
</compile_context>

<pallas_src>
import jax
import jax.numpy as jnp
import numpy as np
from jax.experimental import pallas as pl
from jax.experimental.pallas import tpu as pltpu

NUM_UPSAMPLING = 4
THRESH = 0.0
MAX_FEATURES = None
FEAT_DIM = 32            # descriptor dim, same for early / middle / deep
PACK_W = 4 * FEAT_DIM    # 128-lane packed slab: 96 features + 3 scores + pad
MAX_TILE_P = 1024        # pixel-tile rows; safe for v7x 64 MiB VMEM


class EmptyTensorError(Exception):
    pass


def _round_up(x, m):
    return ((x + m - 1) // m) * m


# ----------------------------------------------------------------------------
# Pallas kernel 1: fused feature encoder + attention detection heads
#   (pixels, 3) -> packed (pixels, 128):
#     [:, 0:32]  early,  [:, 32:64] middle,  [:, 64:96] deep,
#     [:, 96:99] softplus detection scores (early/middle/deep), rest unused.
# ----------------------------------------------------------------------------
def _fused_encoder_kernel(x_ref, we_ref, be_ref, wm_ref, bm_ref,
                          wd_ref, bd_ref, wa_ref, ba_ref, o_ref):
    x = x_ref[...]
    early = jnp.maximum(
        jnp.dot(x, we_ref[...], preferred_element_type=jnp.float32) + be_ref[...], 0.0)
    middle = jnp.maximum(
        jnp.dot(early, wm_ref[...], preferred_element_type=jnp.float32) + bm_ref[...], 0.0)
    deep = jnp.maximum(
        jnp.dot(middle, wd_ref[...], preferred_element_type=jnp.float32) + bd_ref[...], 0.0)
    feats = jnp.concatenate([early, middle, deep], axis=-1)            # (T, 96)
    # all 3 detection heads in one block-diagonal matmul (lane-dense output)
    z = jnp.dot(feats, wa_ref[...], preferred_element_type=jnp.float32) + ba_ref[...]
    dets = jnp.maximum(z, 0.0) + jnp.log1p(jnp.exp(-jnp.abs(z)))       # softplus
    o_ref[...] = jnp.concatenate([feats, dets], axis=-1)               # (T, 128)


def fused_encoder_detection(x_pc, we, be, wm, bm, wd, bd, wa, ba):
    P, cin = x_pc.shape
    p8 = _round_up(P, 8)
    tile_p = min(MAX_TILE_P, p8)
    p_pad = _round_up(p8, tile_p)
    if p_pad != P:
        x_pc = jnp.pad(x_pc, ((0, p_pad - P), (0, 0)))
    num_tiles = p_pad // tile_p
    out = pl.pallas_call(
        _fused_encoder_kernel,
        out_shape=jax.ShapeDtypeStruct((p_pad, PACK_W), jnp.float32),
        grid=(num_tiles,),
        in_specs=[
            pl.BlockSpec((tile_p, cin), lambda i: (i, 0)),
            pl.BlockSpec((cin, FEAT_DIM), lambda i: (0, 0)),
            pl.BlockSpec((1, FEAT_DIM), lambda i: (0, 0)),
            pl.BlockSpec((FEAT_DIM, FEAT_DIM), lambda i: (0, 0)),
            pl.BlockSpec((1, FEAT_DIM), lambda i: (0, 0)),
            pl.BlockSpec((FEAT_DIM, FEAT_DIM), lambda i: (0, 0)),
            pl.BlockSpec((1, FEAT_DIM), lambda i: (0, 0)),
            pl.BlockSpec((3 * FEAT_DIM, FEAT_DIM), lambda i: (0, 0)),
            pl.BlockSpec((1, FEAT_DIM), lambda i: (0, 0)),
        ],
        out_specs=pl.BlockSpec((tile_p, PACK_W), lambda i: (i, 0)),
        compiler_params=pltpu.CompilerParams(dimension_semantics=("parallel",)),
    )(x_pc, we, be, wm, bm, wd, bd, wa, ba)
    return out[:P]


# ----------------------------------------------------------------------------
# Pallas kernel 2: fused NMS (MaxPool2d(3,1,1) local-max test) + handcrafted
# localization stencil, batched over all scales x batch on the leading axis.
# Input is zero-padded by 2; NMS is computed on the extended (H+2, W+2) region
# so the localization stencil sees an exact zero ring around the NMS'd map.
# ----------------------------------------------------------------------------
def _nms_loc_kernel(xp_ref, nms_ref, oi_ref, oj_ref):
    B, hp, wp = xp_ref.shape
    H, W = hp - 4, wp - 4
    hext, wext = H + 2, W + 2
    xp = xp_ref[...]

    # --- NMS over the extended region --------------------------------------
    def ve(di, dj):
        return xp[:, 1 + di:1 + di + hext, 1 + dj:1 + dj + wext]

    c = ve(0, 0)
    m = c
    for di in (-1, 0, 1):
        for dj in (-1, 0, 1):
            if di == 0 and dj == 0:
                continue
            m = jnp.maximum(m, ve(di, dj))
    # softplus scores are strictly > 0, so zero padding is equivalent to the
    # -inf padding of nn.MaxPool2d here, and the extended ring collapses to 0.
    nms_ext = jnp.where(m == c, c, 0.0)                 # (B, H+2, W+2)
    nms_ref[...] = nms_ext[:, 1:1 + H, 1:1 + W]

    # --- handcrafted localization on the NMS'd map (matches in-place torch) --
    def v(di, dj):
        return nms_ext[:, 1 + di:1 + di + H, 1 + dj:1 + dj + W]

    x = v(0, 0)
    d_i = 0.5 * (v(1, 0) - v(-1, 0))
    d_j = 0.5 * (v(0, 1) - v(0, -1))
    dii = v(1, 0) - 2.0 * x + v(-1, 0)
    djj = v(0, 1) - 2.0 * x + v(0, -1)
    dij = 0.25 * (v(-1, -1) - v(-1, 1) - v(1, -1) + v(1, 1))
    det = dii * djj - dij * dij
    # det == 0 -> Inf/NaN displacements; rejected downstream by |.| < 0.5 mask
    # (mirrors the PyTorch divide-by-zero behavior).
    rdet = pl.reciprocal(det, approx=True)
    inv00 = djj * rdet
    inv01 = -dij * rdet
    inv11 = dii * rdet
    oi_ref[...] = -(inv00 * d_i + inv01 * d_j)
    oj_ref[...] = -(inv01 * d_i + inv11 * d_j)


def nms_and_localization(dmaps):
    """dmaps: (B, H, W) -> (nms_map, step_i, step_j), each (B, H, W)."""
    B, H, W = dmaps.shape
    xp = jnp.pad(dmaps, ((0, 0), (2, 2), (2, 2)))
    return pl.pallas_call(
        _nms_loc_kernel,
        out_shape=(jax.ShapeDtypeStruct((B, H, W), jnp.float32),) * 3,
        grid=(1,),
        in_specs=[pl.BlockSpec((B, H + 4, W + 4), lambda i: (0, 0, 0))],
        out_specs=(pl.BlockSpec((B, H, W), lambda i: (0, 0, 0)),) * 3,
    )(xp)


# ----------------------------------------------------------------------------
# Dense device prefix (single jit, two Pallas kernels)
# ----------------------------------------------------------------------------
@jax.jit
def dense_prefix(images, params):
    n, c_img, H, W = images.shape
    s = 2 ** NUM_UPSAMPLING
    h, w = H // s, W // s

    # 16x average-pool downsample (feature-encoder stem stand-in), then the
    # fused 1x1-conv encoder + detection heads on a (pixels, channels) layout.
    x_ds = images.reshape(n, c_img, h, s, w, s).mean(axis=(3, 5))
    x_pc = jnp.transpose(x_ds, (0, 2, 3, 1)).reshape(n * h * w, c_img)

    # block-diagonal detection-head weights: one matmul for all 3 heads
    wa = jnp.zeros((3 * FEAT_DIM, FEAT_DIM), jnp.float32)
    wa = wa.at[0:FEAT_DIM, 0:1].set(params["Ae"])
    wa = wa.at[FEAT_DIM:2 * FEAT_DIM, 1:2].set(params["Am"])
    wa = wa.at[2 * FEAT_DIM:3 * FEAT_DIM, 2:3].set(params["Ad"])
    ba = jnp.zeros((1, FEAT_DIM), jnp.float32)
    ba = ba.at[0, 0].set(params["ae"][0])
    ba = ba.at[0, 1].set(params["am"][0])
    ba = ba.at[0, 2].set(params["ad"][0])

    packed = fused_encoder_detection(
        x_pc,
        params["We"], params["be"].reshape(1, FEAT_DIM),
        params["Wm"], params["bm"].reshape(1, FEAT_DIM),
        params["Wd"], params["bd"].reshape(1, FEAT_DIM),
        wa, ba)                                           # (P, 128)
    packed = packed.reshape(n, h, w, PACK_W)

    # dense features of image 0 (only image 0 is consumed downstream)
    dense0 = jnp.transpose(packed[0, :, :, :3 * FEAT_DIM], (2, 0, 1))
    dense0 = dense0.reshape(3, FEAT_DIM, h, w)            # (scale, C, h, w)

    # detection score maps for all scales & batch -> fused NMS + localization
    dets = jnp.transpose(packed[..., 3 * FEAT_DIM:3 * FEAT_DIM + 3], (3, 0, 1, 2))
    dmaps = dets.reshape(3 * n, h, w)
    nms_map, step_i, step_j = nms_and_localization(dmaps)
    nms_map = nms_map.reshape(3, n, h, w)
    step_i = step_i.reshape(3, n, h, w)
    step_j = step_j.reshape(3, n, h, w)

    # downstream (keypoints / descriptors / scores / det_maps) uses image 0
    return dense0, nms_map[:, 0], step_i[:, 0], step_j[:, 0]


# ----------------------------------------------------------------------------
# Host-side data-dependent tail (mirrors the .cpu() path of the reference)
# ----------------------------------------------------------------------------
def interpolate_dense_features(pos, dense_features):
    """pos: (2, K) float, dense_features: (C, h, w). Bilinear descriptor gather."""
    if pos.shape[1] == 0:
        raise EmptyTensorError
    ids = np.arange(pos.shape[1])
    _, h, w = dense_features.shape
    i, j = pos[0], pos[1]
    i_tl = np.floor(i).astype(np.int32)
    j_tl = np.floor(j).astype(np.int32)
    i_br = np.ceil(i).astype(np.int32)
    j_br = np.ceil(j).astype(np.int32)
    valid = (i_tl >= 0) & (j_tl >= 0) & (i_br <= h - 1) & (j_br <= w - 1)
    if not np.any(valid):
        raise EmptyTensorError
    ids = ids[valid]
    i, j = i[valid], j[valid]
    i_tl, j_tl, i_br, j_br = i_tl[valid], j_tl[valid], i_br[valid], j_br[valid]
    dist_i = i - i_tl
    dist_j = j - j_tl
    w_tl = (1 - dist_i) * (1 - dist_j)
    w_tr = (1 - dist_i) * dist_j
    w_bl = dist_i * (1 - dist_j)
    w_br = dist_i * dist_j
    descriptors = (w_tl[None] * dense_features[:, i_tl, j_tl]
                   + w_tr[None] * dense_features[:, i_tl, j_br]
                   + w_bl[None] * dense_features[:, i_br, j_tl]
                   + w_br[None] * dense_features[:, i_br, j_br])
    pos_out = np.stack([i, j], axis=0)
    return descriptors, pos_out, ids


def upscale_positions(pos, scaling_steps):
    for _ in range(scaling_steps):
        pos = pos * 2.0 + 0.5
    return pos


def init_params(key):
    ks = jax.random.split(key, 12)
    def w(k, shape, scale):
        return (scale * jax.random.normal(k, shape)).astype(jnp.float32)
    return {
        # synthetic feature encoder (attention_model.feature_encoder): three
        # 1x1 conv + ReLU stages producing early / middle / deep maps
        "We": w(ks[0], (3, FEAT_DIM), 0.4), "be": w(ks[1], (FEAT_DIM,), 0.1),
        "Wm": w(ks[2], (FEAT_DIM, FEAT_DIM), 0.25), "bm": w(ks[3], (FEAT_DIM,), 0.1),
        "Wd": w(ks[4], (FEAT_DIM, FEAT_DIM), 0.25), "bd": w(ks[5], (FEAT_DIM,), 0.1),
        # attention detection heads (DetectionModule scores): 1x1 conv -> softplus
        "Ae": w(ks[6], (FEAT_DIM, 1), 0.4), "ae": w(ks[7], (1,), 0.1),
        "Am": w(ks[8], (FEAT_DIM, 1), 0.4), "am": w(ks[9], (1,), 0.1),
        "Ad": w(ks[10], (FEAT_DIM, 1), 0.4), "ad": w(ks[11], (1,), 0.1),
    }


def extraction_model_forward(images, params):
    # --- dense device prefix: one jit, two fused Pallas kernels, one D2H ----
    dense0, nms0, step_i0, step_j0 = jax.device_get(dense_prefix(images, params))

    # TODO(synk): HardDetectionModule (d2-net) branch not implemented; it is
    # inactive for default flags (use_d2net_detection=False, mult_with_d2=False).

    keyp_all, desc_all, score_all, det_maps = [], [], [], []
    for sidx in range(3):
        d0 = nms0[sidx]                                   # == detections[s][0, 0]
        det_maps.append(np.array(d0))

        # torch.nonzero(d[0]).t(): channel column is identically 0
        ii, jj = np.nonzero(d0)
        d_i = step_i0[sidx][ii, jj]
        d_j = step_j0[sidx][ii, jj]
        mask = (np.abs(d_i) < 0.5) & (np.abs(d_j) < 0.5)  # rejects NaN/Inf too
        ii, jj = ii[mask], jj[mask]
        d_i, d_j = d_i[mask], d_j[mask]
        fmap_kp = np.stack([ii.astype(np.float32) + d_i,
                            jj.astype(np.float32) + d_j], axis=0)

        try:
            rd, _, ids = interpolate_dense_features(fmap_kp, dense0[sidx])
        except EmptyTensorError:
            # torch appends None here; degrade gracefully with empty outputs.
            keyp_all.append(np.zeros((0, 2), np.float32))
            desc_all.append(np.zeros((0, FEAT_DIM), np.float32))
            score_all.append(np.zeros((0,), np.float32))
            continue

        ii, jj = ii[ids], jj[ids]
        fmap_kp = fmap_kp[:, ids]
        kp = upscale_positions(fmap_kp, NUM_UPSAMPLING)

        norm = np.sqrt(np.sum(rd * rd, axis=0, keepdims=True))  # F.normalize(dim=0)
        desc = rd / np.maximum(norm, 1e-12)
        sc = d0[ii, jj]

        keyp_all.append(kp.T)
        desc_all.append(desc.T)
        score_all.append(sc)

    keypoints = np.concatenate(keyp_all, axis=0)
    descriptors = np.concatenate(desc_all, axis=0)
    scores = np.concatenate(score_all, axis=0)

    idx = np.argsort(-scores)            # descending sort
    scores = scores[idx]
    descriptors = descriptors[idx, :]
    keypoints = keypoints[idx, :]

    if THRESH != 0 or MAX_FEATURES is not None:
        m = scores >= THRESH
        scores, descriptors, keypoints = scores[m], descriptors[m, :], keypoints[m, :]
        if MAX_FEATURES is not None and scores.shape[0] > MAX_FEATURES:
            scores = scores[:MAX_FEATURES]
            keypoints = keypoints[:MAX_FEATURES, :]
            descriptors = descriptors[:MAX_FEATURES, :]

    keypoints = keypoints[:, [1, 0]]     # (i, j) -> (x, y)
    return (jnp.asarray(keypoints), jnp.asarray(descriptors),
            jnp.asarray(scores), det_maps)


if __name__ == "__main__":
    key = jax.random.PRNGKey(0)
    k_img, k_par = jax.random.split(key)
    images = jax.random.normal(k_img, (2, 3, 128, 128), dtype=jnp.float32)
    params = init_params(k_par)

    keypoints, descriptors, scores, det_maps = extraction_model_forward(images, params)
    jax.block_until_ready((keypoints, descriptors, scores))
    print("KERNEL_OK")
</pallas_src>

<mosaic_0001>
module attributes {stable_mosaic.version = 11 : i64} {
  func.func @_fused_encoder_kernel(%arg0: i32, %arg1: memref<128x3xf32, #tpu.memory_space<vmem>>, %arg2: memref<3x32xf32, #tpu.memory_space<vmem>>, %arg3: memref<1x32xf32, #tpu.memory_space<vmem>>, %arg4: memref<32x32xf32, #tpu.memory_space<vmem>>, %arg5: memref<1x32xf32, #tpu.memory_space<vmem>>, %arg6: memref<32x32xf32, #tpu.memory_space<vmem>>, %arg7: memref<1x32xf32, #tpu.memory_space<vmem>>, %arg8: memref<96x32xf32, #tpu.memory_space<vmem>>, %arg9: memref<1x32xf32, #tpu.memory_space<vmem>>, %arg10: memref<128x128xf32, #tpu.memory_space<vmem>>) attributes {dimension_semantics = [#tpu.dimension_semantics<parallel>], iteration_bounds = array<i64: 1>, scalar_prefetch = 0 : i64, scratch_operands = 0 : i64, tpu.core_type = #tpu.core_type<tc>, window_params = [{transform_indices = @transform_0, window_bounds = array<i64: 128, 3>}, {pipeline_mode = #tpu.pipeline_mode<synchronous>, transform_indices = @transform_1, window_bounds = array<i64: 3, 32>}, {pipeline_mode = #tpu.pipeline_mode<synchronous>, transform_indices = @transform_2, window_bounds = array<i64: 1, 32>}, {pipeline_mode = #tpu.pipeline_mode<synchronous>, transform_indices = @transform_3, window_bounds = array<i64: 32, 32>}, {pipeline_mode = #tpu.pipeline_mode<synchronous>, transform_indices = @transform_4, window_bounds = array<i64: 1, 32>}, {pipeline_mode = #tpu.pipeline_mode<synchronous>, transform_indices = @transform_5, window_bounds = array<i64: 32, 32>}, {pipeline_mode = #tpu.pipeline_mode<synchronous>, transform_indices = @transform_6, window_bounds = array<i64: 1, 32>}, {pipeline_mode = #tpu.pipeline_mode<synchronous>, transform_indices = @transform_7, window_bounds = array<i64: 96, 32>}, {pipeline_mode = #tpu.pipeline_mode<synchronous>, transform_indices = @transform_8, window_bounds = array<i64: 1, 32>}, {transform_indices = @transform_9, window_bounds = array<i64: 128, 128>}]} {
    %c0 = arith.constant 0 : index
    %c0_0 = arith.constant 0 : index
    %0 = vector.load %arg1[%c0, %c0_0] : memref<128x3xf32, #tpu.memory_space<vmem>>, vector<128x3xf32>
    %c0_1 = arith.constant 0 : index
    %c0_2 = arith.constant 0 : index
    %1 = vector.load %arg2[%c0_1, %c0_2] : memref<3x32xf32, #tpu.memory_space<vmem>>, vector<3x32xf32>
    %cst = arith.constant dense<0.000000e+00> : vector<128x32xf32>
    %2 = tpu.matmul %0, %1, %cst {dimension_numbers = #tpu.dot_dimension_numbers<[1], [0], [0], [1], [0, 0, 1, 1], [], []>} : vector<128x3xf32>, vector<3x32xf32>, vector<128x32xf32> -> vector<128x32xf32>
    %c0_3 = arith.constant 0 : index
    %c0_4 = arith.constant 0 : index
    %3 = vector.load %arg3[%c0_3, %c0_4] : memref<1x32xf32, #tpu.memory_space<vmem>>, vector<1x32xf32>
    %4 = vector.broadcast %3 : vector<1x32xf32> to vector<128x32xf32>
    %5 = arith.addf %2, %4 : vector<128x32xf32>
    %cst_5 = arith.constant 0.000000e+00 : f32
    %6 = vector.broadcast %cst_5 : f32 to vector<128x32xf32>
    %7 = arith.maximumf %5, %6 : vector<128x32xf32>
    %c0_6 = arith.constant 0 : index
    %c0_7 = arith.constant 0 : index
    %8 = vector.load %arg4[%c0_6, %c0_7] : memref<32x32xf32, #tpu.memory_space<vmem>>, vector<32x32xf32>
    %cst_8 = arith.constant dense<0.000000e+00> : vector<128x32xf32>
    %9 = tpu.matmul %7, %8, %cst_8 {dimension_numbers = #tpu.dot_dimension_numbers<[1], [0], [0], [1], [0, 0, 1, 1], [], []>} : vector<128x32xf32>, vector<32x32xf32>, vector<128x32xf32> -> vector<128x32xf32>
    %c0_9 = arith.constant 0 : index
    %c0_10 = arith.constant 0 : index
    %10 = vector.load %arg5[%c0_9, %c0_10] : memref<1x32xf32, #tpu.memory_space<vmem>>, vector<1x32xf32>
    %11 = vector.broadcast %10 : vector<1x32xf32> to vector<128x32xf32>
    %12 = arith.addf %9, %11 : vector<128x32xf32>
    %cst_11 = arith.constant 0.000000e+00 : f32
    %13 = vector.broadcast %cst_11 : f32 to vector<128x32xf32>
    %14 = arith.maximumf %12, %13 : vector<128x32xf32>
    %c0_12 = arith.constant 0 : index
    %c0_13 = arith.constant 0 : index
    %15 = vector.load %arg6[%c0_12, %c0_13] : memref<32x32xf32, #tpu.memory_space<vmem>>, vector<32x32xf32>
    %cst_14 = arith.constant dense<0.000000e+00> : vector<128x32xf32>
    %16 = tpu.matmul %14, %15, %cst_14 {dimension_numbers = #tpu.dot_dimension_numbers<[1], [0], [0], [1], [0, 0, 1, 1], [], []>} : vector<128x32xf32>, vector<32x32xf32>, vector<128x32xf32> -> vector<128x32xf32>
    %c0_15 = arith.constant 0 : index
    %c0_16 = arith.constant 0 : index
    %17 = vector.load %arg7[%c0_15, %c0_16] : memref<1x32xf32, #tpu.memory_space<vmem>>, vector<1x32xf32>
    %18 = vector.broadcast %17 : vector<1x32xf32> to vector<128x32xf32>
    %19 = arith.addf %16, %18 : vector<128x32xf32>
    %cst_17 = arith.constant 0.000000e+00 : f32
    %20 = vector.broadcast %cst_17 : f32 to vector<128x32xf32>
    %21 = arith.maximumf %19, %20 : vector<128x32xf32>
    %22 = tpu.concatenate %7, %14, %21 in 1 : vector<128x32xf32>, vector<128x32xf32>, vector<128x32xf32> -> vector<128x96xf32>
    %c0_18 = arith.constant 0 : index
    %c0_19 = arith.constant 0 : index
    %23 = vector.load %arg8[%c0_18, %c0_19] : memref<96x32xf32, #tpu.memory_space<vmem>>, vector<96x32xf32>
    %cst_20 = arith.constant dense<0.000000e+00> : vector<128x32xf32>
    %24 = tpu.matmul %22, %23, %cst_20 {dimension_numbers = #tpu.dot_dimension_numbers<[1], [0], [0], [1], [0, 0, 1, 1], [], []>} : vector<128x96xf32>, vector<96x32xf32>, vector<128x32xf32> -> vector<128x32xf32>
    %c0_21 = arith.constant 0 : index
    %c0_22 = arith.constant 0 : index
    %25 = vector.load %arg9[%c0_21, %c0_22] : memref<1x32xf32, #tpu.memory_space<vmem>>, vector<1x32xf32>
    %26 = vector.broadcast %25 : vector<1x32xf32> to vector<128x32xf32>
    %27 = arith.addf %24, %26 : vector<128x32xf32>
    %cst_23 = arith.constant 0.000000e+00 : f32
    %28 = vector.broadcast %cst_23 : f32 to vector<128x32xf32>
    %29 = arith.maximumf %27, %28 : vector<128x32xf32>
    %30 = math.absf %27 : vector<128x32xf32>
    %cst_24 = arith.constant 0.000000e+00 : f32
    %31 = vector.broadcast %cst_24 : f32 to vector<128x32xf32>
    %32 = arith.subf %31, %30 : vector<128x32xf32>
    %33 = math.exp %32 : vector<128x32xf32>
    %34 = math.log1p %33 : vector<128x32xf32>
    %35 = arith.addf %29, %34 : vector<128x32xf32>
    %36 = tpu.concatenate %22, %35 in 1 : vector<128x96xf32>, vector<128x32xf32> -> vector<128x128xf32>
    %c0_25 = arith.constant 0 : index
    %c0_26 = arith.constant 0 : index
    %37 = vector.load %arg10[%c0_25, %c0_26] : memref<128x128xf32, #tpu.memory_space<vmem>>, vector<128x128xf32>
    tpu.vector_store %arg10[%c0_25, %c0_26], %36 {strides = array<i32>} : memref<128x128xf32, #tpu.memory_space<vmem>>, vector<128x128xf32>,
    return
  }
  func.func @transform_0(%arg0: i32) -> (i32, i32) {
    %c0_i32 = arith.constant 0 : i32
    %c0_i32_0 = arith.constant 0 : i32
    return %arg0, %c0_i32 : i32, i32
  }
  func.func @transform_1(%arg0: i32) -> (i32, i32) {
    %c0_i32 = arith.constant 0 : i32
    %c0_i32_0 = arith.constant 0 : i32
    %c0_i32_1 = arith.constant 0 : i32
    return %c0_i32, %c0_i32_0 : i32, i32
  }
  func.func @transform_2(%arg0: i32) -> (i32, i32) {
    %c0_i32 = arith.constant 0 : i32
    %c0_i32_0 = arith.constant 0 : i32
    %c0_i32_1 = arith.constant 0 : i32
    return %c0_i32, %c0_i32_0 : i32, i32
  }
  func.func @transform_3(%arg0: i32) -> (i32, i32) {
    %c0_i32 = arith.constant 0 : i32
    %c0_i32_0 = arith.constant 0 : i32
    %c0_i32_1 = arith.constant 0 : i32
    return %c0_i32, %c0_i32_0 : i32, i32
  }
  func.func @transform_4(%arg0: i32) -> (i32, i32) {
    %c0_i32 = arith.constant 0 : i32
    %c0_i32_0 = arith.constant 0 : i32
    %c0_i32_1 = arith.constant 0 : i32
    return %c0_i32, %c0_i32_0 : i32, i32
  }
  func.func @transform_5(%arg0: i32) -> (i32, i32) {
    %c0_i32 = arith.constant 0 : i32
    %c0_i32_0 = arith.constant 0 : i32
    %c0_i32_1 = arith.constant 0 : i32
    return %c0_i32, %c0_i32_0 : i32, i32
  }
  func.func @transform_6(%arg0: i32) -> (i32, i32) {
    %c0_i32 = arith.constant 0 : i32
    %c0_i32_0 = arith.constant 0 : i32
    %c0_i32_1 = arith.constant 0 : i32
    return %c0_i32, %c0_i32_0 : i32, i32
  }
  func.func @transform_7(%arg0: i32) -> (i32, i32) {
    %c0_i32 = arith.constant 0 : i32
    %c0_i32_0 = arith.constant 0 : i32
    %c0_i32_1 = arith.constant 0 : i32
    return %c0_i32, %c0_i32_0 : i32, i32
  }
  func.func @transform_8(%arg0: i32) -> (i32, i32) {
    %c0_i32 = arith.constant 0 : i32
    %c0_i32_0 = arith.constant 0 : i32
    %c0_i32_1 = arith.constant 0 : i32
    return %c0_i32, %c0_i32_0 : i32, i32
  }
  func.func @transform_9(%arg0: i32) -> (i32, i32) {
    %c0_i32 = arith.constant 0 : i32
    %c0_i32_0 = arith.constant 0 : i32
    return %arg0, %c0_i32 : i32, i32
  }
}

module attributes {stable_mosaic.version = 11 : i64} {
  func.func @_nms_loc_kernel(%arg0: i32, %arg1: memref<6x12x12xf32, #tpu.memory_space<vmem>>, %arg2: memref<6x8x8xf32, #tpu.memory_space<vmem>>, %arg3: memref<6x8x8xf32, #tpu.memory_space<vmem>>, %arg4: memref<6x8x8xf32, #tpu.memory_space<vmem>>) attributes {dimension_semantics = [#tpu.dimension_semantics<arbitrary>], iteration_bounds = array<i64: 1>, scalar_prefetch = 0 : i64, scratch_operands = 0 : i64, tpu.core_type = #tpu.core_type<tc>, window_params = [{pipeline_mode = #tpu.pipeline_mode<synchronous>, transform_indices = @transform_0, window_bounds = array<i64: 6, 12, 12>}, {pipeline_mode = #tpu.pipeline_mode<synchronous>, transform_indices = @transform_1, window_bounds = array<i64: 6, 8, 8>}, {pipeline_mode = #tpu.pipeline_mode<synchronous>, transform_indices = @transform_2, window_bounds = array<i64: 6, 8, 8>}, {pipeline_mode = #tpu.pipeline_mode<synchronous>, transform_indices = @transform_3, window_bounds = array<i64: 6, 8, 8>}]} {
    %c0 = arith.constant 0 : index
    %c0_0 = arith.constant 0 : index
    %c0_1 = arith.constant 0 : index
    %0 = vector.load %arg1[%c0, %c0_0, %c0_1] : memref<6x12x12xf32, #tpu.memory_space<vmem>>, vector<6x12x12xf32>
    %1 = vector.extract_strided_slice %0 {offsets = [0, 1, 1], sizes = [6, 10, 10], strides = [1, 1, 1]} : vector<6x12x12xf32> to vector<6x10x10xf32>
    %2 = vector.extract_strided_slice %0 {offsets = [0, 0, 0], sizes = [6, 10, 10], strides = [1, 1, 1]} : vector<6x12x12xf32> to vector<6x10x10xf32>
    %3 = arith.maximumf %1, %2 : vector<6x10x10xf32>
    %4 = vector.extract_strided_slice %0 {offsets = [0, 0, 1], sizes = [6, 10, 10], strides = [1, 1, 1]} : vector<6x12x12xf32> to vector<6x10x10xf32>
    %5 = arith.maximumf %3, %4 : vector<6x10x10xf32>
    %6 = vector.extract_strided_slice %0 {offsets = [0, 0, 2], sizes = [6, 10, 10], strides = [1, 1, 1]} : vector<6x12x12xf32> to vector<6x10x10xf32>
    %7 = arith.maximumf %5, %6 : vector<6x10x10xf32>
    %8 = vector.extract_strided_slice %0 {offsets = [0, 1, 0], sizes = [6, 10, 10], strides = [1, 1, 1]} : vector<6x12x12xf32> to vector<6x10x10xf32>
    %9 = arith.maximumf %7, %8 : vector<6x10x10xf32>
    %10 = vector.extract_strided_slice %0 {offsets = [0, 1, 2], sizes = [6, 10, 10], strides = [1, 1, 1]} : vector<6x12x12xf32> to vector<6x10x10xf32>
    %11 = arith.maximumf %9, %10 : vector<6x10x10xf32>
    %12 = vector.extract_strided_slice %0 {offsets = [0, 2, 0], sizes = [6, 10, 10], strides = [1, 1, 1]} : vector<6x12x12xf32> to vector<6x10x10xf32>
    %13 = arith.maximumf %11, %12 : vector<6x10x10xf32>
    %14 = vector.extract_strided_slice %0 {offsets = [0, 2, 1], sizes = [6, 10, 10], strides = [1, 1, 1]} : vector<6x12x12xf32> to vector<6x10x10xf32>
    %15 = arith.maximumf %13, %14 : vector<6x10x10xf32>
    %16 = vector.extract_strided_slice %0 {offsets = [0, 2, 2], sizes = [6, 10, 10], strides = [1, 1, 1]} : vector<6x12x12xf32> to vector<6x10x10xf32>
    %17 = arith.maximumf %15, %16 : vector<6x10x10xf32>
    %18 = arith.cmpf oeq, %17, %1 : vector<6x10x10xf32>
    %cst = arith.constant 0.000000e+00 : f32
    %19 = vector.broadcast %cst : f32 to vector<6x10x10xf32>
    %20 = arith.select %18, %1, %19 : vector<6x10x10xi1>, vector<6x10x10xf32>
    %21 = vector.extract_strided_slice %20 {offsets = [0, 1, 1], sizes = [6, 8, 8], strides = [1, 1, 1]} : vector<6x10x10xf32> to vector<6x8x8xf32>
    %c0_2 = arith.constant 0 : index
    %c0_3 = arith.constant 0 : index
    %c0_4 = arith.constant 0 : index
    %22 = vector.load %arg2[%c0_2, %c0_3, %c0_4] : memref<6x8x8xf32, #tpu.memory_space<vmem>>, vector<6x8x8xf32>
    tpu.vector_store %arg2[%c0_2, %c0_3, %c0_4], %21 {strides = array<i32>} : memref<6x8x8xf32, #tpu.memory_space<vmem>>, vector<6x8x8xf32>,
    %23 = vector.extract_strided_slice %20 {offsets = [0, 1, 1], sizes = [6, 8, 8], strides = [1, 1, 1]} : vector<6x10x10xf32> to vector<6x8x8xf32>
    %24 = vector.extract_strided_slice %20 {offsets = [0, 2, 1], sizes = [6, 8, 8], strides = [1, 1, 1]} : vector<6x10x10xf32> to vector<6x8x8xf32>
    %25 = vector.extract_strided_slice %20 {offsets = [0, 0, 1], sizes = [6, 8, 8], strides = [1, 1, 1]} : vector<6x10x10xf32> to vector<6x8x8xf32>
    %26 = arith.subf %24, %25 : vector<6x8x8xf32>
    %cst_5 = arith.constant 5.000000e-01 : f32
    %27 = vector.broadcast %cst_5 : f32 to vector<6x8x8xf32>
    %28 = arith.mulf %27, %26 : vector<6x8x8xf32>
    %29 = vector.extract_strided_slice %20 {offsets = [0, 1, 2], sizes = [6, 8, 8], strides = [1, 1, 1]} : vector<6x10x10xf32> to vector<6x8x8xf32>
    %30 = vector.extract_strided_slice %20 {offsets = [0, 1, 0], sizes = [6, 8, 8], strides = [1, 1, 1]} : vector<6x10x10xf32> to vector<6x8x8xf32>
    %31 = arith.subf %29, %30 : vector<6x8x8xf32>
    %cst_6 = arith.constant 5.000000e-01 : f32
    %32 = vector.broadcast %cst_6 : f32 to vector<6x8x8xf32>
    %33 = arith.mulf %32, %31 : vector<6x8x8xf32>
    %34 = vector.extract_strided_slice %20 {offsets = [0, 2, 1], sizes = [6, 8, 8], strides = [1, 1, 1]} : vector<6x10x10xf32> to vector<6x8x8xf32>
    %cst_7 = arith.constant 2.000000e+00 : f32
    %35 = vector.broadcast %cst_7 : f32 to vector<6x8x8xf32>
    %36 = arith.mulf %35, %23 : vector<6x8x8xf32>
    %37 = arith.subf %34, %36 : vector<6x8x8xf32>
    %38 = vector.extract_strided_slice %20 {offsets = [0, 0, 1], sizes = [6, 8, 8], strides = [1, 1, 1]} : vector<6x10x10xf32> to vector<6x8x8xf32>
    %39 = arith.addf %37, %38 : vector<6x8x8xf32>
    %40 = vector.extract_strided_slice %20 {offsets = [0, 1, 2], sizes = [6, 8, 8], strides = [1, 1, 1]} : vector<6x10x10xf32> to vector<6x8x8xf32>
    %cst_8 = arith.constant 2.000000e+00 : f32
    %41 = vector.broadcast %cst_8 : f32 to vector<6x8x8xf32>
    %42 = arith.mulf %41, %23 : vector<6x8x8xf32>
    %43 = arith.subf %40, %42 : vector<6x8x8xf32>
    %44 = vector.extract_strided_slice %20 {offsets = [0, 1, 0], sizes = [6, 8, 8], strides = [1, 1, 1]} : vector<6x10x10xf32> to vector<6x8x8xf32>
    %45 = arith.addf %43, %44 : vector<6x8x8xf32>
    %46 = vector.extract_strided_slice %20 {offsets = [0, 0, 0], sizes = [6, 8, 8], strides = [1, 1, 1]} : vector<6x10x10xf32> to vector<6x8x8xf32>
    %47 = vector.extract_strided_slice %20 {offsets = [0, 0, 2], sizes = [6, 8, 8], strides = [1, 1, 1]} : vector<6x10x10xf32> to vector<6x8x8xf32>
    %48 = arith.subf %46, %47 : vector<6x8x8xf32>
    %49 = vector.extract_strided_slice %20 {offsets = [0, 2, 0], sizes = [6, 8, 8], strides = [1, 1, 1]} : vector<6x10x10xf32> to vector<6x8x8xf32>
    %50 = arith.subf %48, %49 : vector<6x8x8xf32>
    %51 = vector.extract_strided_slice %20 {offsets = [0, 2, 2], sizes = [6, 8, 8], strides = [1, 1, 1]} : vector<6x10x10xf32> to vector<6x8x8xf32>
    %52 = arith.addf %50, %51 : vector<6x8x8xf32>
    %cst_9 = arith.constant 2.500000e-01 : f32
    %53 = vector.broadcast %cst_9 : f32 to vector<6x8x8xf32>
    %54 = arith.mulf %53, %52 : vector<6x8x8xf32>
    %55 = arith.mulf %39, %45 : vector<6x8x8xf32>
    %56 = arith.mulf %54, %54 : vector<6x8x8xf32>
    %57 = arith.subf %55, %56 : vector<6x8x8xf32>
    %58 = tpu.reciprocal %57 {approx = true} : vector<6x8x8xf32> -> vector<6x8x8xf32>
    %59 = arith.mulf %45, %58 : vector<6x8x8xf32>
    %cst_10 = arith.constant 0.000000e+00 : f32
    %60 = vector.broadcast %cst_10 : f32 to vector<6x8x8xf32>
    %61 = arith.subf %60, %54 : vector<6x8x8xf32>
    %62 = arith.mulf %61, %58 : vector<6x8x8xf32>
    %63 = arith.mulf %39, %58 : vector<6x8x8xf32>
    %64 = arith.mulf %59, %28 : vector<6x8x8xf32>
    %65 = arith.mulf %62, %33 : vector<6x8x8xf32>
    %66 = arith.addf %64, %65 : vector<6x8x8xf32>
    %cst_11 = arith.constant 0.000000e+00 : f32
    %67 = vector.broadcast %cst_11 : f32 to vector<6x8x8xf32>
    %68 = arith.subf %67, %66 : vector<6x8x8xf32>
    %c0_12 = arith.constant 0 : index
    %c0_13 = arith.constant 0 : index
    %c0_14 = arith.constant 0 : index
    %69 = vector.load %arg3[%c0_12, %c0_13, %c0_14] : memref<6x8x8xf32, #tpu.memory_space<vmem>>, vector<6x8x8xf32>
    tpu.vector_store %arg3[%c0_12, %c0_13, %c0_14], %68 {strides = array<i32>} : memref<6x8x8xf32, #tpu.memory_space<vmem>>, vector<6x8x8xf32>,
    %70 = arith.mulf %62, %28 : vector<6x8x8xf32>
    %71 = arith.mulf %63, %33 : vector<6x8x8xf32>
    %72 = arith.addf %70, %71 : vector<6x8x8xf32>
    %cst_15 = arith.constant 0.000000e+00 : f32
    %73 = vector.broadcast %cst_15 : f32 to vector<6x8x8xf32>
    %74 = arith.subf %73, %72 : vector<6x8x8xf32>
    %c0_16 = arith.constant 0 : index
    %c0_17 = arith.constant 0 : index
    %c0_18 = arith.constant 0 : index
    %75 = vector.load %arg4[%c0_16, %c0_17, %c0_18] : memref<6x8x8xf32, #tpu.memory_space<vmem>>, vector<6x8x8xf32>
    tpu.vector_store %arg4[%c0_16, %c0_17, %c0_18], %74 {strides = array<i32>} : memref<6x8x8xf32, #tpu.memory_space<vmem>>, vector<6x8x8xf32>,
    return
  }
  func.func @transform_0(%arg0: i32) -> (i32, i32, i32) {
    %c0_i32 = arith.constant 0 : i32
    %c0_i32_0 = arith.constant 0 : i32
    %c0_i32_1 = arith.constant 0 : i32
    %c0_i32_2 = arith.constant 0 : i32
    return %c0_i32, %c0_i32_0, %c0_i32_1 : i32, i32, i32
  }
  func.func @transform_1(%arg0: i32) -> (i32, i32, i32) {
    %c0_i32 = arith.constant 0 : i32
    %c0_i32_0 = arith.constant 0 : i32
    %c0_i32_1 = arith.constant 0 : i32
    %c0_i32_2 = arith.constant 0 : i32
    return %c0_i32, %c0_i32_0, %c0_i32_1 : i32, i32, i32
  }
  func.func @transform_2(%arg0: i32) -> (i32, i32, i32) {
    %c0_i32 = arith.constant 0 : i32
    %c0_i32_0 = arith.constant 0 : i32
    %c0_i32_1 = arith.constant 0 : i32
    %c0_i32_2 = arith.constant 0 : i32
    return %c0_i32, %c0_i32_0, %c0_i32_1 : i32, i32, i32
  }
  func.func @transform_3(%arg0: i32) -> (i32, i32, i32) {
    %c0_i32 = arith.constant 0 : i32
    %c0_i32_0 = arith.constant 0 : i32
    %c0_i32_1 = arith.constant 0 : i32
    %c0_i32_2 = arith.constant 0 : i32
    return %c0_i32, %c0_i32_0, %c0_i32_1 : i32, i32, i32
  }
}

</mosaic_0001>

<bundles_post_ra>
// kernel: dense_prefix.2
= control target key start
LH: loop header
LB: loop body
LE: loop exit
PB: predicated region body
PF: predicated region fallthrough
CT: control target
= control target key end

     0   :  { %vm105_vm0 = vcmask 1042432   ;;  %vm56_vm1 = vcmask 23552   ;;  %vm281_vm2 = vcmask 261120   ;;  %s1808_s15 = smov 32   ;;  %vm839_vm3 = vcmask 523264   ;;  %s2651_s1 = inlined_call_operand.vmem [shape: f32[3,32], index: 1, kind: input, shape index: {}]   ;;  %s2652_s0 = inlined_call_operand.vmem [shape: f32[128,3], index: 0, kind: input, shape index: {}]   ;;  %s2653_s3 = inlined_call_operand.vmem [shape: f32[32,32], index: 3, kind: input, shape index: {}]   ;;  %s2654_s5 = inlined_call_operand.vmem [shape: f32[32,32], index: 5, kind: input, shape index: {}]   ;;  %s2655_s2 = inlined_call_operand.vmem [shape: f32[1,32], index: 2, kind: input, shape index: {}]   ;;  %s2656_s4 = inlined_call_operand.vmem [shape: f32[1,32], index: 4, kind: input, shape index: {}]   ;;  %s2657_s7 = inlined_call_operand.vmem [shape: f32[96,32], index: 7, kind: input, shape index: {}]   ;;  %s2658_s6 = inlined_call_operand.vmem [shape: f32[1,32], index: 6, kind: input, shape index: {}]   ;;  %s2659_s8 = inlined_call_operand.vmem [shape: f32[1,32], index: 8, kind: input, shape index: {}]   ;;  %s2660_s9 = inlined_call_operand.vmem [shape: f32[128,128], index: 9, kind: output, shape index: {}]  }
   0x1   :  { %v48_v0 = vld [vmem:[%s2651_s1] sm:$0x7]  ;;  %v33_v2 = vld [vmem:[%s2652_s0 + $0x8] sm:$0xff]  ;;  %v34_v3 = vld [vmem:[%s2652_s0 + $0x10] sm:$0xff]  ;;  %vm875_vm4 = vcmask 785408  }
   0x2   :  { %v32_v1 = vld [vmem:[%s2652_s0] sm:$0xff]  ;;  %1563 = vmatprep.subr.msk.mxu0 %vm105_vm0, %v48_v0  ;;  %v35_v4 = vld [vmem:[%s2652_s0 + $0x18] sm:$0xff]  ;;  %v271_v7 = vld [vmem:[%s2653_s3 + $0x8] sm:$0xff] }
   0x3   :  { %1565 = vmatprep.mubr.msk.f32.mxu0 %vm56_vm1, %v32_v1  ;;  %1564 = vmatpush3.msk.msra.mxu0 %vm105_vm0, %v48_v0  ;;  %v36_v5 = vld [vmem:[%s2652_s0 + $0x20] sm:$0xff]  ;;  %v37_v9 = vld [vmem:[%s2652_s0 + $0x28] sm:$0xff]  ;;  %v38_v10 = vld [vmem:[%s2652_s0 + $0x30] sm:$0xff] }
   0x4   :  { %1566 = vmatmul.mubr.msk.f32.vlgmr.msra.gmra.mrb[0].mxu0 %vm56_vm1, %v33_v2  ;;  %v270_v6 = vld [vmem:[%s2653_s3] sm:$0xff]  ;;  %v39_v11 = vld [vmem:[%s2652_s0 + $0x38] sm:$0xff]  ;;  %v41_v13 = vld [vmem:[%s2652_s0 + $0x48] sm:$0xff] }
   0x5   :  { %1568 = vmatprep.mubr.msk.f32.mxu0 %vm56_vm1, %v34_v3  ;;  %v1701_v8 = vpack.c.bf16 %v271_v7, %v270_v6  ;;  %v40_v12 = vld [vmem:[%s2652_s0 + $0x40] sm:$0xff]  ;;  %v42_v14 = vld [vmem:[%s2652_s0 + $0x50] sm:$0xff]  ;;  %v43_v15 = vld [vmem:[%s2652_s0 + $0x58] sm:$0xff] }
   0x6   :  { %v44_v16 = vld [vmem:[%s2652_s0 + $0x60] sm:$0xff]  ;;  %v45_v17 = vld [vmem:[%s2652_s0 + $0x68] sm:$0xff]  ;;  %v46_v18 = vld [vmem:[%s2652_s0 + $0x70] sm:$0xff] }
   0x7   :  { %1702 = vmatprep.subr.bf16.mxu1 %v1701_v8  ;;  %v47_v19 = vld [vmem:[%s2652_s0 + $0x78] sm:$0xff]  ;;  %v272_v20 = vld [vmem:[%s2653_s3 + $0x10] sm:$0xff]  ;;  %v491_v23 = vld [vmem:[%s2654_s5] sm:$0xff] }
   0x8   :  { %1569 = vmatmul.mubr.msk.f32.gmra.mrb[2].mxu0 %vm56_vm1, %v35_v4  ;;  %1704 = vmatpush3.bf16.msra.mxu1 %v1701_v8  ;;  %v273_v21 = vld [vmem:[%s2653_s3 + $0x18] sm:$0xff]  ;;  %v492_v24 = vld [vmem:[%s2654_s5 + $0x8] sm:$0xff]  ;;  %v493_v25 = vld [vmem:[%s2654_s5 + $0x10] sm:$0xff] }
   0x9   :  { %1571 = vmatprep.mubr.msk.f32.mxu0 %vm56_vm1, %v36_v5  ;;  %v1705_v22 = vpack.c.bf16 %v273_v21, %v272_v20  ;;  %v1709_v26 = vpack.c.bf16 %v492_v24, %v491_v23  ;;  %v494_v27 = vld [vmem:[%s2654_s5 + $0x18] sm:$0xff]  ;;  %v1409_v29 = vld [vmem:[%s2655_s2] ss:$0 sm:$0xff] }
   0xa   :  { %v1713_v28 = vpack.c.bf16 %v494_v27, %v493_v25 }
   0xb   :  { %1706 = vmatprep.subr.bf16.mxu1 %v1705_v22  ;;  %1710 = vmatprep.subr.bf16.mxu0 %v1709_v26 }
   0xc   :  { %1572 = vmatmul.mubr.msk.f32.gmra.mrb[4].mxu0 %vm56_vm1, %v37_v9  ;;  %1708 = vmatpush3.bf16.msra.mxu1 %v1705_v22 }
   0xd   :  { %1574 = vmatprep.mubr.msk.f32.mxu0 %vm56_vm1, %v38_v10  ;;  %1712 = vmatpush3.bf16.msra.mxu0 %v1709_v26 }
   0xe   :  { %1714 = vmatprep.subr.bf16.mxu0 %v1713_v28 }
  0x10   :  { %1575 = vmatmul.mubr.msk.f32.gmra.mrb[6].mxu0 %vm56_vm1, %v39_v11 }
  0x11   :  { %1577 = vmatprep.mubr.msk.f32.mxu0 %vm56_vm1, %v40_v12  ;;  %1716 = vmatpush3.bf16.msra.mxu0 %v1713_v28 }
  0x14   :  { %1578 = vmatmul.mubr.msk.f32.gmra.mrb[8].mxu0 %vm56_vm1, %v41_v13 }
  0x15   :  { %1580 = vmatprep.mubr.msk.f32.mxu0 %vm56_vm1, %v42_v14  ;;  %v2054_v14 = vld [vmem:[%s2656_s4] ss:$0 sm:$0xff]  ;;  %s1809_s4 = smov 64  }
  0x18   :  { %1581 = vmatmul.mubr.msk.f32.gmra.mrb[10].mxu0 %vm56_vm1, %v43_v15 }
  0x19   :  { %1583 = vmatprep.mubr.msk.f32.mxu0 %vm56_vm1, %v44_v16 }
  0x1c   :  { %1584 = vmatmul.mubr.msk.f32.gmra.mrb[12].mxu0 %vm56_vm1, %v45_v17 }
  0x1d   :  { %1586 = vmatprep.mubr.msk.f32.mxu0 %vm56_vm1, %v46_v18 }
  0x20   :  { %1587 = vmatmul.mubr.msk.f32.gmra.mrb[14].mxu0 %vm56_vm1, %v47_v19 }
  0xd7   :  { %v1567_v30 = vpop.f32.mrb[0].mxu0 }
  0xd8   :  { %v1955_v31 = vadd.f32 %v1567_v30, %v1409_v29  ;;  %v175_v32 = vpop.f32.mrb[1].mxu0 }
  0xd9   :  { %v1957_v33 = vadd.f32 %v1409_v29, %v175_v32 }
  0xda   :  { %v255_v36 = vmax.f32 %v1955_v31, 0.0 }
  0xdb   :  { %v254_v34 = vmax.f32 %v1957_v33, 0.0  ;;  %v1570_v35 = vpop.f32.mrb[2].mxu0 }
  0xdc   :  { %v1961_v37 = vadd.f32 %v1570_v35, %v1409_v29  ;;  %v185_v38 = vpop.f32.mrb[3].mxu0 }
  0xdd   :  { %v1963_v39 = vadd.f32 %v1409_v29, %v185_v38  ;;  %1597 = vmatprep.mubr.msk.f32.mxu1 %vm281_vm2, %v254_v34 }
  0xde   :  { %v257_v40 = vmax.f32 %v1961_v37, 0.0  ;;  %1598 = vmatmul.mubr.msk.f32.vlgmr.msra.gmra.mrb[0].mxu1 %vm281_vm2, %v255_v36 }
  0xdf   :  { %v256_v41 = vmax.f32 %v1963_v39, 0.0  ;;  %v1573_v42 = vpop.f32.mrb[4].mxu0 }
  0xe0   :  { %v1973_v43 = vadd.f32 %v1573_v42, %v1409_v29  ;;  %v195_v44 = vpop.f32.mrb[5].mxu0 }
  0xe1   :  { %v1975_v45 = vadd.f32 %v1409_v29, %v195_v44  ;;  %1600 = vmatprep.mubr.msk.f32.mxu1 %vm281_vm2, %v256_v41 }
  0xe2   :  { %v259_v46 = vmax.f32 %v1973_v43, 0.0  ;;  %1601 = vmatmul.mubr.msk.f32.gmra.mrb[2].mxu1 %vm281_vm2, %v257_v40 }
  0xe3   :  { %v258_v47 = vmax.f32 %v1975_v45, 0.0  ;;  %v1576_v48 = vpop.f32.mrb[6].mxu0 }
  0xe4   :  { %v1985_v49 = vadd.f32 %v1576_v48, %v1409_v29  ;;  %v205_v50 = vpop.f32.mrb[7].mxu0 }
  0xe5   :  { %v1987_v51 = vadd.f32 %v1409_v29, %v205_v50  ;;  %1603 = vmatprep.mubr.msk.f32.mxu1 %vm281_vm2, %v258_v47 }
  0xe6   :  { %v261_v52 = vmax.f32 %v1985_v49, 0.0  ;;  %1604 = vmatmul.mubr.msk.f32.gmra.mrb[4].mxu1 %vm281_vm2, %v259_v46 }
  0xe7   :  { %v260_v53 = vmax.f32 %v1987_v51, 0.0  ;;  %v1579_v54 = vpop.f32.mrb[8].mxu0 }
  0xe8   :  { %v1997_v55 = vadd.f32 %v1579_v54, %v1409_v29  ;;  %v215_v56 = vpop.f32.mrb[9].mxu0 }
  0xe9   :  { %v1999_v57 = vadd.f32 %v1409_v29, %v215_v56  ;;  %1606 = vmatprep.mubr.msk.f32.mxu1 %vm281_vm2, %v260_v53 }
  0xea   :  { %v263_v58 = vmax.f32 %v1997_v55, 0.0  ;;  %1607 = vmatmul.mubr.msk.f32.gmra.mrb[6].mxu1 %vm281_vm2, %v261_v52 }
  0xeb   :  { %v262_v59 = vmax.f32 %v1999_v57, 0.0  ;;  %v1582_v60 = vpop.f32.mrb[10].mxu0 }
  0xec   :  { %v2009_v61 = vadd.f32 %v1582_v60, %v1409_v29  ;;  %v225_v62 = vpop.f32.mrb[11].mxu0 }
  0xed   :  { %v2011_v63 = vadd.f32 %v1409_v29, %v225_v62  ;;  %1609 = vmatprep.mubr.msk.f32.mxu1 %vm281_vm2, %v262_v59 }
  0xee   :  { %v265_v0 = vmax.f32 %v2009_v61, 0.0  ;;  %1610 = vmatmul.mubr.msk.f32.gmra.mrb[8].mxu1 %vm281_vm2, %v263_v58 }
  0xef   :  { %v264_v1 = vmax.f32 %v2011_v63, 0.0  ;;  %v1585_v2 = vpop.f32.mrb[12].mxu0 }
  0xf0   :  { %v2021_v3 = vadd.f32 %v1585_v2, %v1409_v29  ;;  %v235_v4 = vpop.f32.mrb[13].mxu0 }
  0xf1   :  { %v2023_v5 = vadd.f32 %v1409_v29, %v235_v4  ;;  %1612 = vmatprep.mubr.msk.f32.mxu1 %vm281_vm2, %v264_v1 }
  0xf2   :  { %v267_v6 = vmax.f32 %v2021_v3, 0.0  ;;  %1613 = vmatmul.mubr.msk.f32.gmra.mrb[10].mxu1 %vm281_vm2, %v265_v0 }
  0xf3   :  { %v266_v7 = vmax.f32 %v2023_v5, 0.0  ;;  %v1588_v8 = vpop.f32.mrb[14].mxu0 }
  0xf4   :  { %v2033_v9 = vadd.f32 %v1588_v8, %v1409_v29  ;;  %v245_v10 = vpop.f32.mrb[15].mxu0 }
  0xf5   :  { %v2035_v11 = vadd.f32 %v1409_v29, %v245_v10  ;;  %1615 = vmatprep.mubr.msk.f32.mxu1 %vm281_vm2, %v266_v7 }
  0xf6   :  { %v269_v12 = vmax.f32 %v2033_v9, 0.0  ;;  %1616 = vmatmul.mubr.msk.f32.gmra.mrb[12].mxu1 %vm281_vm2, %v267_v6 }
  0xf7   :  { %v268_v13 = vmax.f32 %v2035_v11, 0.0 }
  0xf9   :  { %1618 = vmatprep.mubr.msk.f32.mxu1 %vm281_vm2, %v268_v13 }
  0xfa   :  { %1619 = vmatmul.mubr.msk.f32.gmra.mrb[14].mxu1 %vm281_vm2, %v269_v12 }
 0x1b1   :  { %v1599_v15 = vpop.f32.mrb[0].mxu1 }
 0x1b2   :  { %v402_v16 = vadd.f32 %v1599_v15, %v2054_v14  ;;  %v396_v17 = vpop.f32.mrb[1].mxu1 }
 0x1b3   :  { %v397_v18 = vadd.f32 %v2054_v14, %v396_v17 }
 0x1b4   :  { %v476_v19 = vmax.f32 %v402_v16, 0.0 }
 0x1b5   :  { %v475_v20 = vmax.f32 %v397_v18, 0.0  ;;  %v1602_v21 = vpop.f32.mrb[2].mxu1 }
 0x1b6   :  { %v412_v22 = vadd.f32 %v1602_v21, %v2054_v14  ;;  %713 = vrot.lane.b32.xlu0 %v476_v19, %s1808_s15  ;;  %v406_v23 = vpop.f32.mrb[3].mxu1 }
 0x1b7   :  { %v407_v24 = vadd.f32 %v2054_v14, %v406_v23  ;;  %1629 = vmatprep.mubr.msk.f32.mxu0 %vm281_vm2, %v475_v20 }
 0x1b8   :  { %v478_v25 = vmax.f32 %v412_v22, 0.0  ;;  %1630 = vmatmul.mubr.msk.f32.vlgmr.msra.gmra.mrb[16].mxu0 %vm281_vm2, %v476_v19 }
 0x1b9   :  { %v477_v26 = vmax.f32 %v407_v24, 0.0  ;;  %v1605_v27 = vpop.f32.mrb[4].mxu1 }
 0x1ba   :  { %v422_v28 = vadd.f32 %v1605_v27, %v2054_v14  ;;  %717 = vrot.lane.b32.xlu1 %v478_v25, %s1808_s15  ;;  %v416_v29 = vpop.f32.mrb[5].mxu1  ;;  %711 = vrot.lane.b32.xlu0 %v475_v20, %s1808_s15 }
 0x1bb   :  { %v417_v30 = vadd.f32 %v2054_v14, %v416_v29  ;;  %1632 = vmatprep.mubr.msk.f32.mxu0 %vm281_vm2, %v477_v26 }
 0x1bc   :  { %v480_v32 = vmax.f32 %v422_v28, 0.0  ;;  %1633 = vmatmul.mubr.msk.f32.gmra.mrb[18].mxu0 %vm281_vm2, %v478_v25 }
 0x1bd   :  { %v479_v35 = vmax.f32 %v417_v30, 0.0  ;;  %v1608_v38 = vpop.f32.mrb[6].mxu1 }
 0x1be   :  { %v432_v42 = vadd.f32 %v1608_v38, %v2054_v14  ;;  %721 = vrot.lane.b32.xlu1 %v480_v32, %s1808_s15  ;;  %v426_v44 = vpop.f32.mrb[7].mxu1  ;;  %715 = vrot.lane.b32.xlu0 %v477_v26, %s1808_s15  ;;  %v858_v38 = vld [vmem:[%s2657_s7 + $0x10] sm:$0xff] }
 0x1bf   :  { %v427_v48 = vadd.f32 %v2054_v14, %v426_v44  ;;  %1635 = vmatprep.mubr.msk.f32.mxu0 %vm281_vm2, %v479_v35  ;;  %v859_v44 = vld [vmem:[%s2657_s7 + $0x18] sm:$0xff] }
 0x1c0   :  { %v482_v50 = vmax.f32 %v432_v42, 0.0  ;;  %1636 = vmatmul.mubr.msk.f32.gmra.mrb[20].mxu0 %vm281_vm2, %v480_v32 }
 0x1c1   :  { %v481_v54 = vmax.f32 %v427_v48, 0.0  ;;  %v1611_v56 = vpop.f32.mrb[8].mxu1  ;;  %v1721_v48 = vpack.c.bf16 %v859_v44, %v858_v38 }
 0x1c2   :  { %v442_v60 = vadd.f32 %v1611_v56, %v2054_v14  ;;  %725 = vrot.lane.b32.xlu1 %v482_v50, %s1808_s15  ;;  %v436_v62 = vpop.f32.mrb[9].mxu1  ;;  %719 = vrot.lane.b32.xlu0 %v479_v35, %s1808_s15  ;;  %v856_v35 = vld [vmem:[%s2657_s7] sm:$0xff] }
 0x1c3   :  { %v437_v2 = vadd.f32 %v2054_v14, %v436_v62  ;;  %1638 = vmatprep.mubr.msk.f32.mxu0 %vm281_vm2, %v481_v54  ;;  %v863_v62 = vld [vmem:[%s2657_s7 + $0x38] sm:$0xff] }
 0x1c4   :  { %v484_v4 = vmax.f32 %v442_v60, 0.0  ;;  %1639 = vmatmul.mubr.msk.f32.gmra.mrb[22].mxu0 %vm281_vm2, %v482_v50  ;;  %v860_v50 = vld [vmem:[%s2657_s7 + $0x20] sm:$0xff]  ;;  %v862_v60 = vld [vmem:[%s2657_s7 + $0x30] sm:$0xff] }
 0x1c5   :  { %v483_v8 = vmax.f32 %v437_v2, 0.0  ;;  %v1614_v10 = vpop.f32.mrb[10].mxu1  ;;  %v1729_v2 = vpack.c.bf16 %v863_v62, %v862_v60 }
 0x1c6   :  { %v452_v15 = vadd.f32 %v1614_v10, %v2054_v14  ;;  %729 = vrot.lane.b32.xlu1 %v484_v4, %s1808_s15  ;;  %v446_v16 = vpop.f32.mrb[11].mxu1  ;;  %723 = vrot.lane.b32.xlu0 %v481_v54, %s1808_s15  ;;  %v861_v54 = vld [vmem:[%s2657_s7 + $0x28] sm:$0xff] }
 0x1c7   :  { %v447_v17 = vadd.f32 %v2054_v14, %v446_v16  ;;  %1641 = vmatprep.mubr.msk.f32.mxu0 %vm281_vm2, %v483_v8  ;;  %v1725_v56 = vpack.c.bf16 %v861_v54, %v860_v50  ;;  %v867_v16 = vld [vmem:[%s2657_s7 + $0x58] sm:$0xff] }
 0x1c8   :  { %v486_v18 = vmax.f32 %v452_v15, 0.0  ;;  %1642 = vmatmul.mubr.msk.f32.gmra.mrb[24].mxu0 %vm281_vm2, %v484_v4  ;;  %v864_v4 = vld [vmem:[%s2657_s7 + $0x40] sm:$0xff]  ;;  %v866_v15 = vld [vmem:[%s2657_s7 + $0x50] sm:$0xff] }
 0x1c9   :  { %v485_v19 = vmax.f32 %v447_v17, 0.0  ;;  %v1617_v20 = vpop.f32.mrb[12].mxu1  ;;  %v1737_v17 = vpack.c.bf16 %v867_v16, %v866_v15 }
 0x1ca   :  { %v462_v21 = vadd.f32 %v1617_v20, %v2054_v14  ;;  %733 = vrot.lane.b32.xlu1 %v486_v18, %s1808_s15  ;;  %v456_v22 = vpop.f32.mrb[13].mxu1  ;;  %727 = vrot.lane.b32.xlu0 %v483_v8, %s1808_s15  ;;  %v865_v8 = vld [vmem:[%s2657_s7 + $0x48] sm:$0xff] }
 0x1cb   :  { %v457_v23 = vadd.f32 %v2054_v14, %v456_v22  ;;  %1644 = vmatprep.mubr.msk.f32.mxu0 %vm281_vm2, %v485_v19  ;;  %v1733_v10 = vpack.c.bf16 %v865_v8, %v864_v4 }
 0x1cc   :  { %v488_v24 = vmax.f32 %v462_v21, 0.0  ;;  %1645 = vmatmul.mubr.msk.f32.gmra.mrb[26].mxu0 %vm281_vm2, %v486_v18  ;;  %v2145_v18 = vld [vmem:[%s2658_s6] ss:$0 sm:$0xff] }
 0x1cd   :  { %v487_v25 = vmax.f32 %v457_v23, 0.0  ;;  %v1620_v26 = vpop.f32.mrb[14].mxu1 }
 0x1ce   :  { %v2094_v27 = vadd.f32 %v1620_v26, %v2054_v14  ;;  %737 = vrot.lane.b32.xlu1 %v488_v24, %s1808_s15  ;;  %v466_v28 = vpop.f32.mrb[15].mxu1  ;;  %731 = vrot.lane.b32.xlu0 %v485_v19, %s1808_s15 }
 0x1cf   :  { %v467_v29 = vadd.f32 %v2054_v14, %v466_v28  ;;  %1647 = vmatprep.mubr.msk.f32.mxu0 %vm281_vm2, %v487_v25  ;;  %v857_v14 = vld [vmem:[%s2657_s7 + $0x8] sm:$0xff] }
 0x1d0   :  { %v490_v30 = vmax.f32 %v2094_v27, 0.0  ;;  %1648 = vmatmul.mubr.msk.f32.gmra.mrb[28].mxu0 %vm281_vm2, %v488_v24  ;;  %v1717_v42 = vpack.c.bf16 %v857_v14, %v856_v35 }
 0x1d1   :  { %v489_v32 = vmax.f32 %v467_v29, 0.0 }
 0x1d2   :  { %735 = vrot.lane.b32.xlu0 %v487_v25, %s1808_s15  ;;  %1718 = vmatprep.subr.bf16.mxu1 %v1717_v42 }
 0x1d3   :  { %1650 = vmatprep.mubr.msk.f32.mxu0 %vm281_vm2, %v489_v32  ;;  %1720 = vmatpush3.bf16.msra.mxu1 %v1717_v42 }
 0x1d4   :  { %1651 = vmatmul.mubr.msk.f32.gmra.mrb[30].mxu0 %vm281_vm2, %v490_v30  ;;  %1722 = vmatprep.subr.bf16.mxu1 %v1721_v48 }
 0x1d6   :  { %739 = vrot.lane.b32.xlu0 %v489_v32, %s1808_s15 }
 0x1d7   :  { %1724 = vmatpush3.bf16.msra.mxu1 %v1721_v48 }
 0x1d8   :  { %1726 = vmatprep.subr.bf16.mxu1 %v1725_v56 }
 0x1db   :  { %1728 = vmatpush3.bf16.msra.mxu1 %v1725_v56 }
 0x1dc   :  { %1730 = vmatprep.subr.bf16.mxu1 %v1729_v2 }
 0x1df   :  { %1732 = vmatpush3.bf16.msra.mxu1 %v1729_v2 }
 0x1e0   :  { %1734 = vmatprep.subr.bf16.mxu1 %v1733_v10 }
 0x1e3   :  { %1736 = vmatpush3.bf16.msra.mxu1 %v1733_v10 }
 0x1e4   :  { %1738 = vmatprep.subr.bf16.mxu1 %v1737_v17 }
 0x1e7   :  { %1740 = vmatpush3.bf16.msra.mxu1 %v1737_v17 }
 0x28b   :  { %v1631_v19 = vpop.f32.mrb[16].mxu0 }
 0x28c   :  { %v622_v20 = vadd.f32 %v1631_v19, %v2145_v18  ;;  %v616_v21 = vpop.f32.mrb[17].mxu0 }
 0x28d   :  { %v617_v23 = vadd.f32 %v2145_v18, %v616_v21 }
 0x28e   :  { %v696_v22 = vmax.f32 %v622_v20, 0.0 }
 0x28f   :  { %v1634_v24 = vpop.f32.mrb[18].mxu0  ;;  %v695_v27 = vmax.f32 %v617_v23, 0.0 }
 0x290   :  { %777 = vrot.lane.b32.xlu1 %v696_v22, %s1809_s4  ;;  %v626_v25 = vpop.f32.mrb[19].mxu0  ;;  %v632_v14 = vadd.f32 %v1634_v24, %v2145_v18 }
 0x291   :  { %v627_v26 = vadd.f32 %v2145_v18, %v626_v25 }
 0x292   :  { %v698_v50 = vmax.f32 %v632_v14, 0.0 }
 0x293   :  { %v697_v28 = vmax.f32 %v627_v26, 0.0  ;;  %v1637_v29 = vpop.f32.mrb[20].mxu0 }
 0x294   :  { %v636_v32 = vpop.f32.mrb[21].mxu0  ;;  %775 = vrot.lane.b32.xlu1 %v695_v27, %s1809_s4  ;;  %v642_v54 = vadd.f32 %v1637_v29, %v2145_v18 }
 0x295   :  { %v637_v35 = vadd.f32 %v2145_v18, %v636_v32  ;;  %779 = vrot.lane.b32.xlu0 %v697_v28, %s1809_s4 }
 0x296   :  { %v700_v4 = vmax.f32 %v642_v54, 0.0 }
 0x297   :  { %v699_v38 = vmax.f32 %v637_v35, 0.0  ;;  %v1640_v42 = vpop.f32.mrb[22].mxu0 }
 0x298   :  { %v646_v44 = vpop.f32.mrb[23].mxu0  ;;  %741 = vrot.lane.b32.xlu1 %v490_v30, %s1808_s15  ;;  %v652_v8 = vadd.f32 %v1640_v42, %v2145_v18 }
 0x299   :  { %v647_v48 = vadd.f32 %v2145_v18, %v646_v44  ;;  %783 = vrot.lane.b32.xlu0 %v699_v38, %s1809_s4 }
 0x29a   :  { %v702_v17 = vmax.f32 %v652_v8, 0.0 }
 0x29b   :  { %v701_v56 = vmax.f32 %v647_v48, 0.0  ;;  %v1643_v60 = vpop.f32.mrb[24].mxu0  ;;  %v714_v48 = vpop.permute.xlu0 %713 }
 0x29c   :  { %v656_v62 = vpop.f32.mrb[25].mxu0  ;;  %781 = vrot.lane.b32.xlu1 %v698_v50, %s1809_s4  ;;  %v662_v19 = vadd.f32 %v1643_v60, %v2145_v18 }
 0x29d   :  { %v657_v2 = vadd.f32 %v2145_v18, %v656_v62  ;;  %787 = vrot.lane.b32.xlu0 %v701_v56, %s1809_s4  ;;  %v718_v56 = vpop.permute.xlu1 %717 }
 0x29e   :  { %v704_v24 = vmax.f32 %v662_v19, 0.0 }
 0x29f   :  { %v703_v30 = vmax.f32 %v657_v2, 0.0  ;;  %v1646_v10 = vpop.f32.mrb[26].mxu0  ;;  %v712_v50 = vpop.permute.xlu0 %711 }
 0x2a0   :  { %v666_v15 = vpop.f32.mrb[27].mxu0  ;;  %785 = vrot.lane.b32.xlu1 %v700_v4, %s1809_s4  ;;  %v672_v25 = vadd.f32 %v1646_v10, %v2145_v18 }
 0x2a1   :  { %v667_v16 = vadd.f32 %v2145_v18, %v666_v15  ;;  %791 = vrot.lane.b32.xlu0 %v703_v30, %s1809_s4  ;;  %v722_v62 = vpop.permute.xlu1 %721 }
 0x2a2   :  { %v706_v32 = vmax.f32 %v672_v25, 0.0  ;;  %v828_v37 = vsel %vm281_vm2, %v259_v46, %v722_v62 }
 0x2a3   :  { %v705_v20 = vmax.f32 %v667_v16, 0.0  ;;  %v1649_v21 = vpop.f32.mrb[28].mxu0  ;;  %v716_v54 = vpop.permute.xlu0 %715 }
 0x2a4   :  { %v676_v22 = vpop.f32.mrb[29].mxu0  ;;  %789 = vrot.lane.b32.xlu1 %v702_v17, %s1809_s4  ;;  %v682_v35 = vadd.f32 %v1649_v21, %v2145_v18 }
 0x2a5   :  { %v677_v23 = vadd.f32 %v2145_v18, %v676_v22  ;;  %795 = vrot.lane.b32.xlu0 %v705_v20, %s1809_s4  ;;  %v726_v4 = vpop.permute.xlu1 %725  ;;  %v823_v20 = vsel %vm281_vm2, %v254_v34, %v712_v50  ;;  %v824_v22 = vsel %vm281_vm2, %v255_v36, %v714_v48  ;;  %v826_v36 = vsel %vm281_vm2, %v257_v40, %v718_v56 }
 0x2a6   :  { %v708_v38 = vmax.f32 %v682_v35, 0.0  ;;  %v830_v43 = vsel %vm281_vm2, %v261_v52, %v726_v4 }
 0x2a7   :  { %v707_v26 = vmax.f32 %v677_v23, 0.0  ;;  %v1652_v27 = vpop.f32.mrb[30].mxu0  ;;  %v720_v60 = vpop.permute.xlu0 %719  ;;  %v825_v23 = vsel %vm281_vm2, %v256_v41, %v716_v54 }
 0x2a8   :  { %v686_v28 = vpop.f32.mrb[31].mxu0  ;;  %793 = vrot.lane.b32.xlu1 %v704_v24, %s1809_s4  ;;  %v692_v42 = vadd.f32 %v1652_v27, %v2145_v18  ;;  %v827_v41 = vsel %vm281_vm2, %v258_v47, %v720_v60 }
 0x2a9   :  { %v687_v29 = vadd.f32 %v2145_v18, %v686_v28  ;;  %799 = vrot.lane.b32.xlu0 %v707_v26, %s1809_s4  ;;  %v730_v30 = vpop.permute.xlu1 %729 }
 0x2aa   :  { %v710_v44 = vmax.f32 %v692_v42, 0.0  ;;  %v832_v49 = vsel %vm281_vm2, %v263_v58, %v730_v30 }
 0x2ab   :  { %v709_v14 = vmax.f32 %v687_v29, 0.0  ;;  %v724_v2 = vpop.permute.xlu0 %723 }
 0x2ac   :  { %797 = vrot.lane.b32.xlu1 %v706_v32, %s1809_s4  ;;  %v829_v45 = vsel %vm281_vm2, %v260_v53, %v724_v2 }
 0x2ad   :  { %803 = vrot.lane.b32.xlu0 %v709_v14, %s1809_s4  ;;  %v734_v15 = vpop.permute.xlu1 %733 }
 0x2ae   :  { %v834_v55 = vsel %vm281_vm2, %v265_v0, %v734_v15 }
 0x2af   :  { %v728_v8 = vpop.permute.xlu0 %727 }
 0x2b0   :  { %801 = vrot.lane.b32.xlu1 %v708_v38, %s1809_s4  ;;  %v831_v51 = vsel %vm281_vm2, %v262_v59, %v728_v8 }
 0x2b1   :  { %v738_v17 = vpop.permute.xlu1 %737 }
 0x2b2   :  { %v836_v61 = vsel %vm281_vm2, %v267_v6, %v738_v17 }
 0x2b3   :  { %v732_v10 = vpop.permute.xlu0 %731 }
 0x2b4   :  { %805 = vrot.lane.b32.xlu1 %v710_v44, %s1809_s4  ;;  %v833_v57 = vsel %vm281_vm2, %v264_v1, %v732_v10 }
 0x2b7   :  { %v736_v16 = vpop.permute.xlu0 %735 }
 0x2b8   :  { %v835_v63 = vsel %vm281_vm2, %v266_v7, %v736_v16 }
 0x2bb   :  { %v740_v19 = vpop.permute.xlu0 %739 }
 0x2bc   :  { %v837_v5 = vsel %vm281_vm2, %v268_v13, %v740_v19  ;;  %v2311_v13 = vld [vmem:[%s2659_s8] ss:$0 sm:$0xff]  ;;  %s1810_s8 = smov 96  }
 0x302   :  { %v778_v18 = vpop.permute.xlu1 %777 }
 0x303   :  { %v2193_v26 = vsel %vm839_vm3, %v824_v22, %v778_v18 }
 0x306   :  { %v776_v21 = vpop.permute.xlu1 %775 }
 0x307   :  { %v2190_v24 = vsel %vm839_vm3, %v823_v20, %v776_v21  ;;  %v780_v25 = vpop.permute.xlu0 %779 }
 0x308   :  { %v2196_v33 = vsel %vm839_vm3, %v825_v23, %v780_v25  ;;  %1677 = vmatprep.mubr.msk.f32.mxu1 %vm875_vm4, %v2190_v24 }
 0x309   :  { %1678 = vmatmul.mubr.msk.f32.vlgmr.msra.gmra.mrb[16].mxu1 %vm875_vm4, %v2193_v26 }
 0x30a   :  { %1680 = vmatprep.mubr.msk.f32.mxu1 %vm875_vm4, %v2196_v33  ;;  %v742_v31 = vpop.permute.xlu1 %741 }
 0x30b   :  { %v784_v34 = vpop.permute.xlu0 %783  ;;  %v838_v3 = vsel %vm281_vm2, %v269_v12, %v742_v31 }
 0x30c   :  { %v2214_v29 = vsel %vm839_vm3, %v827_v41, %v784_v34 }
 0x30e   :  { %v782_v39 = vpop.permute.xlu1 %781 }
 0x30f   :  { %v2211_v27 = vsel %vm839_vm3, %v826_v36, %v782_v39  ;;  %v788_v28 = vpop.permute.xlu0 %787 }
 0x310   :  { %1681 = vmatmul.mubr.msk.f32.gmra.mrb[18].mxu1 %vm875_vm4, %v2211_v27  ;;  %v2230_v35 = vsel %vm839_vm3, %v829_v45, %v788_v28 }
 0x311   :  { %1683 = vmatprep.mubr.msk.f32.mxu1 %vm875_vm4, %v2214_v29 }
 0x312   :  { %v786_v40 = vpop.permute.xlu1 %785 }
 0x313   :  { %v2227_v47 = vsel %vm839_vm3, %v828_v37, %v786_v40  ;;  %v792_v32 = vpop.permute.xlu0 %791 }
 0x314   :  { %1684 = vmatmul.mubr.msk.f32.gmra.mrb[20].mxu1 %vm875_vm4, %v2227_v47  ;;  %v2246_v38 = vsel %vm839_vm3, %v831_v51, %v792_v32 }
 0x315   :  { %1686 = vmatprep.mubr.msk.f32.mxu1 %vm875_vm4, %v2230_v35 }
 0x316   :  { %v790_v46 = vpop.permute.xlu1 %789 }
 0x317   :  { %v2243_v53 = vsel %vm839_vm3, %v830_v43, %v790_v46  ;;  %v796_v14 = vpop.permute.xlu0 %795 }
 0x318   :  { %1687 = vmatmul.mubr.msk.f32.gmra.mrb[22].mxu1 %vm875_vm4, %v2243_v53  ;;  %v2262_v44 = vsel %vm839_vm3, %v833_v57, %v796_v14 }
 0x319   :  { %1689 = vmatprep.mubr.msk.f32.mxu1 %vm875_vm4, %v2246_v38 }
 0x31a   :  { %v794_v52 = vpop.permute.xlu1 %793 }
 0x31b   :  { %v2259_v59 = vsel %vm839_vm3, %v832_v49, %v794_v52  ;;  %v800_v42 = vpop.permute.xlu0 %799 }
 0x31c   :  { %1690 = vmatmul.mubr.msk.f32.gmra.mrb[24].mxu1 %vm875_vm4, %v2259_v59  ;;  %v2278_v48 = vsel %vm839_vm3, %v835_v63, %v800_v42 }
 0x31d   :  { %1692 = vmatprep.mubr.msk.f32.mxu1 %vm875_vm4, %v2262_v44 }
 0x31e   :  { %v798_v58 = vpop.permute.xlu1 %797 }
 0x31f   :  { %v2275_v1 = vsel %vm839_vm3, %v834_v55, %v798_v58  ;;  %v804_v50 = vpop.permute.xlu0 %803 }
 0x320   :  { %1693 = vmatmul.mubr.msk.f32.gmra.mrb[26].mxu1 %vm875_vm4, %v2275_v1  ;;  %v2294_v54 = vsel %vm839_vm3, %v837_v5, %v804_v50 }
 0x321   :  { %1695 = vmatprep.mubr.msk.f32.mxu1 %vm875_vm4, %v2278_v48  ;;  %2662 = vst [vmem:[#allocation2_spill] sm:$0xff] %v2294_v54 }
 0x322   :  { %v802_v0 = vpop.permute.xlu1 %801 }
 0x323   :  { %v2291_v7 = vsel %vm839_vm3, %v836_v61, %v802_v0 }
 0x324   :  { %1696 = vmatmul.mubr.msk.f32.gmra.mrb[28].mxu1 %vm875_vm4, %v2291_v7 }
 0x325   :  { %1698 = vmatprep.mubr.msk.f32.mxu1 %vm875_vm4, %v2294_v54 }
 0x326   :  { %v806_v6 = vpop.permute.xlu1 %805 }
 0x327   :  { %v2304_v11 = vsel %vm839_vm3, %v838_v3, %v806_v6 }
 0x328   :  { %1699 = vmatmul.mubr.msk.f32.gmra.mrb[30].mxu1 %vm875_vm4, %v2304_v11 }
 0x3dc   :  { %v1679_v56 = vpop.f32.mrb[16].mxu1 }
 0x3dd   :  { %v2314_v60 = vadd.f32 %v1679_v56, %v2311_v13  ;;  %v990_v62 = vpop.f32.mrb[17].mxu1 }
 0x3de   :  { %v2317_v9 = vadd.f32 %v2311_v13, %v990_v62 }
 0x3df   :  { %v1086_v12 = vand.u32 2147483647, %v2314_v60 }
 0x3e0   :  { %v1085_v2 = vand.u32 2147483647, %v2317_v9 }
 0x3e1   :  { %v1102_v4 = vsub.f32 0.0, %v1086_v12 }
 0x3e2   :  { %v1101_v10 = vsub.f32 0.0, %v1085_v2 }
 0x3e3   :  { %v1119_v8 = vmul.f32 1.442695, %v1102_v4  ;;  %v1682_v30 = vpop.f32.mrb[18].mxu1  ;;  %v1070_v4 = vmax.f32 %v2314_v60, 0.0 }
 0x3e4   :  { %v2322_v15 = vadd.f32 %v1682_v30, %v2311_v13  ;;  %v1000_v16 = vpop.f32.mrb[19].mxu1  ;;  %v1117_v19 = vmul.f32 1.442695, %v1101_v10 }
 0x3e5   :  { %1744 = vpow2.f32 %v1119_v8  ;;  %v2325_v17 = vadd.f32 %v2311_v13, %v1000_v16 }
 0x3e6   :  { %v1088_v20 = vand.u32 2147483647, %v2322_v15  ;;  %1746 = vpow2.f32 %v1117_v19  ;;  %v1069_v19 = vmax.f32 %v2317_v9, 0.0  ;;  %v1072_v60 = vmax.f32 %v2322_v15, 0.0 }
 0x3e7   :  { %v1685_v18 = vpop.f32.mrb[20].mxu1  ;;  %v1087_v23 = vand.u32 2147483647, %v2325_v17 }
 0x3e8   :  { %v2329_v21 = vadd.f32 %v1685_v18, %v2311_v13  ;;  %v1010_v22 = vpop.f32.mrb[21].mxu1  ;;  %v1104_v39 = vsub.f32 0.0, %v1088_v20 }
 0x3e9   :  { %v2333_v25 = vadd.f32 %v2311_v13, %v1010_v22  ;;  %v1103_v37 = vsub.f32 0.0, %v1087_v23 }
 0x3ea   :  { %v1090_v31 = vand.u32 2147483647, %v2329_v21  ;;  %v1123_v49 = vmul.f32 1.442695, %v1104_v39 }
 0x3eb   :  { %v1089_v34 = vand.u32 2147483647, %v2333_v25  ;;  %v1688_v36 = vpop.f32.mrb[22].mxu1  ;;  %v1121_v58 = vmul.f32 1.442695, %v1103_v37 }
 0x3ec   :  { %v2338_v41 = vadd.f32 %v1688_v36, %v2311_v13  ;;  %v1020_v28 = vpop.f32.mrb[23].mxu1  ;;  %v1106_v45 = vsub.f32 0.0, %v1090_v31 }
 0x3ed   :  { %v2341_v40 = vadd.f32 %v2311_v13, %v1020_v28  ;;  %v1105_v46 = vsub.f32 0.0, %v1089_v34 }
 0x3ee   :  { %v1092_v32 = vand.u32 2147483647, %v2338_v41  ;;  %v1127_v50 = vmul.f32 1.442695, %v1106_v45 }
 0x3ef   :  { %v2344_v43 = vpop.eup %1744  ;;  %v1091_v51 = vand.u32 2147483647, %v2341_v40  ;;  %v1691_v14 = vpop.f32.mrb[24].mxu1  ;;  %v1125_v5 = vmul.f32 1.442695, %v1105_v46 }
 0x3f0   :  { %v1108_v52 = vsub.f32 0.0, %v1092_v32  ;;  %v2348_v57 = vadd.f32 %v1691_v14, %v2311_v13  ;;  %v1030_v42 = vpop.f32.mrb[25].mxu1  ;;  %v1158_v55 = vadd.f32 1.0, %v2344_v43  ;;  %v1161_v2 = vmul.f32 -0.5, %v2344_v43  ;;  %v2364_v30 = vpop.eup %1746 }
 0x3f1   :  { %v2352_v63 = vadd.f32 %v2311_v13, %v1030_v42  ;;  %v1107_v61 = vsub.f32 0.0, %v1091_v51  ;;  %v1164_v37 = vand.u32 2147483647, %v2344_v43  ;;  %v1149_v45 = vadd.f32 1.0, %v2364_v30 }
 0x3f2   :  { %v1094_v0 = vand.u32 2147483647, %v2348_v57  ;;  %1748 = vlog2.f32 %v1158_v55  ;;  %v1131_v56 = vmul.f32 1.442695, %v1108_v52  ;;  %v1162_v36 = vadd.f32 1.0, %v1161_v2 }
 0x3f3   :  { %v1093_v3 = vand.u32 2147483647, %v2352_v63  ;;  %v1694_v6 = vpop.f32.mrb[26].mxu1  ;;  %1750 = vpow2.f32 %v1123_v49  ;;  %v1129_v10 = vmul.f32 1.442695, %v1107_v61 }
 0x3f4   :  { %v2357_v62 = vadd.f32 %v1694_v6, %v2311_v13  ;;  %v1040_v12 = vpop.f32.mrb[27].mxu1  ;;  %1752 = vpow2.f32 %v1121_v58  ;;  %v1110_v16 = vsub.f32 0.0, %v1094_v0  ;;  %v1163_v0 = vmul.f32 %v2344_v43, %v1162_v36 }
 0x3f5   :  { %v2362_v8 = vadd.f32 %v2311_v13, %v1040_v12  ;;  %1754 = vpow2.f32 %v1127_v50  ;;  %v1109_v20 = vsub.f32 0.0, %v1093_v3  ;;  %vm1165_vm5 = vcmp.lt.f32.partialorder %v1164_v37, 0.0004427343 }
 0x3f6   :  { %v1096_v18 = vand.u32 2147483647, %v2357_v62  ;;  %1756 = vpow2.f32 %v1125_v5  ;;  %v1135_v32 = vmul.f32 1.442695, %v1110_v16  ;;  %v1152_v5 = vmul.f32 -0.5, %v2364_v30 }
 0x3f7   :  { %v1095_v22 = vand.u32 2147483647, %v2362_v8  ;;  %v1697_v23 = vpop.f32.mrb[28].mxu1  ;;  %1758 = vpow2.f32 %v1131_v56  ;;  %v1133_v49 = vmul.f32 1.442695, %v1109_v20 }
 0x3f8   :  { %v2371_v31 = vadd.f32 %v1697_v23, %v2311_v13  ;;  %v1050_v34 = vpop.f32.mrb[29].mxu1  ;;  %v1112_v39 = vsub.f32 0.0, %v1096_v18  ;;  %1760 = vpow2.f32 %v1129_v10 }
 0x3f9   :  { %v2374_v28 = vadd.f32 %v2311_v13, %v1050_v34  ;;  %v1111_v46 = vsub.f32 0.0, %v1095_v22  ;;  %1762 = vlog2.f32 %v1149_v45 }
 0x3fa   :  { %v1098_v51 = vand.u32 2147483647, %v2371_v31  ;;  %v1139_v3 = vmul.f32 1.442695, %v1112_v39  ;;  %1764 = vpow2.f32 %v1135_v32  ;;  %v1153_v39 = vadd.f32 1.0, %v1152_v5 }
 0x3fb   :  { %v1097_v52 = vand.u32 2147483647, %v2374_v28  ;;  %v1700_v42 = vpop.f32.mrb[30].mxu1  ;;  %v1137_v10 = vmul.f32 1.442695, %v1111_v46  ;;  %1766 = vpow2.f32 %v1133_v49 }
 0x3fc   :  { %v1749_v55 = vpop.eup %1748  ;;  %v1114_v58 = vsub.f32 0.0, %v1098_v51  ;;  %v2382_v50 = vadd.f32 %v1700_v42, %v2311_v13  ;;  %v1060_v61 = vpop.f32.mrb[31].mxu1  ;;  %1768 = vpow2.f32 %v1139_v3  ;;  %v1154_v3 = vmul.f32 %v2364_v30, %v1153_v39 }
 0x3fd   :  { %v1113_v6 = vsub.f32 0.0, %v1097_v52  ;;  %v2387_v56 = vadd.f32 %v2311_v13, %v1060_v61  ;;  %v1160_v12 = vmul.f32 0.6931472, %v1749_v55  ;;  %v1751_v2 = vpop.eup %1750  ;;  %1770 = vpow2.f32 %v1137_v10 }
 0x3fe   :  { %v1100_v16 = vand.u32 2147483647, %v2382_v50  ;;  %v2390_v18 = vpop.eup %1752  ;;  %v1143_v34 = vmul.f32 1.442695, %v1114_v58  ;;  %v1176_v46 = vadd.f32 1.0, %v1751_v2  ;;  %v1179_v42 = vmul.f32 -0.5, %v1751_v2 }
 0x3ff   :  { %v1099_v43 = vand.u32 2147483647, %v2387_v56  ;;  %v1166_v22 = vsel %vm1165_vm5, %v1163_v0, %v1160_v12  ;;  %v2394_v23 = vpop.eup %1754  ;;  %v1141_v37 = vmul.f32 1.442695, %v1113_v6  ;;  %v1155_v55 = vand.u32 2147483647, %v2364_v30 }
 0x400   :  { %v1116_v13 = vsub.f32 0.0, %v1100_v16  ;;  %v1294_v36 = vadd.f32 %v1166_v22, %v1070_v4  ;;  %v2396_v45 = vpop.eup %1756  ;;  %1772 = vlog2.f32 %v1176_v46  ;;  %v1167_v58 = vadd.f32 1.0, %v2390_v18 }
 0x401   :  { %v2399_v51 = vpop.eup %1758  ;;  %v1115_v52 = vsub.f32 0.0, %v1099_v43  ;;  %1774 = vpow2.f32 %v1143_v34  ;;  %v1182_v12 = vand.u32 2147483647, %v1751_v2  ;;  %v1170_v10 = vmul.f32 -0.5, %v2390_v18 }
 0x402   :  { %1327 = vrot.lane.b32.xlu1 %v1294_v36, %s1810_s8  ;;  %v2406_v61 = vpop.eup %1760  ;;  %v1147_v5 = vmul.f32 1.442695, %v1116_v13  ;;  %1776 = vpow2.f32 %v1141_v37  ;;  %v1194_v16 = vadd.f32 1.0, %v2394_v23  ;;  %v1180_v36 = vadd.f32 1.0, %v1179_v42 }
 0x403   :  { %v1763_v6 = vpop.eup %1762  ;;  %v1145_v43 = vmul.f32 1.442695, %v1115_v52  ;;  %1778 = vlog2.f32 %v1167_v58  ;;  %vm1156_vm6 = vcmp.lt.f32.partialorder %v1155_v55, 0.0004427343  ;;  %v1197_v46 = vmul.f32 -0.5, %v2394_v23 }
 0x404   :  { %v1151_v22 = vmul.f32 0.6931472, %v1763_v6  ;;  %1780 = vlog2.f32 %v1194_v16  ;;  %v1185_v34 = vadd.f32 1.0, %v2396_v45  ;;  %v2414_v13 = vpop.eup %1764  ;;  %v1173_v37 = vand.u32 2147483647, %v2390_v18 }
 0x405   :  { %1782 = vpow2.f32 %v1147_v5  ;;  %v2418_v0 = vpop.eup %1766  ;;  %v1171_v42 = vadd.f32 1.0, %v1170_v10  ;;  %v1188_v55 = vmul.f32 -0.5, %v2396_v45  ;;  %v1181_v58 = vmul.f32 %v1751_v2, %v1180_v36 }
 0x406   :  { %v1157_v39 = vsel %vm1156_vm6, %v1154_v3, %v1151_v22  ;;  %1784 = vlog2.f32 %v1185_v34  ;;  %vm2423_vm7 = vcmp.lt.f32.partialorder %v1182_v12, 0.0004427343  ;;  %v1212_v5 = vadd.f32 1.0, %v2399_v51  ;;  %v2428_v3 = vpop.eup %1768 }
 0x407   :  { %v1293_v52 = vadd.f32 %v1157_v39, %v1069_v19  ;;  %1786 = vpow2.f32 %v1145_v43  ;;  %v1198_v16 = vadd.f32 1.0, %v1197_v46  ;;  %v1200_v9 = vand.u32 2147483647, %v2394_v23  ;;  %v2434_v22 = vpop.eup %1770 }
 0x408   :  { %v1191_v19 = vand.u32 2147483647, %v2396_v45  ;;  %v1203_v10 = vadd.f32 1.0, %v2406_v61  ;;  %vm2436_vm8 = vcmp.lt.f32.partialorder %v1173_v37, 0.0004427343  ;;  %1788 = vlog2.f32 %v1212_v5 }
 0x409   :  { %1325 = vrot.lane.b32.xlu0 %v1293_v52, %s1810_s8  ;;  %v1215_v12 = vmul.f32 -0.5, %v2399_v51  ;;  %v1230_v43 = vadd.f32 1.0, %v2414_v13  ;;  %v1172_v46 = vmul.f32 %v2390_v18, %v1171_v42  ;;  %v1189_v34 = vadd.f32 1.0, %v1188_v55 }
 0x40a   :  { %v1773_v36 = vpop.eup %1772  ;;  %v1218_v39 = vand.u32 2147483647, %v2399_v51  ;;  %1790 = vlog2.f32 %v1203_v10  ;;  %v1206_v37 = vmul.f32 -0.5, %v2406_v61  ;;  %v1209_v4 = vand.u32 2147483647, %v2406_v61 }
 0x40b   :  { %v2444_v52 = vpop.eup %1774  ;;  %v1178_v30 = vmul.f32 0.6931472, %v1773_v36  ;;  %1792 = vlog2.f32 %v1230_v43  ;;  %v1199_v49 = vmul.f32 %v2394_v23, %v1198_v16  ;;  %vm2451_vm9 = vcmp.lt.f32.partialorder %v1200_v9, 0.0004427343 }
 0x40c   :  { %v2448_v5 = vpop.eup %1776  ;;  %vm2455_vm10 = vcmp.lt.f32.partialorder %v1191_v19, 0.0004427343  ;;  %v1221_v42 = vadd.f32 1.0, %v2418_v0  ;;  %v1216_v36 = vadd.f32 1.0, %v1215_v12  ;;  %v1233_v43 = vmul.f32 -0.5, %v2414_v13 }
 0x40d   :  { %v1779_v55 = vpop.eup %1778  ;;  %v1184_v10 = vsel %vm2423_vm7, %v1181_v58, %v1178_v30  ;;  %v1248_v20 = vadd.f32 1.0, %v2428_v3  ;;  %vm2466_vm11 = vcmp.lt.f32.partialorder %v1218_v39, 0.0004427343  ;;  %v1190_v30 = vmul.f32 %v2396_v45, %v1189_v34 }
 0x40e   :  { %v1781_v23 = vpop.eup %1780  ;;  %v1296_v16 = vadd.f32 %v1184_v10, %v1072_v60  ;;  %v1169_v9 = vmul.f32 0.6931472, %v1779_v55  ;;  %1794 = vlog2.f32 %v1221_v42  ;;  %v1207_v58 = vadd.f32 1.0, %v1206_v37 }
 0x40f   :  { %v2470_v14 = vpop.eup %1782  ;;  %v1196_v54 = vmul.f32 0.6931472, %v1781_v23  ;;  %vm2473_vm12 = vcmp.lt.f32.partialorder %v1209_v4, 0.0004427343  ;;  %v1236_v60 = vand.u32 2147483647, %v2414_v13  ;;  %1796 = vlog2.f32 %v1248_v20 }
 0x410   :  { %v1785_v12 = vpop.eup %1784  ;;  %1331 = vrot.lane.b32.xlu1 %v1296_v16, %s1810_s8  ;;  %v1175_v15 = vsel %vm2436_vm8, %v1172_v46, %v1169_v9  ;;  %v1224_v39 = vmul.f32 -0.5, %v2418_v0  ;;  %v2675_v45 = vmax.f32 %v2325_v17, 0.0  ;;  %v1234_v55 = vadd.f32 1.0, %v1233_v43 }
 0x411   :  { %v2482_v42 = vpop.eup %1786  ;;  %v1202_v4 = vsel %vm2451_vm9, %v1199_v49, %v1196_v54  ;;  %v1187_v37 = vmul.f32 0.6931472, %v1785_v12  ;;  %v2676_v10 = vmax.f32 %v2329_v21, 0.0  ;;  %v1217_v2 = vmul.f32 %v2399_v51, %v1216_v36 }
 0x412   :  { %v1295_v34 = vadd.f32 %v1175_v15, %v2675_v45  ;;  %v1251_v46 = vmul.f32 -0.5, %v2428_v3  ;;  %v1239_v16 = vadd.f32 1.0, %v2434_v22  ;;  %v1789_v20 = vpop.eup %1788  ;;  %v1208_v32 = vmul.f32 %v2406_v61, %v1207_v58 }
 0x413   :  { %v1298_v23 = vadd.f32 %v1202_v4, %v2676_v10  ;;  %v1193_v17 = vsel %vm2455_vm10, %v1190_v30, %v1187_v37  ;;  %v1227_v54 = vand.u32 2147483647, %v2418_v0  ;;  %v1266_v49 = vadd.f32 1.0, %v2444_v52 }
 0x414   :  { %1329 = vrot.lane.b32.xlu0 %v1295_v34, %s1810_s8  ;;  %v1791_v21 = vpop.eup %1790  ;;  %v2677_v51 = vmax.f32 %v2333_v25, 0.0  ;;  %v1214_v43 = vmul.f32 0.6931472, %v1789_v20  ;;  %vm2502_vm13 = vcmp.lt.f32.partialorder %v1236_v60, 0.0004427343  ;;  %1798 = vlog2.f32 %v1239_v16 }
 0x415   :  { %1335 = vrot.lane.b32.xlu1 %v1298_v23, %s1810_s8  ;;  %v1793_v18 = vpop.eup %1792  ;;  %v1205_v30 = vmul.f32 0.6931472, %v1791_v21  ;;  %v1235_v61 = vmul.f32 %v2414_v13, %v1234_v55  ;;  %v1225_v58 = vadd.f32 1.0, %v1224_v39  ;;  %1800 = vlog2.f32 %v1266_v49 }
 0x416   :  { %v1297_v36 = vadd.f32 %v1193_v17, %v2677_v51  ;;  %v1220_v12 = vsel %vm2466_vm11, %v1217_v2, %v1214_v43  ;;  %v1232_v15 = vmul.f32 0.6931472, %v1793_v18  ;;  %v1252_v45 = vadd.f32 1.0, %v1251_v46 }
 0x417   :  { %v1254_v25 = vand.u32 2147483647, %v2428_v3  ;;  %v2680_v60 = vmax.f32 %v2338_v41, 0.0  ;;  %v1211_v4 = vsel %vm2473_vm12, %v1208_v32, %v1205_v30  ;;  %v1242_v37 = vmul.f32 -0.5, %v2434_v22 }
 0x418   :  { %1333 = vrot.lane.b32.xlu0 %v1297_v36, %s1810_s8  ;;  %v1257_v13 = vadd.f32 1.0, %v2448_v5  ;;  %v1795_v39 = vpop.eup %1794  ;;  %v2681_v19 = vmax.f32 %v2341_v40, 0.0  ;;  %v1238_v10 = vsel %vm2502_vm13, %v1235_v61, %v1232_v15  ;;  %vm2521_vm14 = vcmp.lt.f32.partialorder %v1227_v54, 0.0004427343 }
 0x419   :  { %v1300_v34 = vadd.f32 %v1220_v12, %v2680_v60  ;;  %v1269_v41 = vmul.f32 -0.5, %v2444_v52  ;;  %v2684_v6 = vmax.f32 %v2348_v57, 0.0  ;;  %v1223_v46 = vmul.f32 0.6931472, %v1795_v39  ;;  %v1797_v40 = vpop.eup %1796 }
 0x41a   :  { %v1299_v55 = vadd.f32 %v1211_v4, %v2681_v19  ;;  %v1226_v16 = vmul.f32 %v2418_v0, %v1225_v58  ;;  %1802 = vlog2.f32 %v1257_v13  ;;  %v1080_v20 = vmax.f32 %v2357_v62, 0.0 }
 0x41b   :  { %1339 = vrot.lane.b32.xlu1 %v1300_v34, %s1810_s8  ;;  %v1302_v2 = vadd.f32 %v1238_v10, %v2684_v6  ;;  %vm2531_vm15 = vcmp.lt.f32.partialorder %v1254_v25, 0.0004427343  ;;  %v1245_v32 = vand.u32 2147483647, %v2434_v22  ;;  %v1284_v54 = vadd.f32 1.0, %v2470_v14 }
 0x41c   :  { %1337 = vrot.lane.b32.xlu0 %v1299_v55, %s1810_s8  ;;  %v1229_v57 = vsel %vm2521_vm14, %v1226_v16, %v1223_v46  ;;  %v1250_v49 = vmul.f32 0.6931472, %v1797_v40  ;;  %v1253_v0 = vmul.f32 %v2428_v3, %v1252_v45  ;;  %v1243_v21 = vadd.f32 1.0, %v1242_v37 }
 0x41d   :  { %v2687_v51 = vmax.f32 %v2352_v63, 0.0  ;;  %v1270_v36 = vadd.f32 1.0, %v1269_v41  ;;  %v1260_v43 = vmul.f32 -0.5, %v2448_v5  ;;  %1804 = vlog2.f32 %v1284_v54 }
 0x41e   :  { %v1256_v9 = vsel %vm2531_vm15, %v1253_v0, %v1250_v49  ;;  %v1272_v18 = vand.u32 2147483647, %v2444_v52  ;;  %v1275_v30 = vadd.f32 1.0, %v2482_v42  ;;  %v1799_v61 = vpop.eup %1798  ;;  %v1079_v3 = vmax.f32 %v2362_v8, 0.0 }
 0x41f   :  { %v1301_v62 = vadd.f32 %v1229_v57, %v2687_v51  ;;  %1343 = vrot.lane.b32.xlu1 %v1302_v2, %s1810_s8  ;;  %v1304_v58 = vadd.f32 %v1256_v9, %v1080_v20  ;;  %v1801_v12 = vpop.eup %1800  ;;  %v1241_v63 = vmul.f32 0.6931472, %v1799_v61  ;;  %v1244_v15 = vmul.f32 %v2434_v22, %v1243_v21 }
 0x420   :  { %v1287_v45 = vmul.f32 -0.5, %v2470_v14  ;;  %1806 = vlog2.f32 %v1275_v30  ;;  %vm1246_vm0 = vcmp.lt.f32.partialorder %v1245_v32, 0.0004427343  ;;  %v1268_v25 = vmul.f32 0.6931472, %v1801_v12 }
 0x421   :  { %1341 = vrot.lane.b32.xlu0 %v1301_v62, %s1810_s8  ;;  %v1271_v60 = vmul.f32 %v2444_v52, %v1270_v36  ;;  %v1261_v34 = vadd.f32 1.0, %v1260_v43  ;;  %v1082_v4 = vmax.f32 %v2371_v31, 0.0  ;;  %v1247_v8 = vsel %vm1246_vm0, %v1244_v15, %v1241_v63 }
 0x422   :  { %vm1273_vm1 = vcmp.lt.f32.partialorder %v1272_v18, 0.0004427343  ;;  %v1263_v37 = vand.u32 2147483647, %v2448_v5  ;;  %v1303_v13 = vadd.f32 %v1247_v8, %v1079_v3  ;;  %v1278_v22 = vmul.f32 -0.5, %v2482_v42 }
 0x423   :  { %1347 = vrot.lane.b32.xlu1 %v1304_v58, %s1810_s8  ;;  %v1274_v39 = vsel %vm1273_vm1, %v1271_v60, %v1268_v25  ;;  %v1288_v10 = vadd.f32 1.0, %v1287_v45  ;;  %v1262_v52 = vmul.f32 %v2448_v5, %v1261_v34  ;;  %v1290_v31 = vand.u32 2147483647, %v2470_v14  ;;  %v2688_v60 = vld [vmem:[#allocation2_spill] sm:$0xff] }
 0x424   :  { %v1803_v19 = vpop.eup %1802  ;;  %v1306_v55 = vadd.f32 %v1274_v39, %v1082_v4  ;;  %v1081_v41 = vmax.f32 %v2374_v28, 0.0  ;;  %vm1264_vm2 = vcmp.lt.f32.partialorder %v1263_v37, 0.0004427343  ;;  %v1279_v46 = vadd.f32 1.0, %v1278_v22 }
 0x425   :  { %1345 = vrot.lane.b32.xlu0 %v1303_v13, %s1810_s8  ;;  %v1259_v23 = vmul.f32 0.6931472, %v1803_v19  ;;  %v1289_v20 = vmul.f32 %v2470_v14, %v1288_v10  ;;  %v1281_v17 = vand.u32 2147483647, %v2482_v42  ;;  %v1084_v32 = vmax.f32 %v2382_v50, 0.0 }
 0x426   :  { %vm1291_vm3 = vcmp.lt.f32.partialorder %v1290_v31, 0.0004427343  ;;  %v1280_v49 = vmul.f32 %v2482_v42, %v1279_v46  ;;  %v1083_v0 = vmax.f32 %v2387_v56, 0.0 }
 0x427   :  { %1351 = vrot.lane.b32.xlu1 %v1306_v55, %s1810_s8  ;;  %v1805_v6 = vpop.eup %1804  ;;  %v1265_v2 = vsel %vm1264_vm2, %v1262_v52, %v1259_v23  ;;  %vm1282_vm5 = vcmp.lt.f32.partialorder %v1281_v17, 0.0004427343 }
 0x428   :  { %v1305_v16 = vadd.f32 %v1265_v2, %v1081_v41  ;;  %v1286_v40 = vmul.f32 0.6931472, %v1805_v6 }
 0x42a   :  { %v1807_v5 = vpop.eup %1806  ;;  %1349 = vrot.lane.b32.xlu0 %v1305_v16, %s1810_s8  ;;  %v1292_v54 = vsel %vm1291_vm3, %v1289_v20, %v1286_v40 }
 0x42b   :  { %v1308_v28 = vadd.f32 %v1292_v54, %v1084_v32  ;;  %v1277_v57 = vmul.f32 0.6931472, %v1807_v5 }
 0x42d   :  { %1355 = vrot.lane.b32.xlu1 %v1308_v28, %s1810_s8  ;;  %v1283_v21 = vsel %vm1282_vm5, %v1280_v49, %v1277_v57 }
 0x42e   :  { %v1307_v14 = vadd.f32 %v1283_v21, %v1083_v0 }
 0x430   :  { %1353 = vrot.lane.b32.xlu0 %v1307_v14, %s1810_s8 }
 0x474   :  { %v1328_v51 = vpop.permute.xlu1 %1327 }
 0x475   :  { %v1374_v50 = vsel %vm875_vm4, %v2193_v26, %v1328_v51 }
 0x476   :  { %1390 = vst [vmem:[%s2660_s9 + $0x8] sm:$0xff] %v1374_v50 }
 0x47b   :  { %v1326_v62 = vpop.permute.xlu0 %1325 }
 0x47c   :  { %v1373_v42 = vsel %vm875_vm4, %v2190_v24, %v1326_v62 }
 0x47d   :  { %1389 = vst [vmem:[%s2660_s9] sm:$0xff] %v1373_v42 }
 0x482   :  { %v1332_v56 = vpop.permute.xlu1 %1331 }
 0x483   :  { %v1376_v36 = vsel %vm875_vm4, %v2211_v27, %v1332_v56 }
 0x484   :  { %1392 = vst [vmem:[%s2660_s9 + $0x18] sm:$0xff] %v1376_v36 }
 0x486   :  { %v1330_v26 = vpop.permute.xlu0 %1329 }
 0x487   :  { %v1375_v43 = vsel %vm875_vm4, %v2196_v33, %v1330_v26  ;;  %v1336_v9 = vpop.permute.xlu1 %1335 }
 0x488   :  { %1391 = vst [vmem:[%s2660_s9 + $0x10] sm:$0xff] %v1375_v43  ;;  %v1378_v24 = vsel %vm875_vm4, %v2227_v47, %v1336_v9 }
 0x489   :  { %1394 = vst [vmem:[%s2660_s9 + $0x28] sm:$0xff] %v1378_v24 }
 0x48a   :  { %v1334_v27 = vpop.permute.xlu0 %1333 }
 0x48b   :  { %v1377_v18 = vsel %vm875_vm4, %v2214_v29, %v1334_v27 }
 0x48c   :  { %1393 = vst [vmem:[%s2660_s9 + $0x20] sm:$0xff] %v1377_v18 }
 0x48d   :  { %v1340_v33 = vpop.permute.xlu1 %1339 }
 0x48e   :  { %v1380_v30 = vsel %vm875_vm4, %v2243_v53, %v1340_v33  ;;  %v1338_v47 = vpop.permute.xlu0 %1337 }
 0x48f   :  { %1396 = vst [vmem:[%s2660_s9 + $0x38] sm:$0xff] %v1380_v30  ;;  %v1379_v61 = vsel %vm875_vm4, %v2230_v35, %v1338_v47 }
 0x490   :  { %1395 = vst [vmem:[%s2660_s9 + $0x30] sm:$0xff] %v1379_v61 }
 0x491   :  { %v1344_v29 = vpop.permute.xlu1 %1343 }
 0x492   :  { %v1382_v3 = vsel %vm875_vm4, %v2259_v59, %v1344_v29 }
 0x493   :  { %1398 = vst [vmem:[%s2660_s9 + $0x48] sm:$0xff] %v1382_v3  ;;  %v1342_v53 = vpop.permute.xlu0 %1341 }
 0x494   :  { %v1381_v58 = vsel %vm875_vm4, %v2246_v38, %v1342_v53 }
 0x495   :  { %1397 = vst [vmem:[%s2660_s9 + $0x40] sm:$0xff] %v1381_v58  ;;  %v1348_v35 = vpop.permute.xlu1 %1347 }
 0x496   :  { %v1384_v12 = vsel %vm875_vm4, %v2275_v1, %v1348_v35 }
 0x497   :  { %1400 = vst [vmem:[%s2660_s9 + $0x58] sm:$0xff] %v1384_v12  ;;  %v1346_v59 = vpop.permute.xlu0 %1345 }
 0x498   :  { %v1383_v63 = vsel %vm875_vm4, %v2262_v44, %v1346_v59 }
 0x499   :  { %v1352_v15 = vpop.permute.xlu1 %1351  ;;  %1399 = vst [vmem:[%s2660_s9 + $0x50] sm:$0xff] %v1383_v63 }
 0x49a   :  { %v1386_v38 = vsel %vm875_vm4, %v2291_v7, %v1352_v15 }
 0x49b   :  { %1402 = vst [vmem:[%s2660_s9 + $0x68] sm:$0xff] %v1386_v38 }
 0x49c   :  { %v1350_v1 = vpop.permute.xlu0 %1349 }
 0x49d   :  { %v1385_v45 = vsel %vm875_vm4, %v2278_v48, %v1350_v1 }
 0x49e   :  { %1401 = vst [vmem:[%s2660_s9 + $0x60] sm:$0xff] %v1385_v45 }
 0x49f   :  { %v1356_v44 = vpop.permute.xlu1 %1355 }
 0x4a0   :  { %v1388_v25 = vsel %vm875_vm4, %v2304_v11, %v1356_v44 }
 0x4a1   :  { %1404 = vst [vmem:[%s2660_s9 + $0x78] sm:$0xff] %v1388_v25 }
 0x4a2   :  { %v1354_v7 = vpop.permute.xlu0 %1353 }
 0x4a3   :  { %v1387_v34 = vsel %vm875_vm4, %v2688_v60, %v1354_v7 }
 0x4a4   :  { %1403 = vst [vmem:[%s2660_s9 + $0x70] sm:$0xff] %v1387_v34 }

// kernel: dense_prefix.3
= control target key start
LH: loop header
LB: loop body
LE: loop exit
PB: predicated region body
PF: predicated region fallthrough
CT: control target
= control target key end

     0   :  { %vm35_vm0 = vcmask 1040384   ;;  %s1842_s24 = smov 1   ;;  %vm270_vm1 = vcmask 1046528   ;;  %s1844_s10 = smov 126   ;;  %vm495_vm10 = vcmask 1041408   ;;  %vm760_vm15 = vcmask 1045504   ;;  %s3666_s0 = inlined_call_operand.vmem [shape: f32[6,12,12], index: 0, kind: input, shape index: {}]   ;;  %s3667_s1 = inlined_call_operand.vmem [shape: f32[6,8,8], index: 1, kind: output, shape index: {0}]   ;;  %s3668_s3 = inlined_call_operand.vmem [shape: f32[6,8,8], index: 3, kind: output, shape index: {2}]   ;;  %s3669_s2 = inlined_call_operand.vmem [shape: f32[6,8,8], index: 2, kind: output, shape index: {1}]  }
   0x1   :  { %v1870_v0 = vld [vmem:[%s3666_s0 + $0x10] sm:$0xff]  ;;  %v1875_v1 = vld [vmem:[%s3666_s0] sm:$0xff]  ;;  %v1880_v2 = vld [vmem:[%s3666_s0 + $0x18] sm:$0xf]  ;;  %s1845_s11 = smov 2  }
   0x2   :  { %3723 = vst [vmem:[#allocation2_spill] sm:$0xff] %v1875_v1  ;;  %v1883_v3 = vrot.slane %v1870_v0, 7  ;;  %v1886_v4 = vrot.slane %v1875_v1, 7  ;;  %v40_v5 = vrot.slane %v1880_v2, 7  ;;  %v1892_v6 = vld [vmem:[%s3666_s0 + $0x8] sm:$0xf] }
   0x3   :  { %3724 = vst [vmem:[#allocation3_spill] sm:$0xff] %v1892_v6  ;;  %v1897_v7 = vld [vmem:[%s3666_s0 + $0x20] sm:$0xff]  ;;  %v37_v8 = vrot.slane %v1892_v6, 7  ;;  %v1903_v9 = vld [vmem:[%s3666_s0 + $0x28] sm:$0xf]  ;;  %v1924_v14 = vld [vmem:[%s3666_s0 + $0x30] sm:$0xff] }
   0x4   :  { %58 = vrot.lane.b32.xlu1 %v1883_v3, %s1842_s24  ;;  %54 = vrot.lane.b32.xlu0 %v1886_v4, %s1842_s24  ;;  %v1911_v10 = vsel %vm35_vm0, %v1883_v3, %v40_v5  ;;  %v1918_v12 = vrot.slane %v1897_v7, 7  ;;  %v43_v13 = vrot.slane %v1903_v9, 7  ;;  %v1929_v15 = vld [vmem:[%s3666_s0 + $0x38] sm:$0xf]  ;;  %v1940_v17 = vrot.slane %v1924_v14, 7  ;;  %v1946_v19 = vld [vmem:[%s3666_s0 + $0x40] sm:$0xff] }
   0x5   :  { %v1915_v11 = vsel %vm35_vm0, %v1886_v4, %v37_v8  ;;  %v46_v18 = vrot.slane %v1929_v15, 7  ;;  %v1951_v20 = vld [vmem:[%s3666_s0 + $0x48] sm:$0xf]  ;;  %v1962_v22 = vrot.slane %v1946_v19, 7  ;;  %v1968_v24 = vld [vmem:[%s3666_s0 + $0x50] sm:$0xff]  ;;  %v2068_v30 = vrot.slane %v1892_v6, 1 }
   0x6   :  { %v1937_v16 = vsel %vm35_vm0, %v1918_v12, %v43_v13  ;;  %v49_v23 = vrot.slane %v1951_v20, 7  ;;  %v1973_v25 = vld [vmem:[%s3666_s0 + $0x58] sm:$0xf]  ;;  %v1984_v27 = vrot.slane %v1968_v24, 7  ;;  %s1843_s0 = smov 127   ;;  %v271_v31 = vrot.slane %v1875_v1, 1 }
   0x7   :  { %v1959_v21 = vsel %vm35_vm0, %v1940_v17, %v46_v18  ;;  %v52_v28 = vrot.slane %v1973_v25, 7  ;;  %3725 = vst [vmem:[#allocation4_spill] sm:$0xff] %v2068_v30  ;;  %v2080_v33 = vrot.slane %v1880_v2, 1  ;;  %v274_v34 = vrot.slane %v1870_v0, 1 }
   0x8   :  { %60 = vrot.lane.b32.xlu1 %v1911_v10, %s1842_s24  ;;  %56 = vrot.lane.b32.xlu0 %v1915_v11, %s1842_s24  ;;  %v1981_v26 = vsel %vm35_vm0, %v1962_v22, %v49_v23  ;;  %v2077_v32 = vsel %vm270_vm1, %v271_v31, %v2068_v30  ;;  %v2092_v36 = vrot.slane %v1903_v9, 1  ;;  %v277_v37 = vrot.slane %v1897_v7, 1 }
   0x9   :  { %v1993_v29 = vsel %vm35_vm0, %v1984_v27, %v52_v28  ;;  %3726 = vst [vmem:[#allocation5_spill] sm:$0xff] %v2077_v32  ;;  %3727 = vst [vmem:[#allocation6_spill] sm:$0xff] %v2080_v33  ;;  %v2089_v35 = vsel %vm270_vm1, %v274_v34, %v2080_v33  ;;  %v2104_v39 = vrot.slane %v1929_v15, 1  ;;  %v280_v40 = vrot.slane %v1924_v14, 1 }
   0xa   :  { %3728 = vst [vmem:[#allocation7_spill] sm:$0xff] %v2089_v35  ;;  %3729 = vst [vmem:[#allocation8_spill] sm:$0xff] %v2092_v36  ;;  %v2101_v38 = vsel %vm270_vm1, %v277_v37, %v2092_v36  ;;  %v2116_v42 = vrot.slane %v1951_v20, 1  ;;  %v283_v43 = vrot.slane %v1946_v19, 1  ;;  %v2128_v45 = vrot.slane %v1973_v25, 1 }
   0xb   :  { %3730 = vst [vmem:[#allocation9_spill] sm:$0xff] %v2101_v38  ;;  %3731 = vst [vmem:[#allocation10_spill] sm:$0xff] %v2104_v39  ;;  %v2113_v41 = vsel %vm270_vm1, %v280_v40, %v2104_v39  ;;  %v286_v46 = vrot.slane %v1968_v24, 1 }
   0xc   :  { %64 = vrot.lane.b32.xlu1 %v1937_v16, %s1842_s24  ;;  %62 = vrot.lane.b32.xlu0 %v1918_v12, %s1842_s24  ;;  %3732 = vst [vmem:[#allocation11_spill] sm:$0xff] %v2113_v41  ;;  %3733 = vst [vmem:[#allocation12_spill] sm:$0xff] %v2116_v42  ;;  %v2125_v44 = vsel %vm270_vm1, %v283_v43, %v2116_v42 }
   0xd   :  { %3734 = vst [vmem:[#allocation13_spill] sm:$0xff] %v2125_v44  ;;  %3735 = vst [vmem:[#allocation14_spill] sm:$0xff] %v2128_v45  ;;  %v2137_v47 = vsel %vm270_vm1, %v286_v46, %v2128_v45 }
   0xe   :  { %3736 = vst [vmem:[#allocation15_spill] sm:$0xff] %v2137_v47 }
  0x10   :  { %68 = vrot.lane.b32.xlu1 %v1959_v21, %s1842_s24  ;;  %66 = vrot.lane.b32.xlu0 %v1940_v17, %s1842_s24 }
  0x14   :  { %72 = vrot.lane.b32.xlu1 %v1981_v26, %s1842_s24  ;;  %70 = vrot.lane.b32.xlu0 %v1962_v22, %s1842_s24 }
  0x18   :  { %76 = vrot.lane.b32.xlu1 %v1993_v29, %s1842_s24  ;;  %74 = vrot.lane.b32.xlu0 %v1984_v27, %s1842_s24 }
  0x1c   :  { %128 = vrot.lane.b32.xlu1 %v1915_v11, %s1843_s0  ;;  %126 = vrot.lane.b32.xlu0 %v1886_v4, %s1843_s0 }
  0x20   :  { %132 = vrot.lane.b32.xlu1 %v1911_v10, %s1843_s0  ;;  %130 = vrot.lane.b32.xlu0 %v1883_v3, %s1843_s0 }
  0x24   :  { %136 = vrot.lane.b32.xlu1 %v1937_v16, %s1843_s0  ;;  %134 = vrot.lane.b32.xlu0 %v1918_v12, %s1843_s0 }
  0x28   :  { %140 = vrot.lane.b32.xlu1 %v1959_v21, %s1843_s0  ;;  %138 = vrot.lane.b32.xlu0 %v1940_v17, %s1843_s0 }
  0x2c   :  { %144 = vrot.lane.b32.xlu1 %v1981_v26, %s1843_s0  ;;  %142 = vrot.lane.b32.xlu0 %v1962_v22, %s1843_s0 }
  0x30   :  { %148 = vrot.lane.b32.xlu1 %v1993_v29, %s1843_s0  ;;  %146 = vrot.lane.b32.xlu0 %v1984_v27, %s1843_s0 }
  0x34   :  { %176 = vrot.lane.b32.xlu1 %v1892_v6, %s1842_s24  ;;  %174 = vrot.lane.b32.xlu0 %v1875_v1, %s1842_s24 }
  0x38   :  { %180 = vrot.lane.b32.xlu1 %v1880_v2, %s1842_s24  ;;  %178 = vrot.lane.b32.xlu0 %v1870_v0, %s1842_s24 }
  0x3c   :  { %184 = vrot.lane.b32.xlu1 %v1903_v9, %s1842_s24  ;;  %182 = vrot.lane.b32.xlu0 %v1897_v7, %s1842_s24 }
  0x40   :  { %188 = vrot.lane.b32.xlu1 %v1929_v15, %s1842_s24  ;;  %186 = vrot.lane.b32.xlu0 %v1924_v14, %s1842_s24 }
  0x44   :  { %192 = vrot.lane.b32.xlu1 %v1951_v20, %s1842_s24  ;;  %190 = vrot.lane.b32.xlu0 %v1946_v19, %s1842_s24 }
  0x48   :  { %196 = vrot.lane.b32.xlu1 %v1973_v25, %s1842_s24  ;;  %194 = vrot.lane.b32.xlu0 %v1968_v24, %s1842_s24 }
  0x4c   :  { %224 = vrot.lane.b32.xlu1 %v1892_v6, %s1843_s0  ;;  %222 = vrot.lane.b32.xlu0 %v1875_v1, %s1843_s0 }
  0x50   :  { %228 = vrot.lane.b32.xlu1 %v1880_v2, %s1843_s0  ;;  %226 = vrot.lane.b32.xlu0 %v1870_v0, %s1843_s0 }
  0x54   :  { %232 = vrot.lane.b32.xlu1 %v1903_v9, %s1843_s0  ;;  %230 = vrot.lane.b32.xlu0 %v1897_v7, %s1843_s0 }
  0x58   :  { %236 = vrot.lane.b32.xlu1 %v1929_v15, %s1843_s0  ;;  %234 = vrot.lane.b32.xlu0 %v1924_v14, %s1843_s0 }
  0x5c   :  { %240 = vrot.lane.b32.xlu1 %v1951_v20, %s1843_s0  ;;  %238 = vrot.lane.b32.xlu0 %v1946_v19, %s1843_s0 }
  0x60   :  { %244 = vrot.lane.b32.xlu1 %v1973_v25, %s1843_s0  ;;  %242 = vrot.lane.b32.xlu0 %v1968_v24, %s1843_s0 }
  0x64   :  { %291 = vrot.lane.b32.xlu1 %v2068_v30, %s1842_s24  ;;  %289 = vrot.lane.b32.xlu0 %v2077_v32, %s1842_s24 }
  0x68   :  { %295 = vrot.lane.b32.xlu1 %v2080_v33, %s1842_s24  ;;  %293 = vrot.lane.b32.xlu0 %v2089_v35, %s1842_s24 }
  0x6c   :  { %299 = vrot.lane.b32.xlu1 %v2092_v36, %s1842_s24  ;;  %297 = vrot.lane.b32.xlu0 %v2101_v38, %s1842_s24 }
  0x70   :  { %303 = vrot.lane.b32.xlu1 %v2104_v39, %s1842_s24  ;;  %301 = vrot.lane.b32.xlu0 %v2113_v41, %s1842_s24 }
  0x74   :  { %307 = vrot.lane.b32.xlu1 %v2116_v42, %s1842_s24  ;;  %305 = vrot.lane.b32.xlu0 %v2125_v44, %s1842_s24 }
  0x76   :  { %v2139_v48 = vpop.permute.xlu1 %58  ;;  %v2141_v49 = vpop.permute.xlu0 %54 }
  0x78   :  { %311 = vrot.lane.b32.xlu1 %v2128_v45, %s1842_s24  ;;  %309 = vrot.lane.b32.xlu0 %v2137_v47, %s1842_s24 }
  0x7a   :  { %v2147_v50 = vpop.permute.xlu1 %60  ;;  %v2149_v51 = vpop.permute.xlu0 %56 }
  0x7c   :  { %363 = vrot.lane.b32.xlu1 %v2068_v30, %s1843_s0  ;;  %361 = vrot.lane.b32.xlu0 %v2077_v32, %s1843_s0 }
  0x7e   :  { %v2155_v52 = vpop.permute.xlu1 %64  ;;  %v2157_v53 = vpop.permute.xlu0 %62 }
  0x80   :  { %367 = vrot.lane.b32.xlu1 %v2080_v33, %s1843_s0  ;;  %365 = vrot.lane.b32.xlu0 %v2089_v35, %s1843_s0 }
  0x82   :  { %v2163_v54 = vpop.permute.xlu1 %68  ;;  %v2165_v55 = vpop.permute.xlu0 %66 }
  0x84   :  { %371 = vrot.lane.b32.xlu1 %v2092_v36, %s1843_s0  ;;  %369 = vrot.lane.b32.xlu0 %v2101_v38, %s1843_s0 }
  0x86   :  { %v2171_v56 = vpop.permute.xlu1 %72  ;;  %v2173_v57 = vpop.permute.xlu0 %70 }
  0x88   :  { %375 = vrot.lane.b32.xlu1 %v2104_v39, %s1843_s0  ;;  %373 = vrot.lane.b32.xlu0 %v2113_v41, %s1843_s0 }
  0x8a   :  { %v2179_v58 = vpop.permute.xlu1 %76  ;;  %v2181_v59 = vpop.permute.xlu0 %74 }
  0x8c   :  { %379 = vrot.lane.b32.xlu1 %v2116_v42, %s1843_s0  ;;  %377 = vrot.lane.b32.xlu0 %v2125_v44, %s1843_s0 }
  0x8e   :  { %v129_v60 = vpop.permute.xlu1 %128  ;;  %v127_v61 = vpop.permute.xlu0 %126 }
  0x90   :  { %383 = vrot.lane.b32.xlu1 %v2128_v45, %s1843_s0  ;;  %381 = vrot.lane.b32.xlu0 %v2137_v47, %s1843_s0 }
  0x92   :  { %v2191_v62 = vpop.permute.xlu1 %132  ;;  %v2193_v63 = vpop.permute.xlu0 %130 }
  0x96   :  { %v2195_v5 = vpop.permute.xlu1 %136  ;;  %v2197_v8 = vpop.permute.xlu0 %134 }
  0x9a   :  { %v2199_v13 = vpop.permute.xlu1 %140  ;;  %v2201_v18 = vpop.permute.xlu0 %138 }
  0x9b   :  { %3737 = vst [vmem:[#allocation16_spill] sm:$0xff] %v2201_v18 }
  0x9e   :  { %v2203_v23 = vpop.permute.xlu1 %144  ;;  %v2205_v28 = vpop.permute.xlu0 %142 }
  0x9f   :  { %3738 = vst [vmem:[#allocation17_spill] sm:$0xff] %v2203_v23  ;;  %3739 = vst [vmem:[#allocation18_spill] sm:$0xff] %v2205_v28 }
  0xa2   :  { %v2207_v31 = vpop.permute.xlu1 %148  ;;  %v2209_v34 = vpop.permute.xlu0 %146 }
  0xa3   :  { %3740 = vst [vmem:[#allocation19_spill] sm:$0xff] %v2207_v31  ;;  %3741 = vst [vmem:[#allocation20_spill] sm:$0xff] %v2209_v34 }
  0xa6   :  { %v177_v37 = vpop.permute.xlu1 %176  ;;  %v175_v40 = vpop.permute.xlu0 %174 }
  0xaa   :  { %v181_v43 = vpop.permute.xlu1 %180  ;;  %v179_v46 = vpop.permute.xlu0 %178 }
  0xae   :  { %v2211_v47 = vpop.permute.xlu1 %184  ;;  %v2213_v45 = vpop.permute.xlu0 %182 }
  0xaf   :  { %3742 = vst [vmem:[#allocation21_spill] sm:$0xff] %v2211_v47  ;;  %3743 = vst [vmem:[#allocation22_spill] sm:$0xff] %v2213_v45 }
  0xb2   :  { %v2215_v44 = vpop.permute.xlu1 %188  ;;  %v2217_v42 = vpop.permute.xlu0 %186 }
  0xb3   :  { %3744 = vst [vmem:[#allocation23_spill] sm:$0xff] %v2215_v44  ;;  %3745 = vst [vmem:[#allocation24_spill] sm:$0xff] %v2217_v42 }
  0xb6   :  { %v2219_v41 = vpop.permute.xlu1 %192  ;;  %v2221_v39 = vpop.permute.xlu0 %190 }
  0xb7   :  { %3746 = vst [vmem:[#allocation25_spill] sm:$0xff] %v2219_v41  ;;  %3747 = vst [vmem:[#allocation26_spill] sm:$0xff] %v2221_v39 }
  0xba   :  { %v2223_v38 = vpop.permute.xlu1 %196  ;;  %v2225_v36 = vpop.permute.xlu0 %194 }
  0xbb   :  { %3748 = vst [vmem:[#allocation27_spill] sm:$0xff] %v2223_v38  ;;  %3749 = vst [vmem:[#allocation28_spill] sm:$0xff] %v2225_v36 }
  0xbe   :  { %v225_v34 = vpop.permute.xlu1 %224  ;;  %v223_v35 = vpop.permute.xlu0 %222 }
  0xc2   :  { %v2227_v33 = vpop.permute.xlu1 %228  ;;  %v2229_v31 = vpop.permute.xlu0 %226 }
  0xc6   :  { %v2231_v28 = vpop.permute.xlu1 %232  ;;  %v2233_v23 = vpop.permute.xlu0 %230 }
  0xc7   :  { %3750 = vst [vmem:[#allocation29_spill] sm:$0xff] %v2231_v28  ;;  %3751 = vst [vmem:[#allocation30_spill] sm:$0xff] %v2233_v23  ;;  %v90_v28 = vmax.f32 %v1875_v1, %v2141_v49 }
  0xca   :  { %v2235_v44 = vpop.permute.xlu1 %236  ;;  %v2237_v42 = vpop.permute.xlu0 %234 }
  0xcb   :  { %3752 = vst [vmem:[#allocation31_spill] sm:$0xff] %v2235_v44  ;;  %3753 = vst [vmem:[#allocation32_spill] sm:$0xff] %v2237_v42  ;;  %v91_v44 = vmax.f32 %v1892_v6, %v2149_v51  ;;  %v95_v6 = vmax.f32 %v1903_v9, %v2155_v52  ;;  %v101_v52 = vmax.f32 %v1973_v25, %v2179_v58 }
  0xce   :  { %v2239_v41 = vpop.permute.xlu1 %240  ;;  %v2241_v39 = vpop.permute.xlu0 %238 }
  0xcf   :  { %3754 = vst [vmem:[#allocation33_spill] sm:$0xff] %v2239_v41  ;;  %3755 = vst [vmem:[#allocation34_spill] sm:$0xff] %v2241_v39  ;;  %v92_v39 = vmax.f32 %v1870_v0, %v2139_v48  ;;  %v114_v41 = vmax.f32 %v90_v28, %v1886_v4  ;;  %v97_v48 = vmax.f32 %v1929_v15, %v2163_v54 }
  0xd0   :  { %v96_v28 = vmax.f32 %v1924_v14, %v2165_v55  ;;  %v119_v55 = vmax.f32 %v95_v6, %v1937_v16 }
  0xd1   :  { %v162_v51 = vmax.f32 %v114_v41, %v127_v61  ;;  %v98_v41 = vmax.f32 %v1946_v19, %v2173_v57  ;;  %v121_v57 = vmax.f32 %v97_v48, %v1959_v21  ;;  %v3762_v48 = vld [vmem:[#allocation5_spill] sm:$0xff] }
  0xd2   :  { %v2243_v38 = vpop.permute.xlu1 %244  ;;  %v2245_v36 = vpop.permute.xlu0 %242 }
  0xd3   :  { %3756 = vst [vmem:[#allocation35_spill] sm:$0xff] %v2243_v38  ;;  %3757 = vst [vmem:[#allocation36_spill] sm:$0xff] %v2245_v36  ;;  %v93_v36 = vmax.f32 %v1880_v2, %v2147_v50  ;;  %v115_v38 = vmax.f32 %v91_v44, %v1915_v11  ;;  %v116_v11 = vmax.f32 %v92_v39, %v1883_v3 }
  0xd4   :  { %v210_v44 = vmax.f32 %v162_v51, %v175_v40  ;;  %v100_v39 = vmax.f32 %v1968_v24, %v2181_v59  ;;  %v167_v40 = vmax.f32 %v119_v55, %v2195_v5  ;;  %v122_v6 = vmax.f32 %v98_v41, %v1962_v22  ;;  %v3759_v5 = vld [vmem:[#allocation21_spill] sm:$0xff] }
  0xd5   :  { %v163_v1 = vmax.f32 %v115_v38, %v129_v60  ;;  %v117_v50 = vmax.f32 %v93_v36, %v1911_v10  ;;  %v99_v38 = vmax.f32 %v1951_v20, %v2171_v56 }
  0xd6   :  { %v292_v18 = vpop.permute.xlu1 %291  ;;  %v290_v32 = vpop.permute.xlu0 %289  ;;  %v258_v36 = vmax.f32 %v210_v44, %v223_v35  ;;  %v3766_v44 = vld [vmem:[#allocation30_spill] sm:$0xff] }
  0xd7   :  { %v211_v4 = vmax.f32 %v163_v1, %v177_v37  ;;  %v165_v3 = vmax.f32 %v117_v50, %v2191_v62  ;;  %v164_v1 = vmax.f32 %v116_v11, %v2193_v63  ;;  %v120_v63 = vmax.f32 %v96_v28, %v1940_v17  ;;  %v3763_v50 = vld [vmem:[#allocation16_spill] sm:$0xff]  ;;  %v3764_v11 = vld [vmem:[#allocation17_spill] sm:$0xff] }
  0xd8   :  { %v325_v37 = vmax.f32 %v258_v36, %v290_v32  ;;  %v123_v35 = vmax.f32 %v99_v38, %v1981_v26  ;;  %v169_v32 = vmax.f32 %v121_v57, %v2199_v13  ;;  %v215_v17 = vmax.f32 %v167_v40, %v3759_v5  ;;  %v3767_v38 = vld [vmem:[#allocation18_spill] sm:$0xff]  ;;  %v3770_v36 = vld [vmem:[#allocation24_spill] sm:$0xff]  ;;  %v3775_v40 = vld [vmem:[#allocation7_spill] sm:$0xff] }
  0xd9   :  { %v259_v10 = vmax.f32 %v211_v4, %v225_v34  ;;  %v213_v58 = vmax.f32 %v165_v3, %v181_v43  ;;  %v212_v60 = vmax.f32 %v164_v1, %v179_v46  ;;  %v3761_v46 = vld [vmem:[#allocation4_spill] sm:$0xff]  ;;  %v3765_v4 = vld [vmem:[#allocation29_spill] sm:$0xff]  ;;  %v170_v41 = vmax.f32 %v122_v6, %v3767_v38  ;;  %v3769_v1 = vld [vmem:[#allocation23_spill] sm:$0xff] }
  0xda   :  { %v296_v30 = vpop.permute.xlu1 %295  ;;  %v294_v45 = vpop.permute.xlu0 %293  ;;  %v349_v22 = vmax.f32 %v325_v37, %v3762_v48  ;;  %v3777_v6 = vld [vmem:[#allocation31_spill] sm:$0xff]  ;;  %v3778_v5 = vld [vmem:[#allocation32_spill] sm:$0xff] }
  0xdb   :  { %v326_v61 = vmax.f32 %v259_v10, %v292_v18  ;;  %v261_v16 = vmax.f32 %v213_v58, %v2227_v33  ;;  %v260_v21 = vmax.f32 %v212_v60, %v2229_v31  ;;  %v171_v33 = vmax.f32 %v123_v35, %v3764_v11  ;;  %v3772_v58 = vld [vmem:[#allocation3_spill] sm:$0xff]  ;;  %v3773_v60 = vld [vmem:[#allocation2_spill] sm:$0xff] }
  0xdc   :  { %v263_v31 = vmax.f32 %v215_v17, %v3765_v4  ;;  %v217_v10 = vmax.f32 %v169_v32, %v3769_v1  ;;  %v3783_v4 = vld [vmem:[#allocation33_spill] sm:$0xff] }
  0xdd   :  { %v328_v18 = vmax.f32 %v261_v16, %v296_v30  ;;  %v327_v43 = vmax.f32 %v260_v21, %v294_v45  ;;  %v350_v51 = vmax.f32 %v326_v61, %v3761_v46  ;;  %v3774_v61 = vld [vmem:[#allocation6_spill] sm:$0xff] }
  0xde   :  { %v2251_v23 = vpop.permute.xlu1 %299  ;;  %v2253_v42 = vpop.permute.xlu0 %297 }
  0xdf   :  { %3758 = vst [vmem:[#allocation37_spill] sm:$0xff] %v2253_v42  ;;  %v94_v42 = vmax.f32 %v1897_v7, %v2157_v53  ;;  %v330_v55 = vmax.f32 %v263_v31, %v2251_v23  ;;  %v352_v37 = vmax.f32 %v328_v18, %v3774_v61 }
  0xe1   :  { %v118_v56 = vmax.f32 %v94_v42, %v1918_v12  ;;  %v125_v12 = vmax.f32 %v101_v52, %v1993_v29  ;;  %v124_v42 = vmax.f32 %v100_v39, %v1984_v27  ;;  %v168_v29 = vmax.f32 %v120_v63, %v3763_v50  ;;  %v3768_v52 = vld [vmem:[#allocation19_spill] sm:$0xff]  ;;  %v3776_v63 = vld [vmem:[#allocation20_spill] sm:$0xff] }
  0xe2   :  { %v2261_v47 = vpop.permute.xlu1 %303  ;;  %v2263_v49 = vpop.permute.xlu0 %301 }
  0xe3   :  { %v166_v62 = vmax.f32 %v118_v56, %v2197_v8  ;;  %v3760_v8 = vld [vmem:[#allocation22_spill] sm:$0xff]  ;;  %v173_v3 = vmax.f32 %v125_v12, %v3768_v52  ;;  %v216_v39 = vmax.f32 %v168_v29, %v3770_v36  ;;  %v172_v35 = vmax.f32 %v124_v42, %v3776_v63  ;;  %v3779_v42 = vld [vmem:[#allocation25_spill] sm:$0xff]  ;;  %v3788_v36 = vld [vmem:[#allocation11_spill] sm:$0xff] }
  0xe4   :  { %v265_v12 = vmax.f32 %v217_v10, %v3777_v6  ;;  %v219_v18 = vmax.f32 %v171_v33, %v3779_v42  ;;  %v3792_v63 = vld [vmem:[#allocation13_spill] sm:$0xff] }
  0xe5   :  { %v214_v26 = vmax.f32 %v166_v62, %v3760_v8  ;;  %v351_v62 = vmax.f32 %v327_v43, %v3775_v40  ;;  %v264_v17 = vmax.f32 %v216_v39, %v3778_v5  ;;  %v3780_v43 = vld [vmem:[#allocation26_spill] sm:$0xff]  ;;  %v3791_v40 = vld [vmem:[#allocation12_spill] sm:$0xff] }
  0xe6   :  { %v2281_v53 = vpop.permute.xlu1 %307  ;;  %v2283_v54 = vpop.permute.xlu0 %305  ;;  %v3771_v56 = vld [vmem:[#allocation37_spill] sm:$0xff]  ;;  %v218_v46 = vmax.f32 %v170_v41, %v3780_v43  ;;  %v332_v29 = vmax.f32 %v265_v12, %v2261_v47  ;;  %v267_v31 = vmax.f32 %v219_v18, %v3783_v4 }
  0xe7   :  { %v262_v13 = vmax.f32 %v214_v26, %v3766_v44  ;;  %v331_v11 = vmax.f32 %v264_v17, %v2263_v49  ;;  %v3784_v44 = vld [vmem:[#allocation34_spill] sm:$0xff]  ;;  %v3785_v49 = vld [vmem:[#allocation27_spill] sm:$0xff] }
  0xe8   :  { %v221_v52 = vmax.f32 %v173_v3, %v3785_v49 }
  0xe9   :  { %v329_v57 = vmax.f32 %v262_v13, %v3771_v56  ;;  %v266_v13 = vmax.f32 %v218_v46, %v3784_v44  ;;  %v355_v39 = vmax.f32 %v331_v11, %v3788_v36 }
  0xea   :  { %v2296_v34 = vpop.permute.xlu1 %311  ;;  %v2298_v59 = vpop.permute.xlu0 %309 }
  0xeb   :  { %v333_v1 = vmax.f32 %v266_v13, %v2283_v54 }
  0xee   :  { %v364_v28 = vpop.permute.xlu1 %363  ;;  %v362_v27 = vpop.permute.xlu0 %361 }
  0xef   :  { %v398_v30 = vmax.f32 %v350_v51, %v364_v28  ;;  %v397_v45 = vmax.f32 %v349_v22, %v362_v27  ;;  %v3781_v51 = vld [vmem:[#allocation8_spill] sm:$0xff]  ;;  %v3782_v22 = vld [vmem:[#allocation9_spill] sm:$0xff] }
  0xf0   :  { %v354_v48 = vmax.f32 %v330_v55, %v3781_v51  ;;  %v353_v50 = vmax.f32 %v329_v57, %v3782_v22  ;;  %v3789_v55 = vld [vmem:[#allocation35_spill] sm:$0xff] }
  0xf1   :  { %vm410_vm2 = vcmp.eq.f32.partialorder %v398_v30, %v3772_v58  ;;  %vm409_vm3 = vcmp.eq.f32.partialorder %v397_v45, %v3773_v60  ;;  %v3786_v30 = vld [vmem:[#allocation28_spill] sm:$0xff]  ;;  %v269_v56 = vmax.f32 %v221_v52, %v3789_v55 }
  0xf2   :  { %v2327_v16 = vsel %vm410_vm2, %v3772_v58, 0.0  ;;  %v2330_v21 = vsel %vm409_vm3, %v3773_v60, 0.0  ;;  %v368_v23 = vpop.permute.xlu1 %367  ;;  %v366_v32 = vpop.permute.xlu0 %365  ;;  %v220_v45 = vmax.f32 %v172_v35, %v3786_v30  ;;  %v3790_v60 = vld [vmem:[#allocation36_spill] sm:$0xff]  ;;  %vm483_vm2 = vcmask 58368  }
  0xf3   :  { %v400_v8 = vmax.f32 %v352_v37, %v368_v23  ;;  %v399_v26 = vmax.f32 %v351_v62, %v366_v32  ;;  %447 = vrot.lane.b32.xlu1 %v2327_v16, %s1844_s10  ;;  %445 = vrot.lane.b32.xlu0 %v2330_v21, %s1844_s10  ;;  %v336_v35 = vmax.f32 %v269_v56, %v2296_v34  ;;  %v2394_v34 = vmul.f32 2.0, %v2330_v21 }
  0xf4   :  { %v268_v54 = vmax.f32 %v220_v45, %v3790_v60  ;;  %vm481_vm3 = vcmask 64514  }
  0xf5   :  { %vm412_vm4 = vcmp.eq.f32.partialorder %v400_v8, %v1880_v2  ;;  %vm411_vm5 = vcmp.eq.f32.partialorder %v399_v26, %v1870_v0  ;;  %v3794_v26 = vld [vmem:[#allocation15_spill] sm:$0xff] }
  0xf6   :  { %v2348_v33 = vsel %vm412_vm4, %v1880_v2, 0.0  ;;  %v2351_v28 = vsel %vm411_vm5, %v1870_v0, 0.0  ;;  %v372_v27 = vpop.permute.xlu1 %371  ;;  %v370_v38 = vpop.permute.xlu0 %369  ;;  %v334_v2 = vmax.f32 %v267_v31, %v2281_v53  ;;  %v3787_v0 = vld [vmem:[#allocation10_spill] sm:$0xff] }
  0xf7   :  { %v402_v41 = vmax.f32 %v354_v48, %v372_v27  ;;  %v401_v47 = vmax.f32 %v353_v50, %v370_v38  ;;  %451 = vrot.lane.b32.xlu1 %v2348_v33, %s1844_s10  ;;  %449 = vrot.lane.b32.xlu0 %v2351_v28, %s1844_s10  ;;  %v356_v10 = vmax.f32 %v332_v29, %v3787_v0  ;;  %v2415_v50 = vmul.f32 2.0, %v2327_v16 }
  0xf8   :  { %v358_v62 = vmax.f32 %v334_v2, %v3791_v40  ;;  %v634_v29 = vrot.slane %v2394_v34, 7  ;;  %v2428_v11 = vrot.slane %v2351_v28, 6  ;;  %v500_v13 = vrot.slane %v2348_v33, 6 }
  0xf9   :  { %vm414_vm6 = vcmp.eq.f32.partialorder %v402_v41, %v1903_v9  ;;  %vm413_vm7 = vcmp.eq.f32.partialorder %v401_v47, %v1897_v7  ;;  %v2445_v27 = vmul.f32 2.0, %v2351_v28 }
  0xfa   :  { %v2367_v57 = vsel %vm414_vm6, %v1903_v9, 0.0  ;;  %v2370_v3 = vsel %vm413_vm7, %v1897_v7, 0.0  ;;  %v376_v58 = vpop.permute.xlu1 %375  ;;  %v374_v53 = vpop.permute.xlu0 %373  ;;  %v357_v9 = vmax.f32 %v333_v1, %v3792_v63  ;;  %v335_v7 = vmax.f32 %v268_v54, %v2298_v59  ;;  %v3793_v59 = vld [vmem:[#allocation14_spill] sm:$0xff] }
  0xfb   :  { %v404_v61 = vmax.f32 %v356_v10, %v376_v58  ;;  %v403_v37 = vmax.f32 %v355_v39, %v374_v53  ;;  %455 = vrot.lane.b32.xlu1 %v2367_v57, %s1844_s10  ;;  %453 = vrot.lane.b32.xlu0 %v2370_v3, %s1844_s10  ;;  %v360_v8 = vmax.f32 %v336_v35, %v3793_v59  ;;  %v2437_v44 = vmul.f32 2.0, %v2367_v57 }
  0xfc   :  { %v359_v42 = vmax.f32 %v335_v7, %v3794_v26  ;;  %v664_v47 = vsub.f32 %v2330_v21, %v634_v29  ;;  %v2457_v52 = vmul.f32 2.0, %v2370_v3  ;;  %v501_v45 = vsel %vm495_vm10, %v2428_v11, %v500_v13 }
  0xfd   :  { %vm416_vm8 = vcmp.eq.f32.partialorder %v404_v61, %v1929_v15  ;;  %vm415_vm9 = vcmp.eq.f32.partialorder %v403_v37, %v1924_v14  ;;  %v641_v49 = vrot.slane %v2437_v44, 7  ;;  %v637_v10 = vrot.slane %v2445_v27, 7 }
  0xfe   :  { %v2384_v6 = vsel %vm416_vm8, %v1929_v15, 0.0  ;;  %v2387_v12 = vsel %vm415_vm9, %v1924_v14, 0.0  ;;  %v380_v23 = vpop.permute.xlu1 %379  ;;  %v378_v32 = vpop.permute.xlu0 %377  ;;  %v2397_v15 = vrot.slane %v2330_v21, 6  ;;  %v497_v14 = vrot.slane %v2327_v16, 6 }
  0xff   :  { %v406_v5 = vmax.f32 %v358_v62, %v380_v23  ;;  %v405_v17 = vmax.f32 %v357_v9, %v378_v32  ;;  %459 = vrot.lane.b32.xlu1 %v2384_v6, %s1844_s10  ;;  %457 = vrot.lane.b32.xlu0 %v2387_v12, %s1844_s10  ;;  %v2460_v30 = vmul.f32 2.0, %v2387_v12  ;;  %v502_v36 = vrot.slane %v2370_v3, 6 }
 0x100   :  { %v2473_v0 = vadd.f32 %v664_v47, %v2397_v15  ;;  %v503_v39 = vrot.slane %v2367_v57, 6  ;;  %v2479_v55 = vrot.slane %v2387_v12, 6  ;;  %v506_v58 = vrot.slane %v2384_v6, 6 }
 0x101   :  { %vm418_vm11 = vcmp.eq.f32.partialorder %v406_v5, %v1951_v20  ;;  %vm417_vm12 = vcmp.eq.f32.partialorder %v405_v17, %v1946_v19  ;;  %3795 = vst [vmem:[#allocation21_spill] sm:$0xff] %v2460_v30  ;;  %v666_v60 = vsub.f32 %v2351_v28, %v637_v10  ;;  %v640_v62 = vrot.slane %v2457_v52, 7 }
 0x102   :  { %v2405_v18 = vsel %vm418_vm11, %v1951_v20, 0.0  ;;  %v2408_v43 = vsel %vm417_vm12, %v1946_v19, 0.0  ;;  %v384_v46 = vpop.permute.xlu1 %383  ;;  %v382_v51 = vpop.permute.xlu0 %381  ;;  %v2420_v20 = vsel %vm495_vm10, %v2397_v15, %v497_v14  ;;  %v2425_v19 = vmul.f32 2.0, %v2348_v33  ;;  %3796 = vst [vmem:[#allocation22_spill] sm:$0xff] %v2473_v0  ;;  %3797 = vst [vmem:[#allocation4_spill] sm:$0xff] %v2479_v55 }
 0x103   :  { %v408_v48 = vmax.f32 %v360_v8, %v384_v46  ;;  %v407_v22 = vmax.f32 %v359_v42, %v382_v51  ;;  %463 = vrot.lane.b32.xlu1 %v2405_v18, %s1844_s10  ;;  %461 = vrot.lane.b32.xlu0 %v2408_v43, %s1844_s10  ;;  %v527_v41 = vsub.f32 %v2327_v16, %v2420_v20  ;;  %v2470_v1 = vmul.f32 2.0, %v2405_v18 }
 0x104   :  { %v638_v38 = vrot.slane %v2425_v19, 7  ;;  %v2487_v61 = vmul.f32 2.0, %v2408_v43  ;;  %v2505_v35 = vadd.f32 %v666_v60, %v2428_v11  ;;  %v3692_v7 = vrot.slane %v2460_v30, 7 }
 0x105   :  { %vm420_vm13 = vcmp.eq.f32.partialorder %v408_v48, %v1973_v25  ;;  %vm419_vm14 = vcmp.eq.f32.partialorder %v407_v22, %v1968_v24  ;;  %v504_v23 = vsel %vm495_vm10, %v502_v36, %v503_v39  ;;  %v668_v5 = vsub.f32 %v2370_v3, %v640_v62 }
 0x106   :  { %v2431_v4 = vsel %vm420_vm13, %v1973_v25, 0.0  ;;  %v2434_v31 = vsel %vm419_vm14, %v1968_v24, 0.0  ;;  %v2448_v25 = vmul.f32 2.0, %v2384_v6  ;;  %v635_v24 = vrot.slane %v2415_v50, 7  ;;  %3798 = vst [vmem:[#allocation5_spill] sm:$0xff] %v2487_v61  ;;  %3801 = vst [vmem:[#allocation29_spill] sm:$0xff] %v2505_v35 }
 0x107   :  { %467 = vrot.lane.b32.xlu1 %v2431_v4, %s1844_s10  ;;  %465 = vrot.lane.b32.xlu0 %v2434_v31, %s1844_s10  ;;  %v639_v54 = vsel %vm35_vm0, %v637_v10, %v638_v38  ;;  %v2490_v37 = vmul.f32 2.0, %v2431_v4  ;;  %v2499_v63 = vmul.f32 2.0, %v2434_v31  ;;  %v642_v17 = vsel %vm35_vm0, %v640_v62, %v641_v49 }
 0x108   :  { %v644_v2 = vrot.slane %v2448_v25, 7  ;;  %v636_v56 = vsel %vm35_vm0, %v634_v29, %v635_v24  ;;  %v667_v40 = vsub.f32 %v2348_v33, %v639_v54  ;;  %v647_v14 = vrot.slane %v2470_v1, 7 }
 0x109   :  { %v665_v53 = vsub.f32 %v2327_v16, %v636_v56  ;;  %3799 = vst [vmem:[#allocation16_spill] sm:$0xff] %v2499_v63  ;;  %v2516_v59 = vsel %vm495_vm10, %v2479_v55, %v506_v58  ;;  %v669_v8 = vsub.f32 %v2367_v57, %v642_v17  ;;  %v526_v42 = vsub.f32 %v2330_v21, %v2397_v15 }
 0x10a   :  { %v2509_v32 = vadd.f32 %v667_v40, %v501_v45  ;;  %3803 = vst [vmem:[#allocation18_spill] sm:$0xff] %v2516_v59  ;;  %v2522_v26 = vsel %vm35_vm0, %v3692_v7, %v644_v2  ;;  %v528_v46 = vsub.f32 %v2351_v28, %v2428_v11  ;;  %v529_v51 = vsub.f32 %v2348_v33, %v501_v45 }
 0x10b   :  { %552 = vrot.lane.b32.xlu1 %v2327_v16, %s1845_s11  ;;  %550 = vrot.lane.b32.xlu0 %v2330_v21, %s1845_s11  ;;  %v2502_v9 = vadd.f32 %v665_v53, %v2420_v20  ;;  %3804 = vst [vmem:[#allocation19_spill] sm:$0xff] %v2522_v26  ;;  %v2529_v48 = vadd.f32 %v668_v5, %v502_v36  ;;  %v650_v22 = vrot.slane %v2490_v37, 7  ;;  %v3691_v15 = vrot.slane %v2487_v61, 7 }
 0x10c   :  { %3802 = vst [vmem:[#allocation30_spill] sm:$0xff] %v2509_v32  ;;  %v531_v29 = vsub.f32 %v2367_v57, %v504_v23  ;;  %v2537_v20 = vadd.f32 %v669_v8, %v504_v23  ;;  %v530_v11 = vsub.f32 %v2370_v3, %v502_v36  ;;  %v533_v13 = vsub.f32 %v2384_v6, %v2516_v59 }
 0x10d   :  { %3800 = vst [vmem:[#allocation17_spill] sm:$0xff] %v2502_v9  ;;  %3805 = vst [vmem:[#allocation23_spill] sm:$0xff] %v2529_v48  ;;  %v3690_v24 = vrot.slane %v2499_v63, 7  ;;  %v2544_v38 = vmul.f32 0.5, %v527_v41  ;;  %v532_v47 = vsub.f32 %v2387_v12, %v2479_v55  ;;  %v2551_v49 = vsel %vm35_vm0, %v3691_v15, %v647_v14 }
 0x10e   :  { %3806 = vst [vmem:[#allocation24_spill] sm:$0xff] %v2537_v20  ;;  %3807 = vst [vmem:[#allocation37_spill] sm:$0xff] %v2551_v49  ;;  %v2553_v45 = vmul.f32 0.5, %v526_v42  ;;  %v2555_v2 = vmul.f32 0.5, %v529_v51  ;;  %v2561_v41 = vmul.f32 0.5, %v528_v46  ;;  %v2563_v10 = vmul.f32 0.5, %v531_v29 }
 0x10f   :  { %556 = vrot.lane.b32.xlu1 %v2348_v33, %s1845_s11  ;;  %554 = vrot.lane.b32.xlu0 %v2351_v28, %s1845_s11  ;;  %v2568_v36 = vsel %vm35_vm0, %v3690_v24, %v650_v22  ;;  %v2570_v39 = vmul.f32 0.5, %v530_v11  ;;  %v2572_v56 = vmul.f32 0.5, %v533_v13  ;;  %v2574_v58 = vmul.f32 0.5, %v532_v47 }
 0x110   :  { %3808 = vst [vmem:[#allocation3_spill] sm:$0xff] %v2563_v10  ;;  %3809 = vst [vmem:[#allocation2_spill] sm:$0xff] %v2568_v36  ;;  %v3689_v53 = vrot.slane %v2544_v38, 2  ;;  %v1517_v60 = vrot.slane %v2553_v45, 2  ;;  %v3688_v54 = vrot.slane %v2555_v2, 2  ;;  %v1520_v40 = vrot.slane %v2561_v41, 2 }
 0x111   :  { %3810 = vst [vmem:[#allocation6_spill] sm:$0xff] %v2570_v39  ;;  %3811 = vst [vmem:[#allocation7_spill] sm:$0xff] %v2572_v56  ;;  %v3687_v62 = vrot.slane %v2563_v10, 2  ;;  %v1523_v5 = vrot.slane %v2570_v39, 2  ;;  %v3686_v17 = vrot.slane %v2572_v56, 2  ;;  %v1526_v8 = vrot.slane %v2574_v58, 2 }
 0x112   :  { %3812 = vst [vmem:[#allocation20_spill] sm:$0xff] %v2574_v58  ;;  %v2588_v23 = vsel %vm760_vm15, %v1517_v60, %v3689_v53  ;;  %v2595_v14 = vsel %vm760_vm15, %v1520_v40, %v3688_v54  ;;  %v2669_v51 = vrot.slane %v2384_v6, 2  ;;  %v770_v22 = vrot.slane %v2387_v12, 2 }
 0x113   :  { %560 = vrot.lane.b32.xlu1 %v2367_v57, %s1845_s11  ;;  %558 = vrot.lane.b32.xlu0 %v2370_v3, %s1845_s11  ;;  %3813 = vst [vmem:[#allocation31_spill] sm:$0xff] %v2588_v23  ;;  %3814 = vst [vmem:[#allocation32_spill] sm:$0xff] %v2595_v14  ;;  %v2601_v42 = vsel %vm760_vm15, %v1523_v5, %v3687_v62  ;;  %v2610_v46 = vsel %vm760_vm15, %v1526_v8, %v3686_v17  ;;  %v2681_v11 = vrot.slane %v2405_v18, 2 }
 0x114   :  { %3815 = vst [vmem:[#allocation25_spill] sm:$0xff] %v2601_v42  ;;  %3816 = vst [vmem:[#allocation26_spill] sm:$0xff] %v2610_v46  ;;  %v2678_v29 = vsel %vm760_vm15, %v770_v22, %v2669_v51  ;;  %v773_v13 = vrot.slane %v2408_v43, 2  ;;  %v2693_v60 = vrot.slane %v2431_v4, 2  ;;  %v776_v40 = vrot.slane %v2434_v31, 2 }
 0x116   :  { %v2690_v47 = vsel %vm760_vm15, %v773_v13, %v2681_v11  ;;  %v2702_v5 = vsel %vm760_vm15, %v776_v40, %v2693_v60 }
 0x117   :  { %564 = vrot.lane.b32.xlu1 %v2384_v6, %s1845_s11  ;;  %562 = vrot.lane.b32.xlu0 %v2387_v12, %s1845_s11 }
 0x11b   :  { %568 = vrot.lane.b32.xlu1 %v2405_v18, %s1845_s11  ;;  %566 = vrot.lane.b32.xlu0 %v2408_v43, %s1845_s11 }
 0x11f   :  { %572 = vrot.lane.b32.xlu1 %v2431_v4, %s1845_s11  ;;  %570 = vrot.lane.b32.xlu0 %v2434_v31, %s1845_s11 }
 0x123   :  { %690 = vrot.lane.b32.xlu1 %v2415_v50, %s1842_s24  ;;  %688 = vrot.lane.b32.xlu0 %v2394_v34, %s1842_s24  ;;  %v2633_v34 = vrot.slane %v2327_v16, 2  ;;  %v761_v50 = vrot.slane %v2330_v21, 2 }
 0x127   :  { %694 = vrot.lane.b32.xlu1 %v2425_v19, %s1842_s24  ;;  %692 = vrot.lane.b32.xlu0 %v2445_v27, %s1842_s24  ;;  %v2642_v19 = vsel %vm760_vm15, %v761_v50, %v2633_v34  ;;  %v764_v27 = vrot.slane %v2351_v28, 2 }
 0x12b   :  { %698 = vrot.lane.b32.xlu1 %v2437_v44, %s1842_s24  ;;  %696 = vrot.lane.b32.xlu0 %v2457_v52, %s1842_s24  ;;  %v2645_v44 = vrot.slane %v2348_v33, 2  ;;  %v2657_v52 = vrot.slane %v2367_v57, 2 }
 0x12f   :  { %702 = vrot.lane.b32.xlu1 %v2448_v25, %s1842_s24  ;;  %700 = vrot.lane.b32.xlu0 %v2460_v30, %s1842_s24  ;;  %v2654_v25 = vsel %vm760_vm15, %v764_v27, %v2645_v44 }
 0x133   :  { %706 = vrot.lane.b32.xlu1 %v2470_v1, %s1842_s24  ;;  %704 = vrot.lane.b32.xlu0 %v2487_v61, %s1842_s24  ;;  %v767_v1 = vrot.slane %v2370_v3, 2 }
 0x137   :  { %710 = vrot.lane.b32.xlu1 %v2490_v37, %s1842_s24  ;;  %708 = vrot.lane.b32.xlu0 %v2499_v63, %s1842_s24  ;;  %v2666_v37 = vsel %vm760_vm15, %v767_v1, %v2657_v52 }
 0x13b   :  { %805 = vrot.lane.b32.xlu1 %v2633_v34, %s1844_s10  ;;  %803 = vrot.lane.b32.xlu0 %v2642_v19, %s1844_s10 }
 0x13f   :  { %809 = vrot.lane.b32.xlu1 %v2645_v44, %s1844_s10  ;;  %807 = vrot.lane.b32.xlu0 %v2654_v25, %s1844_s10 }
 0x143   :  { %813 = vrot.lane.b32.xlu1 %v2657_v52, %s1844_s10  ;;  %811 = vrot.lane.b32.xlu0 %v2666_v37, %s1844_s10 }
 0x147   :  { %817 = vrot.lane.b32.xlu1 %v2669_v51, %s1844_s10  ;;  %815 = vrot.lane.b32.xlu0 %v2678_v29, %s1844_s10 }
 0x14b   :  { %821 = vrot.lane.b32.xlu1 %v2681_v11, %s1844_s10  ;;  %819 = vrot.lane.b32.xlu0 %v2690_v47, %s1844_s10 }
 0x14f   :  { %825 = vrot.lane.b32.xlu1 %v2693_v60, %s1844_s10  ;;  %823 = vrot.lane.b32.xlu0 %v2702_v5, %s1844_s10 }
 0x165   :  { %v2708_v8 = vpop.permute.xlu1 %447  ;;  %v2710_v50 = vpop.permute.xlu0 %445 }
 0x166   :  { %484 = vst.msk [vmem:[%s3667_s1 + $0x6] sm:$0x3] %vm483_vm2, %v2708_v8 }
 0x167   :  { %482 = vst.msk [vmem:[%s3667_s1 - $0x2] sm:$0xfc] %vm481_vm3, %v2710_v50 }
 0x169   :  { %v2722_v27 = vpop.permute.xlu1 %451  ;;  %v2724_v1 = vpop.permute.xlu0 %449 }
 0x16a   :  { %486 = vst.msk [vmem:[%s3667_s1 + $0xe] sm:$0x3] %vm483_vm2, %v2722_v27 }
 0x16b   :  { %485 = vst.msk [vmem:[%s3667_s1 + $0x6] sm:$0xfc] %vm481_vm3, %v2724_v1 }
 0x16d   :  { %v2736_v22 = vpop.permute.xlu1 %455  ;;  %v2738_v13 = vpop.permute.xlu0 %453 }
 0x16e   :  { %488 = vst.msk [vmem:[%s3667_s1 + $0x16] sm:$0x3] %vm483_vm2, %v2736_v22 }
 0x16f   :  { %487 = vst.msk [vmem:[%s3667_s1 + $0xe] sm:$0xfc] %vm481_vm3, %v2738_v13 }
 0x171   :  { %v2750_v40 = vpop.permute.xlu1 %459  ;;  %v2752_v17 = vpop.permute.xlu0 %457 }
 0x172   :  { %490 = vst.msk [vmem:[%s3667_s1 + $0x1e] sm:$0x3] %vm483_vm2, %v2750_v40 }
 0x173   :  { %489 = vst.msk [vmem:[%s3667_s1 + $0x16] sm:$0xfc] %vm481_vm3, %v2752_v17 }
 0x175   :  { %v2764_v62 = vpop.permute.xlu1 %463  ;;  %v2766_v54 = vpop.permute.xlu0 %461 }
 0x176   :  { %492 = vst.msk [vmem:[%s3667_s1 + $0x26] sm:$0x3] %vm483_vm2, %v2764_v62 }
 0x177   :  { %491 = vst.msk [vmem:[%s3667_s1 + $0x1e] sm:$0xfc] %vm481_vm3, %v2766_v54 }
 0x179   :  { %v2778_v53 = vpop.permute.xlu1 %467  ;;  %v2780_v24 = vpop.permute.xlu0 %465 }
 0x17a   :  { %494 = vst.msk [vmem:[%s3667_s1 + $0x2e] sm:$0x3] %vm483_vm2, %v2778_v53 }
 0x17b   :  { %493 = vst.msk [vmem:[%s3667_s1 + $0x26] sm:$0xfc] %vm481_vm3, %v2780_v24  ;;  %s1846_s1 = smov 125  }
 0x17d   :  { %v2792_v15 = vpop.permute.xlu1 %552  ;;  %v2794_v7 = vpop.permute.xlu0 %550 }
 0x181   :  { %v2796_v46 = vpop.permute.xlu1 %556  ;;  %v2798_v42 = vpop.permute.xlu0 %554 }
 0x182   :  { %3817 = vst [vmem:[#allocation8_spill] sm:$0xff] %v2796_v46 }
 0x185   :  { %v2800_v14 = vpop.permute.xlu1 %560  ;;  %v2802_v23 = vpop.permute.xlu0 %558 }
 0x189   :  { %v2804_v36 = vpop.permute.xlu1 %564  ;;  %v2806_v63 = vpop.permute.xlu0 %562 }
 0x18d   :  { %v2808_v49 = vpop.permute.xlu1 %568  ;;  %v2810_v59 = vpop.permute.xlu0 %566 }
 0x18e   :  { %3818 = vst [vmem:[#allocation9_spill] sm:$0xff] %v2810_v59 }
 0x191   :  { %v2812_v55 = vpop.permute.xlu1 %572  ;;  %v2814_v20 = vpop.permute.xlu0 %570 }
 0x195   :  { %v691_v61 = vpop.permute.xlu1 %690  ;;  %v689_v48 = vpop.permute.xlu0 %688 }
 0x196   :  { %v725_v26 = vsub.f32 %v2327_v16, %v691_v61  ;;  %v724_v30 = vsub.f32 %v2330_v21, %v689_v48 }
 0x198   :  { %v2819_v32 = vadd.f32 %v725_v26, %v2792_v15  ;;  %v2822_v35 = vadd.f32 %v724_v30, %v2794_v7 }
 0x199   :  { %v695_v9 = vpop.permute.xlu1 %694  ;;  %v693_v0 = vpop.permute.xlu0 %692 }
 0x19a   :  { %3819 = vst [vmem:[#allocation33_spill] sm:$0xff] %v2819_v32  ;;  %3820 = vst [vmem:[#allocation34_spill] sm:$0xff] %v2822_v35  ;;  %v876_v56 = vrot.slane %v2819_v32, 7  ;;  %v875_v58 = vrot.slane %v2822_v35, 7  ;;  %v727_v10 = vsub.f32 %v2348_v33, %v695_v9  ;;  %v726_v39 = vsub.f32 %v2351_v28, %v693_v0 }
 0x19c   :  { %v2829_v61 = vadd.f32 %v727_v10, %v2796_v46  ;;  %v2832_v48 = vadd.f32 %v726_v39, %v2798_v42  ;;  %893 = vrot.lane.b32.xlu0 %v875_v58, %s1843_s0  ;;  %v877_v30 = vsel %vm35_vm0, %v875_v58, %v876_v56 }
 0x19d   :  { %v699_v26 = vpop.permute.xlu1 %698  ;;  %895 = vrot.lane.b32.xlu1 %v877_v30, %s1843_s0  ;;  %v697_v32 = vpop.permute.xlu0 %696 }
 0x19e   :  { %3821 = vst [vmem:[#allocation27_spill] sm:$0xff] %v2829_v61  ;;  %3822 = vst [vmem:[#allocation28_spill] sm:$0xff] %v2832_v48  ;;  %v879_v35 = vrot.slane %v2829_v61, 7  ;;  %v878_v9 = vrot.slane %v2832_v48, 7  ;;  %v729_v0 = vsub.f32 %v2367_v57, %v699_v26  ;;  %v728_v10 = vsub.f32 %v2370_v3, %v697_v32 }
 0x1a0   :  { %v2842_v46 = vadd.f32 %v729_v0, %v2800_v14  ;;  %v2845_v39 = vadd.f32 %v728_v10, %v2802_v23  ;;  %897 = vrot.lane.b32.xlu0 %v878_v9, %s1843_s0  ;;  %v880_v56 = vsel %vm35_vm0, %v878_v9, %v879_v35 }
 0x1a1   :  { %v703_v58 = vpop.permute.xlu1 %702  ;;  %899 = vrot.lane.b32.xlu1 %v880_v56, %s1843_s0  ;;  %v701_v30 = vpop.permute.xlu0 %700 }
 0x1a2   :  { %3823 = vst [vmem:[#allocation10_spill] sm:$0xff] %v2842_v46  ;;  %3824 = vst [vmem:[#allocation11_spill] sm:$0xff] %v2845_v39  ;;  %v882_v61 = vrot.slane %v2842_v46, 7  ;;  %v881_v26 = vrot.slane %v2845_v39, 7  ;;  %v731_v32 = vsub.f32 %v2384_v6, %v703_v58  ;;  %v730_v0 = vsub.f32 %v2387_v12, %v701_v30 }
 0x1a3   :  { %v748_v46 = vsub.f32 %v2330_v21, %v2710_v50 }
 0x1a4   :  { %v2855_v48 = vadd.f32 %v731_v32, %v2804_v36  ;;  %v2858_v10 = vadd.f32 %v730_v0, %v2806_v63  ;;  %901 = vrot.lane.b32.xlu0 %v881_v26, %s1843_s0  ;;  %v883_v35 = vsel %vm35_vm0, %v881_v26, %v882_v61  ;;  %v749_v0 = vsub.f32 %v2327_v16, %v2708_v8 }
 0x1a5   :  { %v707_v9 = vpop.permute.xlu1 %706  ;;  %903 = vrot.lane.b32.xlu1 %v883_v35, %s1843_s0  ;;  %v705_v56 = vpop.permute.xlu0 %704 }
 0x1a6   :  { %3825 = vst [vmem:[#allocation35_spill] sm:$0xff] %v2855_v48  ;;  %3826 = vst [vmem:[#allocation36_spill] sm:$0xff] %v2858_v10  ;;  %v885_v39 = vrot.slane %v2855_v48, 7  ;;  %v884_v58 = vrot.slane %v2858_v10, 7  ;;  %v733_v30 = vsub.f32 %v2405_v18, %v707_v9  ;;  %v732_v32 = vsub.f32 %v2408_v43, %v705_v56 }
 0x1a7   :  { %v792_v48 = vsub.f32 %v749_v0, %v2633_v34  ;;  %v753_v0 = vsub.f32 %v2367_v57, %v2736_v22 }
 0x1a8   :  { %v2872_v61 = vadd.f32 %v733_v30, %v2808_v49  ;;  %v2875_v26 = vadd.f32 %v732_v32, %v2810_v59  ;;  %905 = vrot.lane.b32.xlu0 %v884_v58, %s1843_s0  ;;  %v886_v35 = vsel %vm35_vm0, %v884_v58, %v885_v39  ;;  %v751_v32 = vsub.f32 %v2348_v33, %v2722_v27 }
 0x1a9   :  { %v711_v10 = vpop.permute.xlu1 %710  ;;  %907 = vrot.lane.b32.xlu1 %v886_v35, %s1843_s0  ;;  %v709_v9 = vpop.permute.xlu0 %708  ;;  %v791_v59 = vsub.f32 %v748_v46, %v2642_v19  ;;  %v750_v39 = vsub.f32 %v2351_v28, %v2724_v1 }
 0x1aa   :  { %3827 = vst [vmem:[#allocation12_spill] sm:$0xff] %v2875_v26  ;;  %v888_v56 = vrot.slane %v2872_v61, 7  ;;  %v887_v8 = vrot.slane %v2875_v26, 7  ;;  %v735_v50 = vsub.f32 %v2431_v4, %v711_v10  ;;  %v734_v30 = vsub.f32 %v2434_v31, %v709_v9 }
 0x1ac   :  { %v2891_v58 = vadd.f32 %v735_v50, %v2812_v55  ;;  %v2894_v35 = vadd.f32 %v734_v30, %v2814_v20  ;;  %909 = vrot.lane.b32.xlu0 %v887_v8, %s1843_s0  ;;  %v889_v10 = vsel %vm35_vm0, %v887_v8, %v888_v56  ;;  %v752_v50 = vsub.f32 %v2370_v3, %v2738_v13 }
 0x1ad   :  { %v806_v9 = vpop.permute.xlu1 %805  ;;  %911 = vrot.lane.b32.xlu1 %v889_v10, %s1843_s0  ;;  %v804_v27 = vpop.permute.xlu0 %803  ;;  %v794_v30 = vsub.f32 %v751_v32, %v2645_v44  ;;  %v793_v10 = vsub.f32 %v750_v39, %v2654_v25  ;;  %v796_v25 = vsub.f32 %v753_v0, %v2657_v52 }
 0x1ae   :  { %v891_v34 = vrot.slane %v2891_v58, 7  ;;  %v890_v46 = vrot.slane %v2894_v35, 7  ;;  %v840_v19 = vadd.f32 %v806_v9, %v792_v48  ;;  %v839_v1 = vadd.f32 %v804_v27, %v791_v59 }
 0x1af   :  { %v755_v9 = vsub.f32 %v2384_v6, %v2750_v40  ;;  %v754_v27 = vsub.f32 %v2387_v12, %v2752_v17  ;;  %v795_v39 = vsub.f32 %v752_v50, %v2666_v37  ;;  %v756_v37 = vsub.f32 %v2408_v43, %v2766_v54 }
 0x1b0   :  { %v2906_v26 = vmul.f32 0.25, %v840_v19  ;;  %v2908_v56 = vmul.f32 0.25, %v839_v1  ;;  %913 = vrot.lane.b32.xlu0 %v890_v46, %s1843_s0  ;;  %v892_v8 = vsel %vm35_vm0, %v890_v46, %v891_v34 }
 0x1b1   :  { %v810_v48 = vpop.permute.xlu1 %809  ;;  %915 = vrot.lane.b32.xlu1 %v892_v8, %s1843_s0  ;;  %v808_v59 = vpop.permute.xlu0 %807 }
 0x1b2   :  { %v942_v22 = vmul.f32 %v2906_v26, %v2906_v26  ;;  %v941_v44 = vmul.f32 %v2908_v56, %v2908_v56  ;;  %v842_v13 = vadd.f32 %v810_v48, %v794_v30  ;;  %v841_v32 = vadd.f32 %v808_v59, %v793_v10 }
 0x1b3   :  { %v757_v30 = vsub.f32 %v2405_v18, %v2764_v62  ;;  %v798_v48 = vsub.f32 %v755_v9, %v2669_v51  ;;  %v797_v62 = vsub.f32 %v754_v27, %v2678_v29  ;;  %v759_v27 = vsub.f32 %v2431_v4, %v2778_v53 }
 0x1b4   :  { %v966_v34 = vrot.slane %v942_v22, 6  ;;  %v965_v46 = vrot.slane %v941_v44, 6  ;;  %v2924_v19 = vmul.f32 0.25, %v842_v13  ;;  %v2926_v1 = vmul.f32 0.25, %v841_v32 }
 0x1b5   :  { %v814_v8 = vpop.permute.xlu1 %813  ;;  %v812_v10 = vpop.permute.xlu0 %811 }
 0x1b6   :  { %v944_v40 = vmul.f32 %v2924_v19, %v2924_v19  ;;  %v943_v17 = vmul.f32 %v2926_v1, %v2926_v1  ;;  %v844_v52 = vadd.f32 %v814_v8, %v796_v25  ;;  %v843_v0 = vadd.f32 %v812_v10, %v795_v39  ;;  %983 = vrot.lane.b32.xlu0 %v965_v46, %s1842_s24 }
 0x1b7   :  { %v967_v50 = vsel %vm495_vm10, %v965_v46, %v966_v34  ;;  %v800_v39 = vsub.f32 %v757_v30, %v2681_v11  ;;  %v758_v34 = vsub.f32 %v2434_v31, %v2780_v24  ;;  %v799_v11 = vsub.f32 %v756_v37, %v2690_v47 }
 0x1b8   :  { %v969_v59 = vrot.slane %v944_v40, 6  ;;  %v968_v22 = vrot.slane %v943_v17, 6  ;;  %v2940_v44 = vmul.f32 0.25, %v844_v52  ;;  %v2942_v13 = vmul.f32 0.25, %v843_v0  ;;  %985 = vrot.lane.b32.xlu1 %v967_v50, %s1842_s24 }
 0x1b9   :  { %v818_v32 = vpop.permute.xlu1 %817  ;;  %v816_v25 = vpop.permute.xlu0 %815  ;;  %v802_v37 = vsub.f32 %v759_v27, %v2693_v60 }
 0x1ba   :  { %v946_v54 = vmul.f32 %v2940_v44, %v2940_v44  ;;  %v945_v51 = vmul.f32 %v2942_v13, %v2942_v13  ;;  %v846_v9 = vadd.f32 %v818_v32, %v798_v48  ;;  %v845_v29 = vadd.f32 %v816_v25, %v797_v62  ;;  %987 = vrot.lane.b32.xlu0 %v968_v22, %s1842_s24 }
 0x1bb   :  { %v970_v46 = vsel %vm495_vm10, %v968_v22, %v969_v59  ;;  %v801_v48 = vsub.f32 %v758_v34, %v2702_v5 }
 0x1bc   :  { %v972_v30 = vrot.slane %v946_v54, 6  ;;  %v971_v8 = vrot.slane %v945_v51, 6  ;;  %v2957_v10 = vmul.f32 0.25, %v846_v9  ;;  %v2959_v40 = vmul.f32 0.25, %v845_v29  ;;  %989 = vrot.lane.b32.xlu1 %v970_v46, %s1842_s24 }
 0x1bd   :  { %v822_v17 = vpop.permute.xlu1 %821  ;;  %v820_v52 = vpop.permute.xlu0 %819 }
 0x1be   :  { %v948_v53 = vmul.f32 %v2957_v10, %v2957_v10  ;;  %v947_v24 = vmul.f32 %v2959_v40, %v2959_v40  ;;  %v848_v0 = vadd.f32 %v822_v17, %v800_v39  ;;  %v847_v50 = vadd.f32 %v820_v52, %v799_v11  ;;  %991 = vrot.lane.b32.xlu0 %v971_v8, %s1842_s24 }
 0x1bf   :  { %v973_v47 = vsel %vm495_vm10, %v971_v8, %v972_v30 }
 0x1c0   :  { %v975_v62 = vrot.slane %v948_v53, 6  ;;  %v974_v59 = vrot.slane %v947_v24, 6  ;;  %v2970_v22 = vmul.f32 0.25, %v848_v0  ;;  %v2972_v32 = vmul.f32 0.25, %v847_v50  ;;  %993 = vrot.lane.b32.xlu1 %v973_v47, %s1842_s24 }
 0x1c1   :  { %v826_v25 = vpop.permute.xlu1 %825  ;;  %v824_v54 = vpop.permute.xlu0 %823  ;;  %v1223_v53 = vrot.slane %v2553_v45, 1  ;;  %v1224_v24 = vrot.slane %v2544_v38, 1  ;;  %v587_v50 = vsub.f32 %v2327_v16, %v2792_v15  ;;  %v586_v47 = vsub.f32 %v2330_v21, %v2794_v7  ;;  %v3829_v15 = vld [vmem:[#allocation6_spill] sm:$0xff] }
 0x1c2   :  { %v950_v39 = vmul.f32 %v2970_v22, %v2970_v22  ;;  %v949_v51 = vmul.f32 %v2972_v32, %v2972_v32  ;;  %v850_v9 = vadd.f32 %v826_v25, %v802_v37  ;;  %v849_v60 = vadd.f32 %v824_v54, %v801_v48  ;;  %995 = vrot.lane.b32.xlu0 %v974_v59, %s1842_s24  ;;  %v3828_v25 = vld [vmem:[#allocation8_spill] sm:$0xff]  ;;  %v3830_v54 = vld [vmem:[#allocation3_spill] sm:$0xff] }
 0x1c3   :  { %v976_v5 = vsel %vm495_vm10, %v974_v59, %v975_v62  ;;  %v1225_v37 = vsel %vm270_vm1, %v1223_v53, %v1224_v24  ;;  %v1226_v48 = vrot.slane %v2561_v41, 1  ;;  %v1227_v45 = vrot.slane %v2555_v2, 1  ;;  %v3831_v53 = vld [vmem:[#allocation9_spill] sm:$0xff] }
 0x1c4   :  { %v978_v29 = vrot.slane %v950_v39, 6  ;;  %v977_v27 = vrot.slane %v949_v51, 6  ;;  %v2981_v34 = vmul.f32 0.25, %v850_v9  ;;  %v2983_v46 = vmul.f32 0.25, %v849_v60  ;;  %997 = vrot.lane.b32.xlu1 %v976_v5, %s1842_s24 }
 0x1c5   :  { %v3006_v62 = vmul.f32 0.5, %v587_v50  ;;  %v3008_v59 = vmul.f32 0.5, %v586_v47  ;;  %v589_v16 = vsub.f32 %v2348_v33, %v3828_v25  ;;  %v588_v21 = vsub.f32 %v2351_v28, %v2798_v42 }
 0x1c6   :  { %v952_v11 = vmul.f32 %v2981_v34, %v2981_v34  ;;  %v951_v30 = vmul.f32 %v2983_v46, %v2983_v46  ;;  %999 = vrot.lane.b32.xlu0 %v977_v27, %s1842_s24  ;;  %v979_v8 = vsel %vm495_vm10, %v977_v27, %v978_v29  ;;  %v1228_v7 = vsel %vm270_vm1, %v1226_v48, %v1227_v45 }
 0x1c7   :  { %v1229_v41 = vrot.slane %v3829_v15, 1  ;;  %v1230_v39 = vrot.slane %v3830_v54, 1  ;;  %v591_v51 = vsub.f32 %v2367_v57, %v2800_v14  ;;  %v590_v9 = vsub.f32 %v2370_v3, %v2802_v23 }
 0x1c8   :  { %v981_v17 = vrot.slane %v952_v11, 6  ;;  %v980_v52 = vrot.slane %v951_v30, 6  ;;  %1001 = vrot.lane.b32.xlu1 %v979_v8, %s1842_s24  ;;  %v1302_v33 = vrot.slane %v3006_v62, 1  ;;  %v1301_v28 = vrot.slane %v3008_v59, 1 }
 0x1c9   :  { %v601_v42 = vmul.f32 0.5, %v589_v16  ;;  %v600_v60 = vmul.f32 0.5, %v588_v21  ;;  %v1231_v5 = vsel %vm270_vm1, %v1229_v41, %v1230_v39  ;;  %v603_v29 = vmul.f32 0.5, %v591_v51 }
 0x1ca   :  { %1003 = vrot.lane.b32.xlu0 %v980_v52, %s1842_s24  ;;  %v982_v0 = vsel %vm495_vm10, %v980_v52, %v981_v17  ;;  %v602_v27 = vmul.f32 0.5, %v590_v9  ;;  %v593_v57 = vsub.f32 %v2384_v6, %v2804_v36  ;;  %v592_v3 = vsub.f32 %v2387_v12, %v2806_v63 }
 0x1cb   :  { %v1305_v23 = vrot.slane %v601_v42, 1  ;;  %v1304_v14 = vrot.slane %v600_v60, 1  ;;  %v1303_v11 = vsel %vm270_vm1, %v1301_v28, %v1302_v33  ;;  %v1308_v30 = vrot.slane %v603_v29, 1 }
 0x1cc   :  { %1005 = vrot.lane.b32.xlu1 %v982_v0, %s1842_s24  ;;  %v1307_v8 = vrot.slane %v602_v27, 1  ;;  %v605_v17 = vmul.f32 0.5, %v593_v57  ;;  %v604_v52 = vmul.f32 0.5, %v592_v3  ;;  %v595_v36 = vsub.f32 %v2405_v18, %v2808_v49 }
 0x1cd   :  { %v594_v63 = vsub.f32 %v2408_v43, %v3831_v53  ;;  %v596_v49 = vsub.f32 %v2434_v31, %v2814_v20  ;;  %v1584_v9 = vrot.slane %v3006_v62, 7  ;;  %v1587_v28 = vrot.slane %v601_v42, 7  ;;  %v3833_v53 = vld [vmem:[#allocation7_spill] sm:$0xff] }
 0x1ce   :  { %1241 = vrot.lane.b32.xlu0 %v1225_v37, %s1842_s24  ;;  %v1311_v0 = vrot.slane %v605_v17, 1  ;;  %v1310_v50 = vrot.slane %v604_v52, 1  ;;  %v1309_v47 = vsel %vm270_vm1, %v1307_v8, %v1308_v30  ;;  %v607_v37 = vmul.f32 0.5, %v595_v36 }
 0x1cf   :  { %v606_v48 = vmul.f32 0.5, %v594_v63  ;;  %v608_v15 = vmul.f32 0.5, %v596_v49  ;;  %v1590_v3 = vrot.slane %v603_v29, 7  ;;  %v1593_v62 = vrot.slane %v605_v17, 7 }
 0x1d0   :  { %1243 = vrot.lane.b32.xlu1 %v1224_v24, %s1842_s24  ;;  %v1306_v24 = vsel %vm270_vm1, %v1304_v14, %v1305_v23  ;;  %v1312_v25 = vsel %vm270_vm1, %v1310_v50, %v1311_v0  ;;  %v1314_v16 = vrot.slane %v607_v37, 1  ;;  %v1596_v42 = vrot.slane %v607_v37, 7 }
 0x1d1   :  { %v1313_v21 = vrot.slane %v606_v48, 1  ;;  %v1316_v51 = vrot.slane %v608_v15, 1  ;;  %v1233_v63 = vrot.slane %v3833_v53, 1 }
 0x1d2   :  { %1245 = vrot.lane.b32.xlu0 %v1228_v7, %s1842_s24 }
 0x1d4   :  { %1247 = vrot.lane.b32.xlu1 %v1227_v45, %s1842_s24  ;;  %v597_v45 = vsub.f32 %v2431_v4, %v2812_v55  ;;  %v1315_v55 = vsel %vm270_vm1, %v1313_v21, %v1314_v16 }
 0x1d6   :  { %1249 = vrot.lane.b32.xlu0 %v1231_v5, %s1842_s24  ;;  %v609_v7 = vmul.f32 0.5, %v597_v45  ;;  %v1586_v5 = vrot.slane %v600_v60, 7  ;;  %v1595_v60 = vrot.slane %v606_v48, 7 }
 0x1d8   :  { %1319 = vrot.lane.b32.xlu1 %v1303_v11, %s1844_s10  ;;  %v1317_v41 = vrot.slane %v609_v7, 1  ;;  %v1588_v14 = vsel %vm35_vm0, %v1586_v5, %v1587_v28  ;;  %v1599_v29 = vrot.slane %v609_v7, 7  ;;  %v1597_v8 = vsel %vm35_vm0, %v1595_v60, %v1596_v42  ;;  %v3836_v28 = vld [vmem:[#allocation29_spill] sm:$0xff] }
 0x1da   :  { %1321 = vrot.lane.b32.xlu0 %v1302_v33, %s1844_s10  ;;  %v1318_v20 = vsel %vm270_vm1, %v1316_v51, %v1317_v41  ;;  %v1583_v33 = vrot.slane %v3008_v59, 7  ;;  %v1592_v59 = vrot.slane %v604_v52, 7  ;;  %v3832_v52 = vld [vmem:[#allocation20_spill] sm:$0xff] }
 0x1db   :  { %v1232_v36 = vrot.slane %v3832_v52, 1  ;;  %v3103_v52 = vrot.slane %v2408_v43, 6 }
 0x1dc   :  { %1323 = vrot.lane.b32.xlu1 %v1306_v24, %s1844_s10  ;;  %v1585_v57 = vsel %vm35_vm0, %v1583_v33, %v1584_v9 }
 0x1dd   :  { %v1234_v24 = vsel %vm270_vm1, %v1232_v36, %v1233_v63  ;;  %v3842_v36 = vld [vmem:[#allocation5_spill] sm:$0xff] }
 0x1de   :  { %1325 = vrot.lane.b32.xlu0 %v1305_v23, %s1844_s10  ;;  %v1589_v23 = vrot.slane %v602_v27, 7  ;;  %v1598_v27 = vrot.slane %v608_v15, 7 }
 0x1e0   :  { %1327 = vrot.lane.b32.xlu1 %v1309_v47, %s1844_s10  ;;  %v1591_v11 = vsel %vm35_vm0, %v1589_v23, %v1590_v3  ;;  %v1600_v17 = vsel %vm35_vm0, %v1598_v27, %v1599_v29 }
 0x1e2   :  { %1329 = vrot.lane.b32.xlu0 %v1308_v30, %s1844_s10  ;;  %v1594_v30 = vsel %vm35_vm0, %v1592_v59, %v1593_v62  ;;  %v3838_v62 = vld [vmem:[#allocation21_spill] sm:$0xff] }
 0x1e4   :  { %1331 = vrot.lane.b32.xlu1 %v1312_v25, %s1844_s10 }
 0x1e6   :  { %1333 = vrot.lane.b32.xlu0 %v1311_v0, %s1844_s10 }
 0x1e8   :  { %1335 = vrot.lane.b32.xlu1 %v1315_v55, %s1844_s10  ;;  %v3835_v55 = vld [vmem:[#allocation17_spill] sm:$0xff] }
 0x1ea   :  { %1337 = vrot.lane.b32.xlu0 %v1314_v16, %s1844_s10 }
 0x1ec   :  { %1339 = vrot.lane.b32.xlu1 %v1318_v20, %s1844_s10 }
 0x1ee   :  { %1341 = vrot.lane.b32.xlu0 %v1317_v41, %s1844_s10 }
 0x1f0   :  { %1601 = vrot.lane.b32.xlu1 %v1583_v33, %s1843_s0 }
 0x1f2   :  { %1603 = vrot.lane.b32.xlu0 %v1585_v57, %s1843_s0 }
 0x1f4   :  { %1605 = vrot.lane.b32.xlu1 %v1586_v5, %s1843_s0 }
 0x1f6   :  { %1607 = vrot.lane.b32.xlu0 %v1588_v14, %s1843_s0 }
 0x1f8   :  { %1609 = vrot.lane.b32.xlu1 %v1589_v23, %s1843_s0  ;;  %v3837_v23 = vld [vmem:[#allocation30_spill] sm:$0xff] }
 0x1fa   :  { %1611 = vrot.lane.b32.xlu0 %v1591_v11, %s1843_s0 }
 0x1fc   :  { %1613 = vrot.lane.b32.xlu1 %v1592_v59, %s1843_s0  ;;  %v3839_v59 = vrot.slane %v3838_v62, 7 }
 0x1fe   :  { %1615 = vrot.lane.b32.xlu0 %v1594_v30, %s1843_s0  ;;  %v670_v11 = vsub.f32 %v2387_v12, %v3839_v59  ;;  %v3848_v59 = vld [vmem:[#allocation16_spill] sm:$0xff] }
 0x200   :  { %1617 = vrot.lane.b32.xlu1 %v1595_v60, %s1843_s0  ;;  %v3840_v60 = vld [vmem:[#allocation19_spill] sm:$0xff] }
 0x201   :  { %v671_v30 = vsub.f32 %v2384_v6, %v3840_v60 }
 0x202   :  { %1619 = vrot.lane.b32.xlu0 %v1597_v8, %s1843_s0 }
 0x204   :  { %1621 = vrot.lane.b32.xlu1 %v1598_v27, %s1843_s0  ;;  %v3841_v27 = vld [vmem:[#allocation23_spill] sm:$0xff] }
 0x206   :  { %1623 = vrot.lane.b32.xlu0 %v1600_v17, %s1843_s0 }
 0x208   :  { %1251 = vrot.lane.b32.xlu1 %v1230_v39, %s1842_s24  ;;  %v3834_v39 = vld [vmem:[#allocation22_spill] sm:$0xff] }
 0x20a   :  { %1253 = vrot.lane.b32.xlu0 %v1234_v24, %s1842_s24 }
 0x20c   :  { %1255 = vrot.lane.b32.xlu1 %v1233_v63, %s1842_s24  ;;  %v3843_v63 = vrot.slane %v3842_v36, 7 }
 0x20e   :  { %v894_v0 = vpop.permute.xlu0 %893  ;;  %v672_v24 = vsub.f32 %v2408_v43, %v3843_v63 }
 0x20f   :  { %v896_v50 = vpop.permute.xlu1 %895  ;;  %v929_v41 = vmul.f32 %v894_v0, %v3834_v39  ;;  %v509_v0 = vrot.slane %v2405_v18, 6 }
 0x210   :  { %v930_v20 = vmul.f32 %v896_v50, %v3835_v55  ;;  %v3844_v50 = vld [vmem:[#allocation24_spill] sm:$0xff] }
 0x211   :  { %v3128_v62 = vsel %vm495_vm10, %v3103_v52, %v509_v0 }
 0x212   :  { %v898_v47 = vpop.permute.xlu0 %897 }
 0x213   :  { %v900_v37 = vpop.permute.xlu1 %899  ;;  %v931_v5 = vmul.f32 %v898_v47, %v3836_v28 }
 0x214   :  { %v932_v14 = vmul.f32 %v900_v37, %v3837_v23  ;;  %v3845_v37 = vld [vmem:[#allocation4_spill] sm:$0xff] }
 0x216   :  { %v902_v48 = vpop.permute.xlu0 %901 }
 0x217   :  { %v904_v45 = vpop.permute.xlu1 %903  ;;  %v933_v8 = vmul.f32 %v902_v48, %v3841_v27  ;;  %v3846_v48 = vld [vmem:[#allocation18_spill] sm:$0xff] }
 0x218   :  { %v934_v47 = vmul.f32 %v904_v45, %v3844_v50 }
 0x21a   :  { %v906_v49 = vpop.permute.xlu0 %905 }
 0x21b   :  { %v908_v25 = vpop.permute.xlu1 %907 }
 0x21e   :  { %v910_v16 = vpop.permute.xlu0 %909 }
 0x21f   :  { %v912_v21 = vpop.permute.xlu1 %911 }
 0x222   :  { %v3088_v7 = vpop.permute.xlu0 %913 }
 0x223   :  { %v3090_v15 = vpop.permute.xlu1 %915 }
 0x228   :  { %v984_v51 = vpop.permute.xlu0 %983 }
 0x229   :  { %v1019_v9 = vsub.f32 %v929_v41, %v984_v51  ;;  %v3111_v41 = vadd.f32 %v670_v11, %v3845_v37  ;;  %v3114_v51 = vadd.f32 %v671_v30, %v3846_v48  ;;  %v3849_v11 = vrot.slane %v3848_v59, 7 }
 0x22a   :  { %v986_v33 = vpop.permute.xlu1 %985 }
 0x22b   :  { %1818 = vrcp.f32 %v1019_v9  ;;  %v1020_v57 = vsub.f32 %v930_v20, %v986_v33  ;;  %v3117_v20 = vrot.slane %v2434_v31, 6  ;;  %v512_v9 = vrot.slane %v2431_v4, 6 }
 0x22c   :  { %v988_v3 = vpop.permute.xlu0 %987 }
 0x22d   :  { %1820 = vrcp.f32 %v1020_v57  ;;  %v1021_v42 = vsub.f32 %v931_v5, %v988_v3  ;;  %v935_v5 = vmul.f32 %v906_v49, %v3111_v41  ;;  %v3847_v57 = vld [vmem:[#allocation37_spill] sm:$0xff]  ;;  %v936_v49 = vmul.f32 %v908_v25, %v3114_v51 }
 0x22e   :  { %v990_v29 = vpop.permute.xlu1 %989  ;;  %v673_v3 = vsub.f32 %v2405_v18, %v3847_v57  ;;  %v3138_v36 = vsel %vm495_vm10, %v3117_v20, %v512_v9 }
 0x22f   :  { %1822 = vrcp.f32 %v1021_v42  ;;  %v1022_v17 = vsub.f32 %v932_v14, %v990_v29  ;;  %v3124_v14 = vadd.f32 %v672_v24, %v3103_v52  ;;  %v674_v42 = vsub.f32 %v2434_v31, %v3849_v11  ;;  %v3850_v29 = vld [vmem:[#allocation2_spill] sm:$0xff] }
 0x230   :  { %v992_v12 = vpop.permute.xlu0 %991  ;;  %v3147_v25 = vadd.f32 %v673_v3, %v3128_v62 }
 0x231   :  { %1824 = vrcp.f32 %v1022_v17  ;;  %v1023_v6 = vsub.f32 %v933_v8, %v992_v12  ;;  %v675_v8 = vsub.f32 %v2431_v4, %v3850_v29  ;;  %v937_v37 = vmul.f32 %v910_v16, %v3124_v14 }
 0x232   :  { %v994_v33 = vpop.permute.xlu1 %993  ;;  %v3150_v48 = vadd.f32 %v674_v42, %v3117_v20  ;;  %v938_v16 = vmul.f32 %v912_v21, %v3147_v25 }
 0x233   :  { %1826 = vrcp.f32 %v1023_v6  ;;  %v1024_v45 = vsub.f32 %v934_v47, %v994_v33  ;;  %v3160_v3 = vadd.f32 %v675_v8, %v3138_v36 }
 0x234   :  { %v996_v60 = vpop.permute.xlu0 %995  ;;  %v939_v21 = vmul.f32 %v3088_v7, %v3150_v48 }
 0x235   :  { %v1819_v30 = vpop.eup %1818  ;;  %1828 = vrcp.f32 %v1024_v45  ;;  %v1025_v17 = vsub.f32 %v935_v5, %v996_v60  ;;  %v940_v7 = vmul.f32 %v3090_v15, %v3160_v3 }
 0x236   :  { %v998_v63 = vpop.permute.xlu1 %997  ;;  %v1055_v24 = vrot.slane %v1819_v30, 1  ;;  %v1133_v0 = vrot.slane %v1819_v30, 2  ;;  %v3141_v12 = vmul.f32 %v1819_v30, %v3834_v39 }
 0x237   :  { %v3143_v47 = vpop.eup %1820  ;;  %1830 = vrcp.f32 %v1025_v17  ;;  %v1026_v6 = vsub.f32 %v936_v49, %v998_v63 }
 0x238   :  { %v1000_v9 = vpop.permute.xlu0 %999  ;;  %v1056_v33 = vrot.slane %v3143_v47, 1  ;;  %v3722_v5 = vrot.slane %v3143_v47, 2  ;;  %v3156_v39 = vmul.f32 %v3143_v47, %v3835_v55 }
 0x239   :  { %v1823_v57 = vpop.eup %1822  ;;  %1832 = vrcp.f32 %v1026_v6  ;;  %v1027_v45 = vsub.f32 %v937_v37, %v1000_v9 }
 0x23a   :  { %v1002_v59 = vpop.permute.xlu1 %1001  ;;  %1075 = vrot.lane.b32.xlu1 %v1056_v33, %s1842_s24  ;;  %v1057_v11 = vsel %vm270_vm1, %v1055_v24, %v1056_v33  ;;  %v1058_v42 = vrot.slane %v1823_v57, 1  ;;  %v3167_v60 = vsel %vm760_vm15, %v1133_v0, %v3722_v5  ;;  %v1136_v55 = vrot.slane %v1823_v57, 2 }
 0x23b   :  { %v3169_v30 = vpop.eup %1824  ;;  %1834 = vrcp.f32 %v1027_v45  ;;  %v1028_v49 = vsub.f32 %v938_v16, %v1002_v59  ;;  %1073 = vrot.lane.b32.xlu0 %v1057_v11, %s1842_s24  ;;  %v3175_v29 = vmul.f32 %v1823_v57, %v3836_v28 }
 0x23c   :  { %v1004_v8 = vpop.permute.xlu0 %1003  ;;  %v1059_v17 = vrot.slane %v3169_v30, 1  ;;  %v3721_v63 = vrot.slane %v3169_v30, 2  ;;  %v3181_v24 = vmul.f32 %v3169_v30, %v3837_v23 }
 0x23d   :  { %v1827_v0 = vpop.eup %1826  ;;  %1836 = vrcp.f32 %v1028_v49  ;;  %v1029_v37 = vsub.f32 %v939_v21, %v1004_v8 }
 0x23e   :  { %1079 = vrot.lane.b32.xlu1 %v1059_v17, %s1842_s24  ;;  %v1006_v6 = vpop.permute.xlu1 %1005  ;;  %v1060_v28 = vsel %vm270_vm1, %v1058_v42, %v1059_v17  ;;  %v1061_v9 = vrot.slane %v1827_v0, 1  ;;  %v3190_v33 = vsel %vm760_vm15, %v1136_v55, %v3721_v63  ;;  %v1139_v57 = vrot.slane %v1827_v0, 2 }
 0x23f   :  { %v3192_v23 = vpop.eup %1828  ;;  %1838 = vrcp.f32 %v1029_v37  ;;  %v1030_v16 = vsub.f32 %v940_v7, %v1006_v6  ;;  %1077 = vrot.lane.b32.xlu0 %v1060_v28, %s1842_s24  ;;  %v3196_v15 = vmul.f32 %v1827_v0, %v3841_v27 }
 0x240   :  { %v3198_v45 = vpop.permute.xlu0 %1241  ;;  %v1062_v59 = vrot.slane %v3192_v23, 1  ;;  %v1140_v11 = vrot.slane %v3192_v23, 2  ;;  %v3204_v42 = vmul.f32 %v3192_v23, %v3844_v50 }
 0x241   :  { %v1831_v55 = vpop.eup %1830  ;;  %1840 = vrcp.f32 %v1030_v16 }
 0x242   :  { %1083 = vrot.lane.b32.xlu1 %v1062_v59, %s1842_s24  ;;  %v3207_v21 = vpop.permute.xlu1 %1243  ;;  %v1063_v49 = vsel %vm270_vm1, %v1061_v9, %v1062_v59  ;;  %v1064_v27 = vrot.slane %v1831_v55, 1  ;;  %v1141_v8 = vsel %vm760_vm15, %v1139_v57, %v1140_v11  ;;  %v1142_v17 = vrot.slane %v1831_v55, 2 }
 0x243   :  { %3851 = vst [vmem:[#allocation13_spill] sm:$0xff] %v3207_v21  ;;  %v1833_v0 = vpop.eup %1832  ;;  %1081 = vrot.lane.b32.xlu0 %v1063_v49, %s1842_s24  ;;  %v3213_v7 = vmul.f32 %v1831_v55, %v3111_v41 }
 0x244   :  { %v3215_v50 = vpop.permute.xlu0 %1245  ;;  %v1065_v37 = vrot.slane %v1833_v0, 1  ;;  %v1143_v6 = vrot.slane %v1833_v0, 2  ;;  %v3218_v28 = vmul.f32 %v1833_v0, %v3114_v51 }
 0x245   :  { %3852 = vst [vmem:[#allocation14_spill] sm:$0xff] %v3215_v50  ;;  %v1835_v23 = vpop.eup %1834 }
 0x246   :  { %1087 = vrot.lane.b32.xlu1 %v1065_v37, %s1842_s24  ;;  %v3221_v9 = vpop.permute.xlu1 %1247  ;;  %v1066_v57 = vsel %vm270_vm1, %v1064_v27, %v1065_v37  ;;  %v1067_v16 = vrot.slane %v1835_v23, 1  ;;  %v1144_v59 = vsel %vm760_vm15, %v1142_v17, %v1143_v6  ;;  %v1145_v49 = vrot.slane %v1835_v23, 2 }
 0x247   :  { %3853 = vst [vmem:[#allocation15_spill] sm:$0xff] %v3221_v9  ;;  %v1837_v41 = vpop.eup %1836  ;;  %1085 = vrot.lane.b32.xlu0 %v1066_v57, %s1842_s24  ;;  %v3227_v55 = vmul.f32 %v1835_v23, %v3124_v14 }
 0x248   :  { %v3229_v63 = vpop.permute.xlu0 %1249  ;;  %v1068_v51 = vrot.slane %v1837_v41, 1  ;;  %v1146_v0 = vrot.slane %v1837_v41, 2  ;;  %v3232_v5 = vmul.f32 %v1837_v41, %v3147_v25 }
 0x249   :  { %3854 = vst [vmem:[#allocation8_spill] sm:$0xff] %v3229_v63  ;;  %v1839_v9 = vpop.eup %1838 }
 0x24a   :  { %1091 = vrot.lane.b32.xlu1 %v1068_v51, %s1842_s24  ;;  %v3235_v27 = vpop.permute.xlu1 %1319  ;;  %v1069_v17 = vsel %vm270_vm1, %v1067_v16, %v1068_v51  ;;  %v1070_v37 = vrot.slane %v1839_v9, 1  ;;  %v1147_v57 = vsel %vm760_vm15, %v1145_v49, %v1146_v0  ;;  %v1148_v50 = vrot.slane %v1839_v9, 2 }
 0x24b   :  { %v1841_v14 = vpop.eup %1840  ;;  %1089 = vrot.lane.b32.xlu0 %v1069_v17, %s1842_s24  ;;  %v3241_v23 = vmul.f32 %v1839_v9, %v3150_v48  ;;  %v3855_v48 = vrot.slane %v3143_v47, 2 }
 0x24c   :  { %v3243_v63 = vpop.permute.xlu0 %1321  ;;  %v1071_v25 = vrot.slane %v1841_v14, 1  ;;  %v1149_v41 = vrot.slane %v1841_v14, 2  ;;  %v3246_v21 = vmul.f32 %v1841_v14, %v3160_v3 }
 0x24e   :  { %1095 = vrot.lane.b32.xlu1 %v1071_v25, %s1842_s24  ;;  %v3249_v16 = vpop.permute.xlu1 %1323  ;;  %v1072_v49 = vsel %vm270_vm1, %v1070_v37, %v1071_v25  ;;  %v1150_v51 = vsel %vm760_vm15, %v1148_v50, %v1149_v41  ;;  %v3856_v37 = vrot.slane %v3169_v30, 2  ;;  %v535_v25 = vsub.f32 %v2405_v18, %v3128_v62 }
 0x24f   :  { %1093 = vrot.lane.b32.xlu0 %v1072_v49, %s1842_s24  ;;  %v536_v62 = vsub.f32 %v2434_v31, %v3117_v20 }
 0x250   :  { %v3254_v17 = vpop.permute.xlu0 %1325 }
 0x252   :  { %1153 = vrot.lane.b32.xlu1 %v3855_v48, %s1843_s0  ;;  %v3259_v9 = vpop.permute.xlu1 %1327 }
 0x253   :  { %1151 = vrot.lane.b32.xlu0 %v3167_v60, %s1843_s0 }
 0x254   :  { %v3263_v3 = vpop.permute.xlu0 %1329 }
 0x256   :  { %1157 = vrot.lane.b32.xlu1 %v3856_v37, %s1843_s0  ;;  %v3268_v50 = vpop.permute.xlu1 %1331  ;;  %v3309_v37 = vmul.f32 0.5, %v536_v62 }
 0x257   :  { %1155 = vrot.lane.b32.xlu0 %v3190_v33, %s1843_s0  ;;  %v534_v33 = vsub.f32 %v2408_v43, %v3103_v52 }
 0x258   :  { %v3272_v14 = vpop.permute.xlu0 %1333 }
 0x259   :  { %v3295_v18 = vmul.f32 0.5, %v534_v33 }
 0x25a   :  { %1161 = vrot.lane.b32.xlu1 %v1140_v11, %s1843_s0  ;;  %v3275_v47 = vpop.permute.xlu1 %1335  ;;  %v3290_v11 = vmul.f32 0.5, %v535_v25 }
 0x25b   :  { %1159 = vrot.lane.b32.xlu0 %v1141_v8, %s1843_s0  ;;  %v537_v8 = vsub.f32 %v2431_v4, %v3138_v36 }
 0x25c   :  { %v3278_v60 = vpop.permute.xlu0 %1337  ;;  %v1236_v36 = vrot.slane %v3290_v11, 1 }
 0x25e   :  { %1165 = vrot.lane.b32.xlu1 %v1143_v6, %s1843_s0  ;;  %v3283_v30 = vpop.permute.xlu1 %1339 }
 0x25f   :  { %1163 = vrot.lane.b32.xlu0 %v1144_v59, %s1843_s0  ;;  %v3304_v59 = vmul.f32 0.5, %v537_v8 }
 0x260   :  { %v3288_v49 = vpop.permute.xlu0 %1341 }
 0x261   :  { %v1239_v8 = vrot.slane %v3304_v59, 1 }
 0x262   :  { %1169 = vrot.lane.b32.xlu1 %v1146_v0, %s1843_s0  ;;  %v1602_v48 = vpop.permute.xlu1 %1601  ;;  %v1235_v0 = vrot.slane %v3295_v18, 1 }
 0x263   :  { %v1637_v6 = vmul.f32 %v1602_v48, %v3141_v12  ;;  %1167 = vrot.lane.b32.xlu0 %v1147_v57, %s1843_s0  ;;  %v1238_v48 = vrot.slane %v3309_v37, 1 }
 0x264   :  { %v1604_v43 = vpop.permute.xlu0 %1603  ;;  %v1237_v33 = vsel %vm270_vm1, %v1235_v0, %v1236_v36 }
 0x265   :  { %v3302_v52 = vmul.f32 %v1604_v43, %v3156_v39  ;;  %v1661_v31 = vrot.slane %v1637_v6, 2 }
 0x266   :  { %1173 = vrot.lane.b32.xlu1 %v1149_v41, %s1843_s0  ;;  %v1606_v4 = vpop.permute.xlu1 %1605 }
 0x267   :  { %v1662_v20 = vrot.slane %v3302_v52, 2  ;;  %v1639_v12 = vmul.f32 %v1606_v4, %v3175_v29  ;;  %1171 = vrot.lane.b32.xlu0 %v1150_v51, %s1843_s0 }
 0x268   :  { %v1608_v39 = vpop.permute.xlu0 %1607 }
 0x269   :  { %v1640_v57 = vmul.f32 %v1608_v39, %v3181_v24  ;;  %v1663_v41 = vsel %vm760_vm15, %v1661_v31, %v1662_v20  ;;  %v1664_v62 = vrot.slane %v1639_v12, 2 }
 0x26a   :  { %1259 = vrot.lane.b32.xlu1 %v1236_v36, %s1842_s24  ;;  %v1610_v25 = vpop.permute.xlu1 %1609  ;;  %v1240_v36 = vsel %vm270_vm1, %v1238_v48, %v1239_v8  ;;  %v3858_v48 = vld [vmem:[#allocation31_spill] sm:$0xff]  ;;  %vm1787_vm1 = vcmask 64513  }
 0x26b   :  { %v1665_v29 = vrot.slane %v1640_v57, 2  ;;  %v1641_v51 = vmul.f32 %v1610_v25, %v3196_v15  ;;  %1257 = vrot.lane.b32.xlu0 %v1237_v33, %s1842_s24 }
 0x26c   :  { %v1612_v24 = vpop.permute.xlu0 %1611 }
 0x26d   :  { %v1642_v6 = vmul.f32 %v1612_v24, %v3204_v42  ;;  %v1666_v43 = vsel %vm760_vm15, %v1664_v62, %v1665_v29  ;;  %v1667_v0 = vrot.slane %v1641_v51, 2  ;;  %v3857_v42 = vrot.slane %v2544_v38, 2 }
 0x26e   :  { %1263 = vrot.lane.b32.xlu1 %v1239_v8, %s1842_s24  ;;  %v1614_v4 = vpop.permute.xlu1 %1613 }
 0x26f   :  { %v1668_v31 = vrot.slane %v1642_v6, 2  ;;  %v1643_v39 = vmul.f32 %v1614_v4, %v3213_v7  ;;  %1261 = vrot.lane.b32.xlu0 %v1240_v36, %s1842_s24 }
 0x270   :  { %v1616_v12 = vpop.permute.xlu0 %1615 }
 0x271   :  { %v1644_v15 = vmul.f32 %v1616_v12, %v3218_v28  ;;  %v1669_v57 = vsel %vm760_vm15, %v1667_v0, %v1668_v31  ;;  %v1670_v33 = vrot.slane %v1643_v39, 2  ;;  %v3859_v28 = vrot.slane %v2555_v2, 2  ;;  %v3860_v0 = vld [vmem:[#allocation32_spill] sm:$0xff] }
 0x272   :  { %1537 = vrot.lane.b32.xlu1 %v3857_v42, %s1843_s0  ;;  %v1618_v25 = vpop.permute.xlu1 %1617  ;;  %v3861_v12 = vrot.slane %v3830_v54, 2  ;;  %v3862_v42 = vld [vmem:[#allocation25_spill] sm:$0xff]  ;;  %v1529_v54 = vrot.slane %v3295_v18, 2 }
 0x273   :  { %v1671_v62 = vrot.slane %v1644_v15, 2  ;;  %v1645_v8 = vmul.f32 %v1618_v25, %v3227_v55  ;;  %1535 = vrot.lane.b32.xlu0 %v3858_v48, %s1843_s0  ;;  %v1530_v25 = vrot.slane %v3290_v11, 2  ;;  %v1533_v48 = vrot.slane %v3304_v59, 2 }
 0x274   :  { %v1620_v7 = vpop.permute.xlu0 %1619 }
 0x275   :  { %v1646_v51 = vmul.f32 %v1620_v7, %v3232_v5  ;;  %v1672_v24 = vsel %vm760_vm15, %v1670_v33, %v1671_v62  ;;  %v1673_v38 = vrot.slane %v1645_v8, 2  ;;  %v3864_v33 = vld [vmem:[#allocation26_spill] sm:$0xff]  ;;  %v1531_v8 = vsel %vm760_vm15, %v1529_v54, %v1530_v25 }
 0x276   :  { %1541 = vrot.lane.b32.xlu1 %v3859_v28, %s1843_s0  ;;  %v1622_v6 = vpop.permute.xlu1 %1621  ;;  %v1532_v7 = vrot.slane %v3309_v37, 2 }
 0x277   :  { %v1674_v4 = vrot.slane %v1646_v51, 2  ;;  %v1647_v36 = vmul.f32 %v1622_v6, %v3241_v23  ;;  %1539 = vrot.lane.b32.xlu0 %v3860_v0, %s1843_s0 }
 0x278   :  { %v1624_v55 = vpop.permute.xlu0 %1623 }
 0x279   :  { %v3347_v39 = vmul.f32 %v1624_v55, %v3246_v21  ;;  %v1675_v5 = vsel %vm760_vm15, %v1673_v38, %v1674_v4  ;;  %v1676_v2 = vrot.slane %v1647_v36, 2  ;;  %v3863_v21 = vrot.slane %v3833_v53, 2  ;;  %v3867_v38 = vld [vmem:[#allocation36_spill] sm:$0xff] }
 0x27a   :  { %1545 = vrot.lane.b32.xlu1 %v3861_v12, %s1843_s0  ;;  %v1534_v53 = vsel %vm760_vm15, %v1532_v7, %v1533_v48  ;;  %v1252_v11 = vpop.permute.xlu1 %1251  ;;  %v1124_v7 = vsub.f32 0.0, %v2924_v19 }
 0x27b   :  { %v1677_v15 = vrot.slane %v3347_v39, 2  ;;  %1543 = vrot.lane.b32.xlu0 %v3862_v42, %s1843_s0  ;;  %v1122_v42 = vsub.f32 0.0, %v2906_v26 }
 0x27c   :  { %v1254_v52 = vpop.permute.xlu0 %1253 }
 0x27d   :  { %v3359_v23 = vsel %vm760_vm15, %v1676_v2, %v1677_v15 }
 0x27e   :  { %1549 = vrot.lane.b32.xlu1 %v3863_v21, %s1843_s0  ;;  %v1256_v18 = vpop.permute.xlu1 %1255 }
 0x27f   :  { %1547 = vrot.lane.b32.xlu0 %v3864_v33, %s1843_s0 }
 0x282   :  { %1553 = vrot.lane.b32.xlu1 %v1530_v25, %s1843_s0  ;;  %v1121_v25 = vsub.f32 0.0, %v2908_v56 }
 0x283   :  { %1551 = vrot.lane.b32.xlu0 %v1531_v8, %s1843_s0 }
 0x286   :  { %1557 = vrot.lane.b32.xlu1 %v1533_v48, %s1843_s0 }
 0x287   :  { %1555 = vrot.lane.b32.xlu0 %v1534_v53, %s1843_s0 }
 0x28a   :  { %1681 = vrot.lane.b32.xlu1 %v1662_v20, %s1843_s0 }
 0x28b   :  { %1679 = vrot.lane.b32.xlu0 %v1663_v41, %s1843_s0 }
 0x28e   :  { %1685 = vrot.lane.b32.xlu1 %v1665_v29, %s1843_s0 }
 0x28f   :  { %1683 = vrot.lane.b32.xlu0 %v1666_v43, %s1843_s0  ;;  %v3865_v43 = vld [vmem:[#allocation10_spill] sm:$0xff] }
 0x292   :  { %1689 = vrot.lane.b32.xlu1 %v1668_v31, %s1843_s0 }
 0x293   :  { %1687 = vrot.lane.b32.xlu0 %v1669_v57, %s1843_s0 }
 0x296   :  { %1693 = vrot.lane.b32.xlu1 %v1671_v62, %s1843_s0 }
 0x297   :  { %1691 = vrot.lane.b32.xlu0 %v1672_v24, %s1843_s0  ;;  %v3866_v24 = vld [vmem:[#allocation35_spill] sm:$0xff] }
 0x29a   :  { %1697 = vrot.lane.b32.xlu1 %v1674_v4, %s1843_s0 }
 0x29b   :  { %1695 = vrot.lane.b32.xlu0 %v1675_v5, %s1843_s0 }
 0x2ac   :  { %v3388_v59 = vpop.permute.xlu1 %1075 }
 0x2ad   :  { %v3390_v37 = vpop.permute.xlu0 %1073 }
 0x2b0   :  { %v3392_v20 = vpop.permute.xlu1 %1079 }
 0x2b1   :  { %v3394_v41 = vpop.permute.xlu0 %1077 }
 0x2b4   :  { %v1084_v29 = vpop.permute.xlu1 %1083 }
 0x2b5   :  { %v1114_v31 = vmul.f32 %v1084_v29, %v3865_v43  ;;  %v3397_v57 = vpop.permute.xlu0 %1081 }
 0x2b7   :  { %v3399_v62 = vmul.f32 %v1252_v11, %v1114_v31 }
 0x2b8   :  { %v1088_v51 = vpop.permute.xlu1 %1087 }
 0x2b9   :  { %v1116_v28 = vmul.f32 %v1088_v51, %v3866_v24  ;;  %v1086_v6 = vpop.permute.xlu0 %1085 }
 0x2ba   :  { %v1115_v4 = vmul.f32 %v1086_v6, %v3867_v38 }
 0x2bb   :  { %v3403_v36 = vmul.f32 %v1256_v18, %v1116_v28  ;;  %v1123_v18 = vsub.f32 0.0, %v2926_v1 }
 0x2bc   :  { %v3405_v0 = vpop.permute.xlu1 %1091  ;;  %v3407_v55 = vmul.f32 %v1254_v52, %v1115_v4 }
 0x2bd   :  { %v3409_v5 = vpop.permute.xlu0 %1089 }
 0x2c0   :  { %v3411_v12 = vpop.permute.xlu1 %1095 }
 0x2c1   :  { %v3413_v2 = vpop.permute.xlu0 %1093 }
 0x2c4   :  { %v1154_v21 = vpop.permute.xlu1 %1153 }
 0x2c5   :  { %v3417_v54 = vmul.f32 %v1154_v21, %v1122_v42  ;;  %v1152_v33 = vpop.permute.xlu0 %1151  ;;  %v1127_v21 = vsub.f32 0.0, %v2959_v40 }
 0x2c6   :  { %v3419_v8 = vmul.f32 %v1152_v33, %v1121_v25 }
 0x2c7   :  { %v1356_v48 = vmul.f32 %v3243_v63, %v3417_v54  ;;  %v1126_v63 = vsub.f32 0.0, %v2940_v44 }
 0x2c8   :  { %v1355_v53 = vmul.f32 %v3235_v27, %v3419_v8  ;;  %v1158_v11 = vpop.permute.xlu1 %1157  ;;  %v1125_v27 = vsub.f32 0.0, %v2942_v13 }
 0x2c9   :  { %v1380_v26 = vrot.slane %v1356_v48, 7  ;;  %v3427_v52 = vmul.f32 %v1158_v11, %v1124_v7  ;;  %v1156_v56 = vpop.permute.xlu0 %1155 }
 0x2ca   :  { %v1379_v29 = vrot.slane %v1355_v53, 7  ;;  %v3429_v43 = vmul.f32 %v1156_v56, %v1123_v18  ;;  %v1129_v18 = vsub.f32 0.0, %v2972_v32 }
 0x2cb   :  { %v1358_v31 = vmul.f32 %v3254_v17, %v3427_v52 }
 0x2cc   :  { %v1357_v19 = vmul.f32 %v3249_v16, %v3429_v43  ;;  %v1162_v51 = vpop.permute.xlu1 %1161  ;;  %1397 = vrot.lane.b32.xlu0 %v1379_v29, %s1845_s11  ;;  %v1381_v1 = vsel %vm35_vm0, %v1379_v29, %v1380_v26  ;;  %v1128_v16 = vsub.f32 0.0, %v2957_v10 }
 0x2cd   :  { %v1383_v24 = vrot.slane %v1358_v31, 7  ;;  %v3439_v28 = vmul.f32 %v1162_v51, %v1126_v63  ;;  %1399 = vrot.lane.b32.xlu1 %v1381_v1, %s1845_s11  ;;  %v1160_v6 = vpop.permute.xlu0 %1159  ;;  %v1131_v51 = vsub.f32 0.0, %v2983_v46 }
 0x2ce   :  { %v1382_v38 = vrot.slane %v1357_v19, 7  ;;  %v3442_v17 = vmul.f32 %v1160_v6, %v1125_v27 }
 0x2cf   :  { %v1360_v44 = vmul.f32 %v3263_v3, %v3439_v28 }
 0x2d0   :  { %v1359_v4 = vmul.f32 %v3259_v9, %v3442_v17  ;;  %v1166_v42 = vpop.permute.xlu1 %1165  ;;  %1401 = vrot.lane.b32.xlu0 %v1382_v38, %s1845_s11  ;;  %v1384_v13 = vsel %vm35_vm0, %v1382_v38, %v1383_v24  ;;  %v1130_v9 = vsub.f32 0.0, %v2970_v22 }
 0x2d1   :  { %v1386_v25 = vrot.slane %v1360_v44, 7  ;;  %v3452_v33 = vmul.f32 %v1166_v42, %v1128_v16  ;;  %1403 = vrot.lane.b32.xlu1 %v1384_v13, %s1845_s11  ;;  %v1164_v48 = vpop.permute.xlu0 %1163 }
 0x2d2   :  { %v1385_v7 = vrot.slane %v1359_v4, 7  ;;  %v3455_v3 = vmul.f32 %v1164_v48, %v1127_v21 }
 0x2d3   :  { %v1362_v10 = vmul.f32 %v3272_v14, %v3452_v33 }
 0x2d4   :  { %v1361_v53 = vmul.f32 %v3268_v50, %v3455_v3  ;;  %v1170_v11 = vpop.permute.xlu1 %1169  ;;  %1405 = vrot.lane.b32.xlu0 %v1385_v7, %s1845_s11  ;;  %v1387_v40 = vsel %vm35_vm0, %v1385_v7, %v1386_v25  ;;  %v1132_v50 = vsub.f32 0.0, %v2981_v34  ;;  %v1118_v34 = vmul.f32 %v3405_v0, %v2872_v61 }
 0x2d5   :  { %v1389_v26 = vrot.slane %v1362_v10, 7  ;;  %v3465_v56 = vmul.f32 %v1170_v11, %v1130_v9  ;;  %1407 = vrot.lane.b32.xlu1 %v1387_v40, %s1845_s11  ;;  %v1168_v29 = vpop.permute.xlu0 %1167 }
 0x2d6   :  { %v1388_v31 = vrot.slane %v1361_v53, 7  ;;  %v3468_v14 = vmul.f32 %v1168_v29, %v1129_v18 }
 0x2d7   :  { %v1364_v22 = vmul.f32 %v3278_v60, %v3465_v56 }
 0x2d8   :  { %v1363_v63 = vmul.f32 %v3275_v47, %v3468_v14  ;;  %v1174_v19 = vpop.permute.xlu1 %1173  ;;  %1409 = vrot.lane.b32.xlu0 %v1388_v31, %s1845_s11  ;;  %v1390_v32 = vsel %vm35_vm0, %v1388_v31, %v1389_v26  ;;  %v3868_v47 = vld [vmem:[#allocation12_spill] sm:$0xff] }
 0x2d9   :  { %v1392_v1 = vrot.slane %v1364_v22, 7  ;;  %v1198_v27 = vmul.f32 %v1174_v19, %v1132_v50  ;;  %1411 = vrot.lane.b32.xlu1 %v1390_v32, %s1845_s11  ;;  %v1172_v24 = vpop.permute.xlu0 %1171  ;;  %v1117_v44 = vmul.f32 %v3409_v5, %v3868_v47 }
 0x2da   :  { %v1391_v6 = vrot.slane %v1363_v63, 7  ;;  %v1197_v38 = vmul.f32 %v1172_v24, %v1131_v51 }
 0x2db   :  { %v1366_v60 = vmul.f32 %v3288_v49, %v1198_v27  ;;  %v1120_v49 = vmul.f32 %v3411_v12, %v2891_v58 }
 0x2dc   :  { %v1365_v16 = vmul.f32 %v3283_v30, %v1197_v38  ;;  %v1260_v4 = vpop.permute.xlu1 %1259  ;;  %1413 = vrot.lane.b32.xlu0 %v1391_v6, %s1845_s11  ;;  %v1393_v46 = vsel %vm35_vm0, %v1391_v6, %v1392_v1  ;;  %v1119_v30 = vmul.f32 %v3413_v2, %v2894_v35 }
 0x2dd   :  { %v1395_v42 = vrot.slane %v1366_v60, 7  ;;  %v3487_v13 = vmul.f32 %v1260_v4, %v1118_v34  ;;  %1415 = vrot.lane.b32.xlu1 %v1393_v46, %s1845_s11  ;;  %v1258_v21 = vpop.permute.xlu0 %1257 }
 0x2de   :  { %v1394_v25 = vrot.slane %v1365_v16, 7  ;;  %v3490_v61 = vmul.f32 %v1258_v21, %v1117_v44 }
 0x2e0   :  { %v1264_v0 = vpop.permute.xlu1 %1263  ;;  %1417 = vrot.lane.b32.xlu0 %v1394_v25, %s1845_s11  ;;  %v1396_v5 = vsel %vm35_vm0, %v1394_v25, %v1395_v42  ;;  %vm1789_vm0 = vcmask 57344  }
 0x2e1   :  { %v3498_v48 = vmul.f32 %v1264_v0, %v1120_v49  ;;  %1419 = vrot.lane.b32.xlu1 %v1396_v5, %s1845_s11  ;;  %v1262_v7 = vpop.permute.xlu0 %1261 }
 0x2e2   :  { %v3501_v10 = vmul.f32 %v1262_v7, %v1119_v30 }
 0x2e4   :  { %v1538_v9 = vpop.permute.xlu1 %1537  ;;  %1699 = vrot.lane.b32.xlu0 %v3359_v23, %s1843_s0 }
 0x2e5   :  { %1701 = vrot.lane.b32.xlu1 %v1677_v15, %s1843_s0  ;;  %v1536_v58 = vpop.permute.xlu0 %1535  ;;  %v1572_v23 = vmul.f32 %v1538_v9, %v3417_v54 }
 0x2e6   :  { %v1571_v39 = vmul.f32 %v1536_v58, %v3419_v8 }
 0x2e8   :  { %v1542_v35 = vpop.permute.xlu1 %1541 }
 0x2e9   :  { %v1540_v12 = vpop.permute.xlu0 %1539  ;;  %v1574_v51 = vmul.f32 %v1542_v35, %v3427_v52 }
 0x2ea   :  { %v1573_v24 = vmul.f32 %v1540_v12, %v3429_v43 }
 0x2ec   :  { %v1546_v2 = vpop.permute.xlu1 %1545 }
 0x2ed   :  { %v1544_v53 = vpop.permute.xlu0 %1543  ;;  %v1576_v54 = vmul.f32 %v1546_v2, %v3439_v28 }
 0x2ee   :  { %v1575_v47 = vmul.f32 %v1544_v53, %v3442_v17  ;;  %v3869_v53 = vld [vmem:[#allocation34_spill] sm:$0xff] }
 0x2f0   :  { %v1550_v11 = vpop.permute.xlu1 %1549 }
 0x2f1   :  { %v1548_v40 = vpop.permute.xlu0 %1547  ;;  %v1578_v46 = vmul.f32 %v1550_v11, %v3452_v33  ;;  %v3870_v11 = vld [vmem:[#allocation33_spill] sm:$0xff] }
 0x2f2   :  { %v1577_v21 = vmul.f32 %v1548_v40, %v3455_v3  ;;  %v3871_v40 = vld [vmem:[#allocation28_spill] sm:$0xff] }
 0x2f4   :  { %v1554_v18 = vpop.permute.xlu1 %1553 }
 0x2f5   :  { %v1552_v26 = vpop.permute.xlu0 %1551  ;;  %v1580_v0 = vmul.f32 %v1554_v18, %v3465_v56  ;;  %v1109_v56 = vmul.f32 %v3390_v37, %v3869_v53  ;;  %v1111_v18 = vmul.f32 %v3394_v41, %v3871_v40  ;;  %v3876_v41 = vld [vmem:[#allocation15_spill] sm:$0xff] }
 0x2f6   :  { %v1579_v7 = vmul.f32 %v1552_v26, %v3468_v14  ;;  %v1110_v14 = vmul.f32 %v3388_v59, %v3870_v11 }
 0x2f7   :  { %v1277_v26 = vmul.f32 %v3198_v45, %v1109_v56 }
 0x2f8   :  { %v1558_v29 = vpop.permute.xlu1 %1557 }
 0x2f9   :  { %v3508_v31 = vmul.f32 %v1558_v29, %v1198_v27  ;;  %v1556_v22 = vpop.permute.xlu0 %1555  ;;  %v3872_v29 = vld [vmem:[#allocation27_spill] sm:$0xff] }
 0x2fa   :  { %v3510_v50 = vmul.f32 %v1556_v22, %v1197_v38  ;;  %v1112_v22 = vmul.f32 %v3392_v20, %v3872_v29 }
 0x2fc   :  { %v1682_v15 = vpop.permute.xlu1 %1681 }
 0x2fd   :  { %v1716_v63 = vadd.f32 %v1682_v15, %v1572_v23  ;;  %v1680_v19 = vpop.permute.xlu0 %1679 }
 0x2fe   :  { %v1715_v32 = vadd.f32 %v1680_v19, %v1571_v39  ;;  %v3873_v39 = vld [vmem:[#allocation13_spill] sm:$0xff] }
 0x2ff   :  { %v1728_v1 = vsub.f32 0.0, %v1716_v63  ;;  %v1278_v15 = vmul.f32 %v3873_v39, %v1110_v14 }
 0x300   :  { %v1727_v6 = vsub.f32 0.0, %v1715_v32  ;;  %v1686_v34 = vpop.permute.xlu1 %1685 }
 0x301   :  { %v1718_v27 = vadd.f32 %v1686_v34, %v1574_v51  ;;  %1753 = vrot.lane.b32.xlu1 %v1728_v1, %s1843_s0  ;;  %v1684_v38 = vpop.permute.xlu0 %1683  ;;  %v3874_v51 = vld [vmem:[#allocation11_spill] sm:$0xff] }
 0x302   :  { %v1717_v60 = vadd.f32 %v1684_v38, %v1573_v24  ;;  %1751 = vrot.lane.b32.xlu0 %v1727_v6, %s1843_s0  ;;  %v1113_v37 = vmul.f32 %v3397_v57, %v3874_v51  ;;  %v3875_v24 = vld [vmem:[#allocation14_spill] sm:$0xff] }
 0x303   :  { %v1730_v8 = vsub.f32 0.0, %v1718_v27  ;;  %v1279_v59 = vmul.f32 %v3875_v24, %v1111_v18  ;;  %v1280_v27 = vmul.f32 %v3876_v41, %v1112_v22 }
 0x304   :  { %v1729_v44 = vsub.f32 0.0, %v1717_v60  ;;  %v1690_v16 = vpop.permute.xlu1 %1689 }
 0x305   :  { %v1720_v52 = vadd.f32 %v1690_v16, %v1576_v54  ;;  %1757 = vrot.lane.b32.xlu1 %v1730_v8, %s1843_s0  ;;  %v1688_v43 = vpop.permute.xlu0 %1687  ;;  %v3877_v54 = vld [vmem:[#allocation8_spill] sm:$0xff] }
 0x306   :  { %v1719_v4 = vadd.f32 %v1688_v43, %v1575_v47  ;;  %1755 = vrot.lane.b32.xlu0 %v1729_v44, %s1843_s0  ;;  %v1281_v8 = vmul.f32 %v3877_v54, %v1113_v37 }
 0x307   :  { %v1732_v42 = vsub.f32 0.0, %v1720_v52 }
 0x308   :  { %v1731_v25 = vsub.f32 0.0, %v1719_v4  ;;  %v1694_v49 = vpop.permute.xlu1 %1693 }
 0x309   :  { %v1722_v28 = vadd.f32 %v1694_v49, %v1578_v46  ;;  %1761 = vrot.lane.b32.xlu1 %v1732_v42, %s1843_s0  ;;  %v1692_v17 = vpop.permute.xlu0 %1691 }
 0x30a   :  { %v1721_v30 = vadd.f32 %v1692_v17, %v1577_v21  ;;  %1759 = vrot.lane.b32.xlu0 %v1731_v25, %s1843_s0 }
 0x30b   :  { %v1734_v5 = vsub.f32 0.0, %v1722_v28 }
 0x30c   :  { %v1733_v9 = vsub.f32 0.0, %v1721_v30  ;;  %v1698_v58 = vpop.permute.xlu1 %1697 }
 0x30d   :  { %v1724_v33 = vadd.f32 %v1698_v58, %v1580_v0  ;;  %1765 = vrot.lane.b32.xlu1 %v1734_v5, %s1843_s0  ;;  %v1696_v3 = vpop.permute.xlu0 %1695 }
 0x30e   :  { %v1723_v35 = vadd.f32 %v1696_v3, %v1579_v7  ;;  %1763 = vrot.lane.b32.xlu0 %v1733_v9, %s1843_s0 }
 0x30f   :  { %v1736_v12 = vsub.f32 0.0, %v1724_v33 }
 0x310   :  { %v1735_v2 = vsub.f32 0.0, %v1723_v35 }
 0x311   :  { %1769 = vrot.lane.b32.xlu1 %v1736_v12, %s1843_s0 }
 0x312   :  { %1767 = vrot.lane.b32.xlu0 %v1735_v2, %s1843_s0 }
 0x33e   :  { %v1398_v23 = vpop.permute.xlu0 %1397 }
 0x33f   :  { %v1433_v63 = vadd.f32 %v1398_v23, %v1277_v26  ;;  %v1400_v19 = vpop.permute.xlu1 %1399 }
 0x340   :  { %v1434_v32 = vadd.f32 %v1400_v19, %v1278_v15 }
 0x341   :  { %v1445_v1 = vsub.f32 0.0, %v1433_v63 }
 0x342   :  { %v1446_v6 = vsub.f32 0.0, %v1434_v32  ;;  %v1402_v34 = vpop.permute.xlu0 %1401 }
 0x343   :  { %v1435_v45 = vadd.f32 %v1402_v34, %v1279_v59  ;;  %v1404_v38 = vpop.permute.xlu1 %1403  ;;  %1469 = vrot.lane.b32.xlu0 %v1445_v1, %s1846_s1 }
 0x344   :  { %v1436_v20 = vadd.f32 %v1404_v38, %v1280_v27  ;;  %1471 = vrot.lane.b32.xlu1 %v1446_v6, %s1846_s1 }
 0x345   :  { %v1447_v60 = vsub.f32 0.0, %v1435_v45 }
 0x346   :  { %v1448_v47 = vsub.f32 0.0, %v1436_v20  ;;  %v1406_v57 = vpop.permute.xlu0 %1405 }
 0x347   :  { %v1437_v44 = vadd.f32 %v1406_v57, %v1281_v8  ;;  %v1408_v16 = vpop.permute.xlu1 %1407  ;;  %1473 = vrot.lane.b32.xlu0 %v1447_v60, %s1846_s1 }
 0x348   :  { %v1438_v52 = vadd.f32 %v1408_v16, %v3399_v62  ;;  %1475 = vrot.lane.b32.xlu1 %v1448_v47, %s1846_s1 }
 0x349   :  { %v1449_v43 = vsub.f32 0.0, %v1437_v44 }
 0x34a   :  { %v1450_v4 = vsub.f32 0.0, %v1438_v52  ;;  %v1410_v46 = vpop.permute.xlu0 %1409 }
 0x34b   :  { %v1439_v42 = vadd.f32 %v1410_v46, %v3407_v55  ;;  %v1412_v21 = vpop.permute.xlu1 %1411  ;;  %1477 = vrot.lane.b32.xlu0 %v1449_v43, %s1846_s1 }
 0x34c   :  { %v1440_v25 = vadd.f32 %v1412_v21, %v3403_v36  ;;  %1479 = vrot.lane.b32.xlu1 %v1450_v4, %s1846_s1 }
 0x34d   :  { %v1451_v49 = vsub.f32 0.0, %v1439_v42 }
 0x34e   :  { %v1452_v28 = vsub.f32 0.0, %v1440_v25  ;;  %v1414_v17 = vpop.permute.xlu0 %1413 }
 0x34f   :  { %v1441_v30 = vadd.f32 %v1414_v17, %v3490_v61  ;;  %v1416_v62 = vpop.permute.xlu1 %1415  ;;  %1481 = vrot.lane.b32.xlu0 %v1451_v49, %s1846_s1 }
 0x350   :  { %v1442_v0 = vadd.f32 %v1416_v62, %v3487_v13  ;;  %1483 = vrot.lane.b32.xlu1 %v1452_v28, %s1846_s1 }
 0x351   :  { %v1453_v55 = vsub.f32 0.0, %v1441_v30 }
 0x352   :  { %v1454_v5 = vsub.f32 0.0, %v1442_v0  ;;  %v1418_v7 = vpop.permute.xlu0 %1417 }
 0x353   :  { %v1443_v9 = vadd.f32 %v1418_v7, %v3501_v10  ;;  %v1420_v36 = vpop.permute.xlu1 %1419  ;;  %1485 = vrot.lane.b32.xlu0 %v1453_v55, %s1846_s1 }
 0x354   :  { %v1444_v58 = vadd.f32 %v1420_v36, %v3498_v48  ;;  %1487 = vrot.lane.b32.xlu1 %v1454_v5, %s1846_s1 }
 0x355   :  { %v1455_v61 = vsub.f32 0.0, %v1443_v9 }
 0x356   :  { %v1456_v33 = vsub.f32 0.0, %v1444_v58  ;;  %v1700_v3 = vpop.permute.xlu0 %1699 }
 0x357   :  { %v1725_v35 = vadd.f32 %v1700_v3, %v3510_v50  ;;  %v1702_v13 = vpop.permute.xlu1 %1701  ;;  %1489 = vrot.lane.b32.xlu0 %v1455_v61, %s1846_s1 }
 0x358   :  { %v1726_v12 = vadd.f32 %v1702_v13, %v3508_v31  ;;  %1491 = vrot.lane.b32.xlu1 %v1456_v33, %s1846_s1 }
 0x359   :  { %v1737_v10 = vsub.f32 0.0, %v1725_v35 }
 0x35a   :  { %v1738_v2 = vsub.f32 0.0, %v1726_v12 }
 0x35b   :  { %1771 = vrot.lane.b32.xlu0 %v1737_v10, %s1843_s0 }
 0x35c   :  { %1773 = vrot.lane.b32.xlu1 %v1738_v2, %s1843_s0 }
 0x373   :  { %v1754_v48 = vpop.permute.xlu1 %1753 }
 0x374   :  { %1790 = vst.msk [vmem:[%s3668_s3 + $0x7] sm:$0x1] %vm1789_vm0, %v1754_v48  ;;  %v1752_v50 = vpop.permute.xlu0 %1751 }
 0x375   :  { %1788 = vst.msk [vmem:[%s3668_s3 - $0x1] sm:$0xfe] %vm1787_vm1, %v1752_v50 }
 0x377   :  { %v1758_v31 = vpop.permute.xlu1 %1757 }
 0x378   :  { %1792 = vst.msk [vmem:[%s3668_s3 + $0xf] sm:$0x1] %vm1789_vm0, %v1758_v31  ;;  %v1756_v53 = vpop.permute.xlu0 %1755 }
 0x379   :  { %1791 = vst.msk [vmem:[%s3668_s3 + $0x7] sm:$0xfe] %vm1787_vm1, %v1756_v53 }
 0x37b   :  { %v1762_v56 = vpop.permute.xlu1 %1761 }
 0x37c   :  { %1794 = vst.msk [vmem:[%s3668_s3 + $0x17] sm:$0x1] %vm1789_vm0, %v1762_v56  ;;  %v1760_v11 = vpop.permute.xlu0 %1759 }
 0x37d   :  { %1793 = vst.msk [vmem:[%s3668_s3 + $0xf] sm:$0xfe] %vm1787_vm1, %v1760_v11 }
 0x37f   :  { %v1766_v14 = vpop.permute.xlu1 %1765 }
 0x380   :  { %1796 = vst.msk [vmem:[%s3668_s3 + $0x1f] sm:$0x1] %vm1789_vm0, %v1766_v14  ;;  %v1764_v40 = vpop.permute.xlu0 %1763 }
 0x381   :  { %1795 = vst.msk [vmem:[%s3668_s3 + $0x17] sm:$0xfe] %vm1787_vm1, %v1764_v40 }
 0x383   :  { %v1770_v18 = vpop.permute.xlu1 %1769 }
 0x384   :  { %1798 = vst.msk [vmem:[%s3668_s3 + $0x27] sm:$0x1] %vm1789_vm0, %v1770_v18  ;;  %v1768_v26 = vpop.permute.xlu0 %1767 }
 0x385   :  { %1797 = vst.msk [vmem:[%s3668_s3 + $0x1f] sm:$0xfe] %vm1787_vm1, %v1768_v26 }
 0x3b5   :  { %v1470_v29 = vpop.permute.xlu0 %1469 }
 0x3b6   :  { %1505 = vst.msk [vmem:[%s3669_s2 - $0x2] sm:$0xfc] %vm481_vm3, %v1470_v29  ;;  %v1472_v22 = vpop.permute.xlu1 %1471 }
 0x3b7   :  { %1506 = vst.msk [vmem:[%s3669_s2 + $0x6] sm:$0x3] %vm483_vm2, %v1472_v22 }
 0x3b9   :  { %v1474_v23 = vpop.permute.xlu0 %1473 }
 0x3ba   :  { %1507 = vst.msk [vmem:[%s3669_s2 + $0x6] sm:$0xfc] %vm481_vm3, %v1474_v23  ;;  %v1476_v39 = vpop.permute.xlu1 %1475 }
 0x3bb   :  { %1508 = vst.msk [vmem:[%s3669_s2 + $0xe] sm:$0x3] %vm483_vm2, %v1476_v39 }
 0x3bd   :  { %v1478_v15 = vpop.permute.xlu0 %1477 }
 0x3be   :  { %1509 = vst.msk [vmem:[%s3669_s2 + $0xe] sm:$0xfc] %vm481_vm3, %v1478_v15  ;;  %v1480_v63 = vpop.permute.xlu1 %1479 }
 0x3bf   :  { %1510 = vst.msk [vmem:[%s3669_s2 + $0x16] sm:$0x3] %vm483_vm2, %v1480_v63 }
 0x3c1   :  { %v1482_v19 = vpop.permute.xlu0 %1481 }
 0x3c2   :  { %1511 = vst.msk [vmem:[%s3669_s2 + $0x16] sm:$0xfc] %vm481_vm3, %v1482_v19  ;;  %v1484_v32 = vpop.permute.xlu1 %1483 }
 0x3c3   :  { %1512 = vst.msk [vmem:[%s3669_s2 + $0x1e] sm:$0x3] %vm483_vm2, %v1484_v32 }
 0x3c5   :  { %v1486_v51 = vpop.permute.xlu0 %1485 }
 0x3c6   :  { %1513 = vst.msk [vmem:[%s3669_s2 + $0x1e] sm:$0xfc] %vm481_vm3, %v1486_v51  ;;  %v1488_v37 = vpop.permute.xlu1 %1487 }
 0x3c7   :  { %1514 = vst.msk [vmem:[%s3669_s2 + $0x26] sm:$0x3] %vm483_vm2, %v1488_v37 }
 0x3c9   :  { %v1490_v1 = vpop.permute.xlu0 %1489 }
 0x3ca   :  { %1515 = vst.msk [vmem:[%s3669_s2 + $0x26] sm:$0xfc] %vm481_vm3, %v1490_v1  ;;  %v1492_v24 = vpop.permute.xlu1 %1491 }
 0x3cb   :  { %1516 = vst.msk [vmem:[%s3669_s2 + $0x2e] sm:$0x3] %vm483_vm2, %v1492_v24 }
 0x3cd   :  { %v1772_v59 = vpop.permute.xlu0 %1771 }
 0x3ce   :  { %1799 = vst.msk [vmem:[%s3668_s3 + $0x27] sm:$0xfe] %vm1787_vm1, %v1772_v59  ;;  %v1774_v6 = vpop.permute.xlu1 %1773 }
 0x3cf   :  { %1800 = vst.msk [vmem:[%s3668_s3 + $0x2f] sm:$0x1] %vm1789_vm0, %v1774_v6 }

</bundles_post_ra>
